<compile_context>
chip_gen: v7x
topology: tpu7x:2x2x1
jax: 0.10.0
libtpu: 0.0.40
codegen_flags: <defaults>
</compile_context>

<pallas_src>
import math

import numpy as np
import jax
import jax.numpy as jnp
from jax.experimental import pallas as pl
from jax.experimental.pallas import tpu as pltpu


# ----------------------------------------------------------------------------
# Deterministic parameter construction (plain numpy, module load time)
# ----------------------------------------------------------------------------

def gen_gauss_window(lw, sigma):
    """7-tap normalized Gaussian window (lw=3, sigma=7/6) used by BRISQUE."""
    sd = float(sigma) ** 2
    w = np.zeros(2 * lw + 1, dtype=np.float64)
    w[lw] = 1.0
    for i in range(1, lw + 1):
        t = np.exp(-0.5 * i * i / sd)
        w[lw + i] = t
        w[lw - i] = t
    return (w / w.sum()).astype(np.float32)


def _cubic(x):
    ax = np.abs(x)
    ax2 = ax * ax
    ax3 = ax2 * ax
    return ((1.5 * ax3 - 2.5 * ax2 + 1.0) * (ax <= 1) +
            (-0.5 * ax3 + 2.5 * ax2 - 4.0 * ax + 2.0) * ((ax > 1) & (ax <= 2)))


def imresize_matrix(in_length, scale):
    """MATLAB-style antialiased bicubic resize along one axis as a dense
    (out_length, in_length) matrix (so resize = Wh @ img @ Ww.T)."""
    out_length = int(np.ceil(in_length * scale))
    k_width = 4.0
    if scale < 1.0:
        h = lambda t: scale * _cubic(scale * t)
        kernel_width = k_width / scale
    else:
        h = _cubic
        kernel_width = k_width
    x = np.arange(1, out_length + 1, dtype=np.float64)
    u = x / scale + 0.5 * (1.0 - 1.0 / scale)
    left = np.floor(u - kernel_width / 2.0)
    P = int(np.ceil(kernel_width)) + 2
    indices = (left[:, None] + np.arange(P)[None, :] - 1).astype(np.int64)
    weights = h(u[:, None] - indices - 1)
    weights = weights / np.sum(weights, axis=1, keepdims=True)
    aux = np.concatenate((np.arange(in_length), np.arange(in_length - 1, -1, -1)))
    indices = aux[np.mod(indices, aux.size)]
    M = np.zeros((out_length, in_length), dtype=np.float32)
    for i in range(out_length):
        for j in range(P):
            M[i, indices[i, j]] += weights[i, j]
    return M


# AGGD lookup tables precomputed once in float64 numpy (perf review: no jnp
# gammaln / table construction per trace).
_GAM_F64 = np.arange(0.2, 10.0, 0.001)
_LGAMMA = np.vectorize(math.lgamma)
_G1 = np.exp(_LGAMMA(1.0 / _GAM_F64))
_G2 = np.exp(_LGAMMA(2.0 / _GAM_F64))
_G3 = np.exp(_LGAMMA(3.0 / _GAM_F64))
_GAM_TAB = _GAM_F64.astype(np.float32)                       # alpha candidates
_PREC_TAB = (_G2 ** 2 / (_G1 * _G3)).astype(np.float32)      # r(alpha) table
_AGGD_RATIO_TAB = (np.sqrt(_G1) / np.sqrt(_G3)).astype(np.float32)
_MEAN_RATIO_TAB = (_G2 / _G1).astype(np.float32)


_TOP = 8   # zero rows above the working region (>=3 for the 7-tap conv,
           # >=1 for the vertical neighbor shift; 8 keeps buffers aligned)
_BOT = 8   # zero rows below the working region (>=3 for the conv)


def _round_up(n, m):
    return ((n + m - 1) // m) * m


def _work_dims(h, w):
    # Working region: sublane-aligned height; lane-aligned width with >=3 zero
    # pad columns on the right (needed by the wrapping lane rolls of the conv).
    return _round_up(h, 8), _round_up(w + 3, 128)


# ----------------------------------------------------------------------------
# Pallas kernel: MSCN + sub-band statistics for both scales (fused)
# ----------------------------------------------------------------------------

def _emit_stats(out_ref, row, sb):
    """Write the 4 AGGD input sums of one sub-band map to SMEM.

    Row-blocked partial sums (pure VPU vreg adds over the leading axis) first,
    then a single small (8, Wp) cross-lane reduce per stat, instead of a
    full-map XLU reduce per stat."""
    hw, wp = sb.shape
    sb3 = sb.reshape(hw // 8, 8, wp)
    neg = jnp.minimum(sb3, 0.0)        # drops the explicit (x<0) mask multiply
    out_ref[row, 0] = jnp.sum(jnp.sum(neg * neg, axis=0))           # sum x^2, x<0
    out_ref[row, 1] = jnp.sum(jnp.sum((sb3 < 0.0).astype(jnp.float32), axis=0))
    out_ref[row, 2] = jnp.sum(jnp.sum(jnp.abs(sb3), axis=0))        # sum |x|
    out_ref[row, 3] = jnp.sum(jnp.sum(sb3 * sb3, axis=0))           # sum x^2


def _scale_mscn_stats(x_ref, m_ref, out_ref, base, H, W, Hw, Wp, w7):
    """MSCN transform + 5 sub-band statistics for one scale.

    x_ref : (TOP + Hw + BOT, Wp) zero-padded image; valid data at rows
            [TOP, TOP+H), cols [0, W).
    m_ref : (8 + Hw, Wp) VMEM scratch holding the MSCN map at rows [8, 8+Hw)
            with zero rows above, so the vertical neighbor shift is a plain
            shifted vector load instead of a sublane roll.
    """
    w0, w1, w2, w3 = w7[3], w7[4], w7[5], w7[6]

    # --- 7-tap separable Gaussian (zero boundary): E[x] and E[x^2] ----------
    # Row pass as shifted static slices of the zero-padded input (vld slot).
    xc = x_ref[_TOP:_TOP + Hw, :]
    acc1 = xc * w0
    acc2 = (xc * xc) * w0
    for d, wd in ((1, w1), (2, w2), (3, w3)):
        up = x_ref[_TOP - d:_TOP - d + Hw, :]        # x[i-d]
        dn = x_ref[_TOP + d:_TOP + d + Hw, :]        # x[i+d]
        acc1 = acc1 + wd * (up + dn)
        acc2 = acc2 + wd * (up * up + dn * dn)
    # Column pass as lane rolls; the >=3 zero pad columns implement the zero
    # boundary (garbage written into the pad columns is masked out of m below).
    mu = acc1 * w0
    e2 = acc2 * w0
    for d, wd in ((1, w1), (2, w2), (3, w3)):
        mu = mu + wd * (jnp.roll(acc1, d, axis=1) + jnp.roll(acc1, Wp - d, axis=1))
        e2 = e2 + wd * (jnp.roll(acc2, d, axis=1) + jnp.roll(acc2, Wp - d, axis=1))

    sigma = jnp.sqrt(jnp.abs(e2 - mu * mu))

    # Broadcastable boundary / validity masks (vectors, not full maps).
    rows = jax.lax.broadcasted_iota(jnp.int32, (Hw, 1), 0)
    cols = jax.lax.broadcasted_iota(jnp.int32, (1, Wp), 1)
    row_valid = (rows < H).astype(jnp.float32)
    col_valid = (cols < W).astype(jnp.float32)
    row0 = (rows == 0).astype(jnp.float32)
    col0 = (cols == 0).astype(jnp.float32)
    colL = (cols == (W - 1)).astype(jnp.float32)

    # MSCN map, zero-extended outside the valid (H, W) region.  The reciprocal
    # runs on the EUP (approx) instead of a VPU divide.
    m = (xc - mu) * pl.reciprocal(sigma + 1.0, approx=True)
    m = m * row_valid * col_valid

    # Stash the MSCN map so the vertical neighbor shift is a shifted slice
    # load; the 8 rows above it are zeroed once.
    m_ref[0:8, :] = jnp.zeros((8, Wp), jnp.float32)
    m_ref[8:8 + Hw, :] = m

    m_last_row = m_ref[8 + H - 1:8 + H, :]        # m[H-1, :]   (1, Wp)
    m_last_col = m[:, W - 1:W]                    # m[:, W-1]   (Hw, 1)

    # Band 0: the MSCN map itself.
    _emit_stats(out_ref, base + 0, m)

    # Band 1 (H): m[i, (j-1) mod W].  The base lane roll pulls a zero pad
    # column at j=0; the wrap line is patched with a rank-1 broadcast add.
    s1 = jnp.roll(m, 1, axis=1) + m_last_col * col0
    _emit_stats(out_ref, base + 1, s1 * m)

    # Band 2 (V): m[(i-1) mod H, j] as a shifted slice of the scratch (zero at
    # i=0) plus the row-0 wrap patch.
    s2 = m_ref[7:7 + Hw, :] + row0 * m_last_row
    _emit_stats(out_ref, base + 2, s2 * m)

    # Band 3 (D1): m[(i-1) mod H, (j-1) mod W] == horizontal wrap-shift of s2.
    s3 = jnp.roll(s2, 1, axis=1) + s2[:, W - 1:W] * col0
    _emit_stats(out_ref, base + 3, s3 * m)

    # Band 4 (D2): m[(i-1) mod H, (j+1) mod W] == left wrap-shift of s2.
    s4 = jnp.roll(s2, -1, axis=1) + s2[:, 0:1] * colL
    _emit_stats(out_ref, base + 4, s4 * m)


def _make_kernel(dims_full, dims_half, w7):
    Hf, Wf, Hwf, Wpf = dims_full
    Hh, Wh, Hwh, Wph = dims_half
    w7 = tuple(float(v) for v in w7)

    def kernel(xf_ref, xh_ref, out_ref, mf_ref, mh_ref):
        _scale_mscn_stats(xf_ref, mf_ref, out_ref, 0, Hf, Wf, Hwf, Wpf, w7)
        _scale_mscn_stats(xh_ref, mh_ref, out_ref, 5, Hh, Wh, Hwh, Wph, w7)

    return kernel


# ----------------------------------------------------------------------------
# AGGD fit + feature assembly (scalar glue, plain JAX + precomputed tables)
# ----------------------------------------------------------------------------

def _aggd_params(stats, n_pix):
    # stats rows: [sum x^2 (x<0), count(x<0), sum |x|, sum x^2]  per sub-band.
    s_l = stats[:, 0]
    n_l = stats[:, 1]
    s_abs = stats[:, 2]
    s_sq = stats[:, 3]
    n_r = n_pix - n_l                        # count(x>=0)
    s_r = jnp.maximum(s_sq - s_l, 0.0)       # sum x^2 over x>=0

    lms = jnp.where(n_l > 0, jnp.sqrt(s_l / jnp.maximum(n_l, 1.0)), 0.0)
    rms = jnp.where(n_r > 0, jnp.sqrt(s_r / jnp.maximum(n_r, 1.0)), 0.0)

    # TODO(synk): the reference uses np.inf in the degenerate (empty-partition)
    # branches; we keep the previous large finite stand-in.
    big = jnp.float32(1e30)
    gamma_hat = jnp.where(rms != 0.0, lms / jnp.where(rms != 0.0, rms, 1.0), big)
    mean_abs = s_abs / n_pix
    mean_sq = s_sq / n_pix
    r_hat = jnp.where(mean_sq != 0.0,
                      mean_abs ** 2 / jnp.where(mean_sq != 0.0, mean_sq, 1.0), big)
    rhat_norm = (r_hat * ((gamma_hat ** 3 + 1.0) * (gamma_hat + 1.0))
                 / (gamma_hat ** 2 + 1.0) ** 2)

    prec = jnp.asarray(_PREC_TAB)
    pos = jnp.argmin((prec[None, :] - rhat_norm[:, None]) ** 2, axis=1)
    alpha = jnp.asarray(_GAM_TAB)[pos]
    aggdratio = jnp.asarray(_AGGD_RATIO_TAB)[pos]      # sqrt(G(1/a)/G(3/a))
    bl = aggdratio * lms
    br = aggdratio * rms
    N = (br - bl) * jnp.asarray(_MEAN_RATIO_TAB)[pos]  # * G(2/a)/G(1/a)
    return alpha, N, bl, br


def _scale_feats(stats, n_pix):
    alpha, N, bl, br = _aggd_params(stats, n_pix)
    feats = [alpha[0], (bl[0] + br[0]) * 0.5]
    for i in range(1, 5):
        feats += [alpha[i], N[i], bl[i] ** 2, br[i] ** 2]
    return jnp.stack(feats)  # (18,)


# ----------------------------------------------------------------------------
# BRISQUE forward (equivalent of BRISQUE.forward / brisque())
# ----------------------------------------------------------------------------

def _vmem_limit_bytes():
    cap = None
    try:
        cap = getattr(pltpu.get_tpu_info(), "vmem_capacity_bytes", None)
    except Exception:
        cap = None
    if not cap:
        return 64 * 1024 * 1024          # conservative default (fits v7x)
    # Leave headroom for Mosaic internal scratch / DMA buffers:
    # 64 MiB parts (v7x) -> ~52 MiB; 128 MiB parts (v5e/v6e) -> 112 MiB.
    return int(max(32 * 1024 * 1024,
                   min(cap - 12 * 1024 * 1024, 112 * 1024 * 1024)))


def _pad_image(img, H, W, Hw, Wp):
    return jnp.pad(img, ((_TOP, Hw - H + _BOT), (0, Wp - W)))


def brisque_pallas(x):
    x = jnp.asarray(x, jnp.float32)
    H, W = x.shape

    # MATLAB-style antialiased bicubic 0.5x resize as a plain XLA matmul in the
    # glue (keeps the dense resize weights out of VMEM and the f32 matmul off
    # the kernel's critical path; the half image is 1/4 size so the extra HBM
    # round trip is noise).
    wh = jnp.asarray(imresize_matrix(H, 0.5))            # (H2, H)
    ww = jnp.asarray(imresize_matrix(W, 0.5))            # (W2, W)
    H2, W2 = wh.shape[0], ww.shape[0]
    half = jnp.dot(jnp.dot(wh, x, precision=jax.lax.Precision.HIGHEST),
                   ww.T, precision=jax.lax.Precision.HIGHEST)

    Hw, Wp = _work_dims(H, W)
    H2w, W2p = _work_dims(H2, W2)

    x_pad = _pad_image(x, H, W, Hw, Wp)
    h_pad = _pad_image(half, H2, W2, H2w, W2p)

    w7 = gen_gauss_window(3, 7.0 / 6.0)
    kernel = _make_kernel((H, W, Hw, Wp), (H2, W2, H2w, W2p), w7)

    stats = pl.pallas_call(
        kernel,
        out_shape=jax.ShapeDtypeStruct((10, 4), jnp.float32),
        in_specs=[pl.BlockSpec(memory_space=pltpu.MemorySpace.VMEM)] * 2,
        out_specs=pl.BlockSpec(memory_space=pltpu.MemorySpace.SMEM),
        scratch_shapes=[pltpu.VMEM((8 + Hw, Wp), jnp.float32),
                        pltpu.VMEM((8 + H2w, W2p), jnp.float32)],
        compiler_params=pltpu.CompilerParams(
            vmem_limit_bytes=_vmem_limit_bytes()),
    )(x_pad, h_pad)

    feats_full = _scale_feats(stats[:5], float(H * W))
    feats_half = _scale_feats(stats[5:], float(H2 * W2))
    return jnp.concatenate([feats_full, feats_half])  # (36,)


if __name__ == "__main__":
    key = jax.random.PRNGKey(0)
    # Small grayscale image (H, W) = (32, 32), values in [0, 255).
    x = jax.random.uniform(key, (32, 32), dtype=jnp.float32) * 255.0

    feats = jax.block_until_ready(jax.jit(brisque_pallas)(x))
    assert feats.shape == (36,), feats.shape
    assert bool(jnp.all(jnp.isfinite(feats)))
    print("KERNEL_OK")
</pallas_src>

<mosaic_0001>
module attributes {stable_mosaic.version = 11 : i64} {
  func.func @kernel(%arg0: memref<48x128xf32, #tpu.memory_space<vmem>>, %arg1: memref<32x128xf32, #tpu.memory_space<vmem>>, %arg2: memref<10x4xf32, #tpu.memory_space<smem>>, %arg3: memref<40x128xf32, #tpu.memory_space<vmem>>, %arg4: memref<24x128xf32, #tpu.memory_space<vmem>>) attributes {dimension_semantics = [], scalar_prefetch = 0 : i64, scratch_operands = 2 : i64, tpu.core_type = #tpu.core_type<tc>} {
    %c8 = arith.constant 8 : index
    %c0 = arith.constant 0 : index
    %0 = vector.load %arg0[%c8, %c0] : memref<48x128xf32, #tpu.memory_space<vmem>>, vector<32x128xf32>
    %cst = arith.constant 0.342631519 : f32
    %1 = vector.broadcast %cst : f32 to vector<32x128xf32>
    %2 = arith.mulf %0, %1 : vector<32x128xf32>
    %3 = arith.mulf %0, %0 : vector<32x128xf32>
    %cst_0 = arith.constant 0.342631519 : f32
    %4 = vector.broadcast %cst_0 : f32 to vector<32x128xf32>
    %5 = arith.mulf %3, %4 : vector<32x128xf32>
    %c7 = arith.constant 7 : index
    %c0_1 = arith.constant 0 : index
    %6 = vector.load %arg0[%c7, %c0_1] : memref<48x128xf32, #tpu.memory_space<vmem>>, vector<32x128xf32>
    %c9 = arith.constant 9 : index
    %c0_2 = arith.constant 0 : index
    %7 = vector.load %arg0[%c9, %c0_2] : memref<48x128xf32, #tpu.memory_space<vmem>>, vector<32x128xf32>
    %8 = arith.addf %6, %7 : vector<32x128xf32>
    %cst_3 = arith.constant 0.237296075 : f32
    %9 = vector.broadcast %cst_3 : f32 to vector<32x128xf32>
    %10 = arith.mulf %9, %8 : vector<32x128xf32>
    %11 = arith.addf %2, %10 : vector<32x128xf32>
    %12 = arith.mulf %6, %6 : vector<32x128xf32>
    %13 = arith.mulf %7, %7 : vector<32x128xf32>
    %14 = arith.addf %12, %13 : vector<32x128xf32>
    %cst_4 = arith.constant 0.237296075 : f32
    %15 = vector.broadcast %cst_4 : f32 to vector<32x128xf32>
    %16 = arith.mulf %15, %14 : vector<32x128xf32>
    %17 = arith.addf %5, %16 : vector<32x128xf32>
    %c6 = arith.constant 6 : index
    %c0_5 = arith.constant 0 : index
    %18 = vector.load %arg0[%c6, %c0_5] : memref<48x128xf32, #tpu.memory_space<vmem>>, vector<32x128xf32>
    %c10 = arith.constant 10 : index
    %c0_6 = arith.constant 0 : index
    %19 = vector.load %arg0[%c10, %c0_6] : memref<48x128xf32, #tpu.memory_space<vmem>>, vector<32x128xf32>
    %20 = arith.addf %18, %19 : vector<32x128xf32>
    %cst_7 = arith.constant 0.0788279623 : f32
    %21 = vector.broadcast %cst_7 : f32 to vector<32x128xf32>
    %22 = arith.mulf %21, %20 : vector<32x128xf32>
    %23 = arith.addf %11, %22 : vector<32x128xf32>
    %24 = arith.mulf %18, %18 : vector<32x128xf32>
    %25 = arith.mulf %19, %19 : vector<32x128xf32>
    %26 = arith.addf %24, %25 : vector<32x128xf32>
    %cst_8 = arith.constant 0.0788279623 : f32
    %27 = vector.broadcast %cst_8 : f32 to vector<32x128xf32>
    %28 = arith.mulf %27, %26 : vector<32x128xf32>
    %29 = arith.addf %17, %28 : vector<32x128xf32>
    %c5 = arith.constant 5 : index
    %c0_9 = arith.constant 0 : index
    %30 = vector.load %arg0[%c5, %c0_9] : memref<48x128xf32, #tpu.memory_space<vmem>>, vector<32x128xf32>
    %c11 = arith.constant 11 : index
    %c0_10 = arith.constant 0 : index
    %31 = vector.load %arg0[%c11, %c0_10] : memref<48x128xf32, #tpu.memory_space<vmem>>, vector<32x128xf32>
    %32 = arith.addf %30, %31 : vector<32x128xf32>
    %cst_11 = arith.constant 0.0125602009 : f32
    %33 = vector.broadcast %cst_11 : f32 to vector<32x128xf32>
    %34 = arith.mulf %33, %32 : vector<32x128xf32>
    %35 = arith.addf %23, %34 : vector<32x128xf32>
    %36 = arith.mulf %30, %30 : vector<32x128xf32>
    %37 = arith.mulf %31, %31 : vector<32x128xf32>
    %38 = arith.addf %36, %37 : vector<32x128xf32>
    %cst_12 = arith.constant 0.0125602009 : f32
    %39 = vector.broadcast %cst_12 : f32 to vector<32x128xf32>
    %40 = arith.mulf %39, %38 : vector<32x128xf32>
    %41 = arith.addf %29, %40 : vector<32x128xf32>
    %cst_13 = arith.constant 0.342631519 : f32
    %42 = vector.broadcast %cst_13 : f32 to vector<32x128xf32>
    %43 = arith.mulf %35, %42 : vector<32x128xf32>
    %cst_14 = arith.constant 0.342631519 : f32
    %44 = vector.broadcast %cst_14 : f32 to vector<32x128xf32>
    %45 = arith.mulf %41, %44 : vector<32x128xf32>
    %46 = vector.extract_strided_slice %35 {offsets = [0, 127], sizes = [32, 1], strides = [1, 1]} : vector<32x128xf32> to vector<32x1xf32>
    %47 = vector.extract_strided_slice %35 {offsets = [0, 0], sizes = [32, 127], strides = [1, 1]} : vector<32x128xf32> to vector<32x127xf32>
    %48 = tpu.concatenate %46, %47 in 1 : vector<32x1xf32>, vector<32x127xf32> -> vector<32x128xf32>
    %49 = vector.extract_strided_slice %35 {offsets = [0, 1], sizes = [32, 127], strides = [1, 1]} : vector<32x128xf32> to vector<32x127xf32>
    %50 = vector.extract_strided_slice %35 {offsets = [0, 0], sizes = [32, 1], strides = [1, 1]} : vector<32x128xf32> to vector<32x1xf32>
    %51 = tpu.concatenate %49, %50 in 1 : vector<32x127xf32>, vector<32x1xf32> -> vector<32x128xf32>
    %52 = arith.addf %48, %51 : vector<32x128xf32>
    %cst_15 = arith.constant 0.237296075 : f32
    %53 = vector.broadcast %cst_15 : f32 to vector<32x128xf32>
    %54 = arith.mulf %53, %52 : vector<32x128xf32>
    %55 = arith.addf %43, %54 : vector<32x128xf32>
    %56 = vector.extract_strided_slice %41 {offsets = [0, 127], sizes = [32, 1], strides = [1, 1]} : vector<32x128xf32> to vector<32x1xf32>
    %57 = vector.extract_strided_slice %41 {offsets = [0, 0], sizes = [32, 127], strides = [1, 1]} : vector<32x128xf32> to vector<32x127xf32>
    %58 = tpu.concatenate %56, %57 in 1 : vector<32x1xf32>, vector<32x127xf32> -> vector<32x128xf32>
    %59 = vector.extract_strided_slice %41 {offsets = [0, 1], sizes = [32, 127], strides = [1, 1]} : vector<32x128xf32> to vector<32x127xf32>
    %60 = vector.extract_strided_slice %41 {offsets = [0, 0], sizes = [32, 1], strides = [1, 1]} : vector<32x128xf32> to vector<32x1xf32>
    %61 = tpu.concatenate %59, %60 in 1 : vector<32x127xf32>, vector<32x1xf32> -> vector<32x128xf32>
    %62 = arith.addf %58, %61 : vector<32x128xf32>
    %cst_16 = arith.constant 0.237296075 : f32
    %63 = vector.broadcast %cst_16 : f32 to vector<32x128xf32>
    %64 = arith.mulf %63, %62 : vector<32x128xf32>
    %65 = arith.addf %45, %64 : vector<32x128xf32>
    %66 = vector.extract_strided_slice %35 {offsets = [0, 126], sizes = [32, 2], strides = [1, 1]} : vector<32x128xf32> to vector<32x2xf32>
    %67 = vector.extract_strided_slice %35 {offsets = [0, 0], sizes = [32, 126], strides = [1, 1]} : vector<32x128xf32> to vector<32x126xf32>
    %68 = tpu.concatenate %66, %67 in 1 : vector<32x2xf32>, vector<32x126xf32> -> vector<32x128xf32>
    %69 = vector.extract_strided_slice %35 {offsets = [0, 2], sizes = [32, 126], strides = [1, 1]} : vector<32x128xf32> to vector<32x126xf32>
    %70 = vector.extract_strided_slice %35 {offsets = [0, 0], sizes = [32, 2], strides = [1, 1]} : vector<32x128xf32> to vector<32x2xf32>
    %71 = tpu.concatenate %69, %70 in 1 : vector<32x126xf32>, vector<32x2xf32> -> vector<32x128xf32>
    %72 = arith.addf %68, %71 : vector<32x128xf32>
    %cst_17 = arith.constant 0.0788279623 : f32
    %73 = vector.broadcast %cst_17 : f32 to vector<32x128xf32>
    %74 = arith.mulf %73, %72 : vector<32x128xf32>
    %75 = arith.addf %55, %74 : vector<32x128xf32>
    %76 = vector.extract_strided_slice %41 {offsets = [0, 126], sizes = [32, 2], strides = [1, 1]} : vector<32x128xf32> to vector<32x2xf32>
    %77 = vector.extract_strided_slice %41 {offsets = [0, 0], sizes = [32, 126], strides = [1, 1]} : vector<32x128xf32> to vector<32x126xf32>
    %78 = tpu.concatenate %76, %77 in 1 : vector<32x2xf32>, vector<32x126xf32> -> vector<32x128xf32>
    %79 = vector.extract_strided_slice %41 {offsets = [0, 2], sizes = [32, 126], strides = [1, 1]} : vector<32x128xf32> to vector<32x126xf32>
    %80 = vector.extract_strided_slice %41 {offsets = [0, 0], sizes = [32, 2], strides = [1, 1]} : vector<32x128xf32> to vector<32x2xf32>
    %81 = tpu.concatenate %79, %80 in 1 : vector<32x126xf32>, vector<32x2xf32> -> vector<32x128xf32>
    %82 = arith.addf %78, %81 : vector<32x128xf32>
    %cst_18 = arith.constant 0.0788279623 : f32
    %83 = vector.broadcast %cst_18 : f32 to vector<32x128xf32>
    %84 = arith.mulf %83, %82 : vector<32x128xf32>
    %85 = arith.addf %65, %84 : vector<32x128xf32>
    %86 = vector.extract_strided_slice %35 {offsets = [0, 125], sizes = [32, 3], strides = [1, 1]} : vector<32x128xf32> to vector<32x3xf32>
    %87 = vector.extract_strided_slice %35 {offsets = [0, 0], sizes = [32, 125], strides = [1, 1]} : vector<32x128xf32> to vector<32x125xf32>
    %88 = tpu.concatenate %86, %87 in 1 : vector<32x3xf32>, vector<32x125xf32> -> vector<32x128xf32>
    %89 = vector.extract_strided_slice %35 {offsets = [0, 3], sizes = [32, 125], strides = [1, 1]} : vector<32x128xf32> to vector<32x125xf32>
    %90 = vector.extract_strided_slice %35 {offsets = [0, 0], sizes = [32, 3], strides = [1, 1]} : vector<32x128xf32> to vector<32x3xf32>
    %91 = tpu.concatenate %89, %90 in 1 : vector<32x125xf32>, vector<32x3xf32> -> vector<32x128xf32>
    %92 = arith.addf %88, %91 : vector<32x128xf32>
    %cst_19 = arith.constant 0.0125602009 : f32
    %93 = vector.broadcast %cst_19 : f32 to vector<32x128xf32>
    %94 = arith.mulf %93, %92 : vector<32x128xf32>
    %95 = arith.addf %75, %94 : vector<32x128xf32>
    %96 = vector.extract_strided_slice %41 {offsets = [0, 125], sizes = [32, 3], strides = [1, 1]} : vector<32x128xf32> to vector<32x3xf32>
    %97 = vector.extract_strided_slice %41 {offsets = [0, 0], sizes = [32, 125], strides = [1, 1]} : vector<32x128xf32> to vector<32x125xf32>
    %98 = tpu.concatenate %96, %97 in 1 : vector<32x3xf32>, vector<32x125xf32> -> vector<32x128xf32>
    %99 = vector.extract_strided_slice %41 {offsets = [0, 3], sizes = [32, 125], strides = [1, 1]} : vector<32x128xf32> to vector<32x125xf32>
    %100 = vector.extract_strided_slice %41 {offsets = [0, 0], sizes = [32, 3], strides = [1, 1]} : vector<32x128xf32> to vector<32x3xf32>
    %101 = tpu.concatenate %99, %100 in 1 : vector<32x125xf32>, vector<32x3xf32> -> vector<32x128xf32>
    %102 = arith.addf %98, %101 : vector<32x128xf32>
    %cst_20 = arith.constant 0.0125602009 : f32
    %103 = vector.broadcast %cst_20 : f32 to vector<32x128xf32>
    %104 = arith.mulf %103, %102 : vector<32x128xf32>
    %105 = arith.addf %85, %104 : vector<32x128xf32>
    %106 = arith.mulf %95, %95 : vector<32x128xf32>
    %107 = arith.subf %105, %106 : vector<32x128xf32>
    %108 = math.absf %107 : vector<32x128xf32>
    %109 = math.sqrt %108 : vector<32x128xf32>
    %110 = tpu.iota {dimensions = array<i32: 0>} : vector<32x1xi32>
    %111 = tpu.iota {dimensions = array<i32: 1>} : vector<1x128xi32>
    %c32_i32 = arith.constant 32 : i32
    %112 = vector.broadcast %c32_i32 : i32 to vector<32x1xi32>
    %113 = arith.cmpi slt, %110, %112 : vector<32x1xi32>
    %114 = arith.extui %113 : vector<32x1xi1> to vector<32x1xi32>
    %115 = arith.sitofp %114 : vector<32x1xi32> to vector<32x1xf32>
    %c32_i32_21 = arith.constant 32 : i32
    %116 = vector.broadcast %c32_i32_21 : i32 to vector<1x128xi32>
    %117 = arith.cmpi slt, %111, %116 : vector<1x128xi32>
    %118 = arith.extui %117 : vector<1x128xi1> to vector<1x128xi32>
    %119 = arith.sitofp %118 : vector<1x128xi32> to vector<1x128xf32>
    %c0_i32 = arith.constant 0 : i32
    %120 = vector.broadcast %c0_i32 : i32 to vector<32x1xi32>
    %121 = arith.cmpi eq, %110, %120 : vector<32x1xi32>
    %122 = arith.extui %121 : vector<32x1xi1> to vector<32x1xi32>
    %123 = arith.sitofp %122 : vector<32x1xi32> to vector<32x1xf32>
    %c0_i32_22 = arith.constant 0 : i32
    %124 = vector.broadcast %c0_i32_22 : i32 to vector<1x128xi32>
    %125 = arith.cmpi eq, %111, %124 : vector<1x128xi32>
    %126 = arith.extui %125 : vector<1x128xi1> to vector<1x128xi32>
    %127 = arith.sitofp %126 : vector<1x128xi32> to vector<1x128xf32>
    %c31_i32 = arith.constant 31 : i32
    %128 = vector.broadcast %c31_i32 : i32 to vector<1x128xi32>
    %129 = arith.cmpi eq, %111, %128 : vector<1x128xi32>
    %130 = arith.extui %129 : vector<1x128xi1> to vector<1x128xi32>
    %131 = arith.sitofp %130 : vector<1x128xi32> to vector<1x128xf32>
    %132 = arith.subf %0, %95 : vector<32x128xf32>
    %cst_23 = arith.constant 1.000000e+00 : f32
    %133 = vector.broadcast %cst_23 : f32 to vector<32x128xf32>
    %134 = arith.addf %109, %133 : vector<32x128xf32>
    %135 = tpu.reciprocal %134 {approx = true} : vector<32x128xf32> -> vector<32x128xf32>
    %136 = arith.mulf %132, %135 : vector<32x128xf32>
    %137 = vector.broadcast %115 : vector<32x1xf32> to vector<32x128xf32>
    %138 = arith.mulf %136, %137 : vector<32x128xf32>
    %139 = vector.broadcast %119 : vector<1x128xf32> to vector<32x128xf32>
    %140 = arith.mulf %138, %139 : vector<32x128xf32>
    %cst_24 = arith.constant 0.000000e+00 : f32
    %141 = vector.broadcast %cst_24 : f32 to vector<8x128xf32>
    %c0_25 = arith.constant 0 : index
    %c0_26 = arith.constant 0 : index
    %142 = vector.load %arg3[%c0_25, %c0_26] : memref<40x128xf32, #tpu.memory_space<vmem>>, vector<8x128xf32>
    tpu.vector_store %arg3[%c0_25, %c0_26], %141 {strides = array<i32>} : memref<40x128xf32, #tpu.memory_space<vmem>>, vector<8x128xf32>,
    %c8_27 = arith.constant 8 : index
    %c0_28 = arith.constant 0 : index
    %143 = vector.load %arg3[%c8_27, %c0_28] : memref<40x128xf32, #tpu.memory_space<vmem>>, vector<32x128xf32>
    tpu.vector_store %arg3[%c8_27, %c0_28], %140 {strides = array<i32>} : memref<40x128xf32, #tpu.memory_space<vmem>>, vector<32x128xf32>,
    %c39 = arith.constant 39 : index
    %c0_29 = arith.constant 0 : index
    %144 = vector.load %arg3[%c39, %c0_29] : memref<40x128xf32, #tpu.memory_space<vmem>>, vector<1x128xf32>
    %145 = vector.extract_strided_slice %140 {offsets = [0, 31], sizes = [32, 1], strides = [1, 1]} : vector<32x128xf32> to vector<32x1xf32>
    %146 = vector.shape_cast %140 : vector<32x128xf32> to vector<4x8x128xf32>
    %cst_30 = arith.constant 0.000000e+00 : f32
    %147 = vector.broadcast %cst_30 : f32 to vector<4x8x128xf32>
    %148 = arith.minimumf %146, %147 : vector<4x8x128xf32>
    %149 = arith.mulf %148, %148 : vector<4x8x128xf32>
    %cst_31 = arith.constant dense<0.000000e+00> : vector<8x128xf32>
    %150 = vector.multi_reduction <add>, %149, %cst_31 [0] : vector<4x8x128xf32> to vector<8x128xf32>
    %151 = vector.shape_cast %150 : vector<8x128xf32> to vector<1x8x128xf32>
    %cst_32 = arith.constant dense<0.000000e+00> : vector<1xf32>
    %152 = vector.multi_reduction <add>, %151, %cst_32 [1, 2] : vector<1x8x128xf32> to vector<1xf32>
    %153 = vector.shape_cast %152 : vector<1xf32> to vector<1x1x1xf32>
    %154 = vector.extract %153[0, 0, 0] : f32 from vector<1x1x1xf32>
    %c0_33 = arith.constant 0 : index
    %c0_34 = arith.constant 0 : index
    %155 = memref.load %arg2[%c0_33, %c0_34] : memref<10x4xf32, #tpu.memory_space<smem>>
    memref.store %154, %arg2[%c0_33, %c0_34] : memref<10x4xf32, #tpu.memory_space<smem>>
    %cst_35 = arith.constant 0.000000e+00 : f32
    %156 = vector.broadcast %cst_35 : f32 to vector<4x8x128xf32>
    %157 = arith.cmpf olt, %146, %156 : vector<4x8x128xf32>
    %158 = arith.extui %157 : vector<4x8x128xi1> to vector<4x8x128xi32>
    %159 = arith.sitofp %158 : vector<4x8x128xi32> to vector<4x8x128xf32>
    %cst_36 = arith.constant dense<0.000000e+00> : vector<8x128xf32>
    %160 = vector.multi_reduction <add>, %159, %cst_36 [0] : vector<4x8x128xf32> to vector<8x128xf32>
    %161 = vector.shape_cast %160 : vector<8x128xf32> to vector<1x8x128xf32>
    %cst_37 = arith.constant dense<0.000000e+00> : vector<1xf32>
    %162 = vector.multi_reduction <add>, %161, %cst_37 [1, 2] : vector<1x8x128xf32> to vector<1xf32>
    %163 = vector.shape_cast %162 : vector<1xf32> to vector<1x1x1xf32>
    %164 = vector.extract %163[0, 0, 0] : f32 from vector<1x1x1xf32>
    %c0_38 = arith.constant 0 : index
    %c1 = arith.constant 1 : index
    %165 = memref.load %arg2[%c0_38, %c1] : memref<10x4xf32, #tpu.memory_space<smem>>
    memref.store %164, %arg2[%c0_38, %c1] : memref<10x4xf32, #tpu.memory_space<smem>>
    %166 = math.absf %146 : vector<4x8x128xf32>
    %cst_39 = arith.constant dense<0.000000e+00> : vector<8x128xf32>
    %167 = vector.multi_reduction <add>, %166, %cst_39 [0] : vector<4x8x128xf32> to vector<8x128xf32>
    %168 = vector.shape_cast %167 : vector<8x128xf32> to vector<1x8x128xf32>
    %cst_40 = arith.constant dense<0.000000e+00> : vector<1xf32>
    %169 = vector.multi_reduction <add>, %168, %cst_40 [1, 2] : vector<1x8x128xf32> to vector<1xf32>
    %170 = vector.shape_cast %169 : vector<1xf32> to vector<1x1x1xf32>
    %171 = vector.extract %170[0, 0, 0] : f32 from vector<1x1x1xf32>
    %c0_41 = arith.constant 0 : index
    %c2 = arith.constant 2 : index
    %172 = memref.load %arg2[%c0_41, %c2] : memref<10x4xf32, #tpu.memory_space<smem>>
    memref.store %171, %arg2[%c0_41, %c2] : memref<10x4xf32, #tpu.memory_space<smem>>
    %173 = arith.mulf %146, %146 : vector<4x8x128xf32>
    %cst_42 = arith.constant dense<0.000000e+00> : vector<8x128xf32>
    %174 = vector.multi_reduction <add>, %173, %cst_42 [0] : vector<4x8x128xf32> to vector<8x128xf32>
    %175 = vector.shape_cast %174 : vector<8x128xf32> to vector<1x8x128xf32>
    %cst_43 = arith.constant dense<0.000000e+00> : vector<1xf32>
    %176 = vector.multi_reduction <add>, %175, %cst_43 [1, 2] : vector<1x8x128xf32> to vector<1xf32>
    %177 = vector.shape_cast %176 : vector<1xf32> to vector<1x1x1xf32>
    %178 = vector.extract %177[0, 0, 0] : f32 from vector<1x1x1xf32>
    %c0_44 = arith.constant 0 : index
    %c3 = arith.constant 3 : index
    %179 = memref.load %arg2[%c0_44, %c3] : memref<10x4xf32, #tpu.memory_space<smem>>
    memref.store %178, %arg2[%c0_44, %c3] : memref<10x4xf32, #tpu.memory_space<smem>>
    %180 = vector.extract_strided_slice %140 {offsets = [0, 127], sizes = [32, 1], strides = [1, 1]} : vector<32x128xf32> to vector<32x1xf32>
    %181 = vector.extract_strided_slice %140 {offsets = [0, 0], sizes = [32, 127], strides = [1, 1]} : vector<32x128xf32> to vector<32x127xf32>
    %182 = tpu.concatenate %180, %181 in 1 : vector<32x1xf32>, vector<32x127xf32> -> vector<32x128xf32>
    %183 = vector.broadcast %145 : vector<32x1xf32> to vector<32x128xf32>
    %184 = vector.broadcast %127 : vector<1x128xf32> to vector<32x128xf32>
    %185 = arith.mulf %183, %184 : vector<32x128xf32>
    %186 = arith.addf %182, %185 : vector<32x128xf32>
    %187 = arith.mulf %186, %140 : vector<32x128xf32>
    %188 = vector.shape_cast %187 : vector<32x128xf32> to vector<4x8x128xf32>
    %cst_45 = arith.constant 0.000000e+00 : f32
    %189 = vector.broadcast %cst_45 : f32 to vector<4x8x128xf32>
    %190 = arith.minimumf %188, %189 : vector<4x8x128xf32>
    %191 = arith.mulf %190, %190 : vector<4x8x128xf32>
    %cst_46 = arith.constant dense<0.000000e+00> : vector<8x128xf32>
    %192 = vector.multi_reduction <add>, %191, %cst_46 [0] : vector<4x8x128xf32> to vector<8x128xf32>
    %193 = vector.shape_cast %192 : vector<8x128xf32> to vector<1x8x128xf32>
    %cst_47 = arith.constant dense<0.000000e+00> : vector<1xf32>
    %194 = vector.multi_reduction <add>, %193, %cst_47 [1, 2] : vector<1x8x128xf32> to vector<1xf32>
    %195 = vector.shape_cast %194 : vector<1xf32> to vector<1x1x1xf32>
    %196 = vector.extract %195[0, 0, 0] : f32 from vector<1x1x1xf32>
    %c1_48 = arith.constant 1 : index
    %c0_49 = arith.constant 0 : index
    %197 = memref.load %arg2[%c1_48, %c0_49] : memref<10x4xf32, #tpu.memory_space<smem>>
    memref.store %196, %arg2[%c1_48, %c0_49] : memref<10x4xf32, #tpu.memory_space<smem>>
    %cst_50 = arith.constant 0.000000e+00 : f32
    %198 = vector.broadcast %cst_50 : f32 to vector<4x8x128xf32>
    %199 = arith.cmpf olt, %188, %198 : vector<4x8x128xf32>
    %200 = arith.extui %199 : vector<4x8x128xi1> to vector<4x8x128xi32>
    %201 = arith.sitofp %200 : vector<4x8x128xi32> to vector<4x8x128xf32>
    %cst_51 = arith.constant dense<0.000000e+00> : vector<8x128xf32>
    %202 = vector.multi_reduction <add>, %201, %cst_51 [0] : vector<4x8x128xf32> to vector<8x128xf32>
    %203 = vector.shape_cast %202 : vector<8x128xf32> to vector<1x8x128xf32>
    %cst_52 = arith.constant dense<0.000000e+00> : vector<1xf32>
    %204 = vector.multi_reduction <add>, %203, %cst_52 [1, 2] : vector<1x8x128xf32> to vector<1xf32>
    %205 = vector.shape_cast %204 : vector<1xf32> to vector<1x1x1xf32>
    %206 = vector.extract %205[0, 0, 0] : f32 from vector<1x1x1xf32>
    %c1_53 = arith.constant 1 : index
    %c1_54 = arith.constant 1 : index
    %207 = memref.load %arg2[%c1_53, %c1_54] : memref<10x4xf32, #tpu.memory_space<smem>>
    memref.store %206, %arg2[%c1_53, %c1_54] : memref<10x4xf32, #tpu.memory_space<smem>>
    %208 = math.absf %188 : vector<4x8x128xf32>
    %cst_55 = arith.constant dense<0.000000e+00> : vector<8x128xf32>
    %209 = vector.multi_reduction <add>, %208, %cst_55 [0] : vector<4x8x128xf32> to vector<8x128xf32>
    %210 = vector.shape_cast %209 : vector<8x128xf32> to vector<1x8x128xf32>
    %cst_56 = arith.constant dense<0.000000e+00> : vector<1xf32>
    %211 = vector.multi_reduction <add>, %210, %cst_56 [1, 2] : vector<1x8x128xf32> to vector<1xf32>
    %212 = vector.shape_cast %211 : vector<1xf32> to vector<1x1x1xf32>
    %213 = vector.extract %212[0, 0, 0] : f32 from vector<1x1x1xf32>
    %c1_57 = arith.constant 1 : index
    %c2_58 = arith.constant 2 : index
    %214 = memref.load %arg2[%c1_57, %c2_58] : memref<10x4xf32, #tpu.memory_space<smem>>
    memref.store %213, %arg2[%c1_57, %c2_58] : memref<10x4xf32, #tpu.memory_space<smem>>
    %215 = arith.mulf %188, %188 : vector<4x8x128xf32>
    %cst_59 = arith.constant dense<0.000000e+00> : vector<8x128xf32>
    %216 = vector.multi_reduction <add>, %215, %cst_59 [0] : vector<4x8x128xf32> to vector<8x128xf32>
    %217 = vector.shape_cast %216 : vector<8x128xf32> to vector<1x8x128xf32>
    %cst_60 = arith.constant dense<0.000000e+00> : vector<1xf32>
    %218 = vector.multi_reduction <add>, %217, %cst_60 [1, 2] : vector<1x8x128xf32> to vector<1xf32>
    %219 = vector.shape_cast %218 : vector<1xf32> to vector<1x1x1xf32>
    %220 = vector.extract %219[0, 0, 0] : f32 from vector<1x1x1xf32>
    %c1_61 = arith.constant 1 : index
    %c3_62 = arith.constant 3 : index
    %221 = memref.load %arg2[%c1_61, %c3_62] : memref<10x4xf32, #tpu.memory_space<smem>>
    memref.store %220, %arg2[%c1_61, %c3_62] : memref<10x4xf32, #tpu.memory_space<smem>>
    %c7_63 = arith.constant 7 : index
    %c0_64 = arith.constant 0 : index
    %222 = vector.load %arg3[%c7_63, %c0_64] : memref<40x128xf32, #tpu.memory_space<vmem>>, vector<32x128xf32>
    %223 = vector.broadcast %123 : vector<32x1xf32> to vector<32x128xf32>
    %224 = vector.broadcast %144 : vector<1x128xf32> to vector<32x128xf32>
    %225 = arith.mulf %223, %224 : vector<32x128xf32>
    %226 = arith.addf %222, %225 : vector<32x128xf32>
    %227 = arith.mulf %226, %140 : vector<32x128xf32>
    %228 = vector.shape_cast %227 : vector<32x128xf32> to vector<4x8x128xf32>
    %cst_65 = arith.constant 0.000000e+00 : f32
    %229 = vector.broadcast %cst_65 : f32 to vector<4x8x128xf32>
    %230 = arith.minimumf %228, %229 : vector<4x8x128xf32>
    %231 = arith.mulf %230, %230 : vector<4x8x128xf32>
    %cst_66 = arith.constant dense<0.000000e+00> : vector<8x128xf32>
    %232 = vector.multi_reduction <add>, %231, %cst_66 [0] : vector<4x8x128xf32> to vector<8x128xf32>
    %233 = vector.shape_cast %232 : vector<8x128xf32> to vector<1x8x128xf32>
    %cst_67 = arith.constant dense<0.000000e+00> : vector<1xf32>
    %234 = vector.multi_reduction <add>, %233, %cst_67 [1, 2] : vector<1x8x128xf32> to vector<1xf32>
    %235 = vector.shape_cast %234 : vector<1xf32> to vector<1x1x1xf32>
    %236 = vector.extract %235[0, 0, 0] : f32 from vector<1x1x1xf32>
    %c2_68 = arith.constant 2 : index
    %c0_69 = arith.constant 0 : index
    %237 = memref.load %arg2[%c2_68, %c0_69] : memref<10x4xf32, #tpu.memory_space<smem>>
    memref.store %236, %arg2[%c2_68, %c0_69] : memref<10x4xf32, #tpu.memory_space<smem>>
    %cst_70 = arith.constant 0.000000e+00 : f32
    %238 = vector.broadcast %cst_70 : f32 to vector<4x8x128xf32>
    %239 = arith.cmpf olt, %228, %238 : vector<4x8x128xf32>
    %240 = arith.extui %239 : vector<4x8x128xi1> to vector<4x8x128xi32>
    %241 = arith.sitofp %240 : vector<4x8x128xi32> to vector<4x8x128xf32>
    %cst_71 = arith.constant dense<0.000000e+00> : vector<8x128xf32>
    %242 = vector.multi_reduction <add>, %241, %cst_71 [0] : vector<4x8x128xf32> to vector<8x128xf32>
    %243 = vector.shape_cast %242 : vector<8x128xf32> to vector<1x8x128xf32>
    %cst_72 = arith.constant dense<0.000000e+00> : vector<1xf32>
    %244 = vector.multi_reduction <add>, %243, %cst_72 [1, 2] : vector<1x8x128xf32> to vector<1xf32>
    %245 = vector.shape_cast %244 : vector<1xf32> to vector<1x1x1xf32>
    %246 = vector.extract %245[0, 0, 0] : f32 from vector<1x1x1xf32>
    %c2_73 = arith.constant 2 : index
    %c1_74 = arith.constant 1 : index
    %247 = memref.load %arg2[%c2_73, %c1_74] : memref<10x4xf32, #tpu.memory_space<smem>>
    memref.store %246, %arg2[%c2_73, %c1_74] : memref<10x4xf32, #tpu.memory_space<smem>>
    %248 = math.absf %228 : vector<4x8x128xf32>
    %cst_75 = arith.constant dense<0.000000e+00> : vector<8x128xf32>
    %249 = vector.multi_reduction <add>, %248, %cst_75 [0] : vector<4x8x128xf32> to vector<8x128xf32>
    %250 = vector.shape_cast %249 : vector<8x128xf32> to vector<1x8x128xf32>
    %cst_76 = arith.constant dense<0.000000e+00> : vector<1xf32>
    %251 = vector.multi_reduction <add>, %250, %cst_76 [1, 2] : vector<1x8x128xf32> to vector<1xf32>
    %252 = vector.shape_cast %251 : vector<1xf32> to vector<1x1x1xf32>
    %253 = vector.extract %252[0, 0, 0] : f32 from vector<1x1x1xf32>
    %c2_77 = arith.constant 2 : index
    %c2_78 = arith.constant 2 : index
    %254 = memref.load %arg2[%c2_77, %c2_78] : memref<10x4xf32, #tpu.memory_space<smem>>
    memref.store %253, %arg2[%c2_77, %c2_78] : memref<10x4xf32, #tpu.memory_space<smem>>
    %255 = arith.mulf %228, %228 : vector<4x8x128xf32>
    %cst_79 = arith.constant dense<0.000000e+00> : vector<8x128xf32>
    %256 = vector.multi_reduction <add>, %255, %cst_79 [0] : vector<4x8x128xf32> to vector<8x128xf32>
    %257 = vector.shape_cast %256 : vector<8x128xf32> to vector<1x8x128xf32>
    %cst_80 = arith.constant dense<0.000000e+00> : vector<1xf32>
    %258 = vector.multi_reduction <add>, %257, %cst_80 [1, 2] : vector<1x8x128xf32> to vector<1xf32>
    %259 = vector.shape_cast %258 : vector<1xf32> to vector<1x1x1xf32>
    %260 = vector.extract %259[0, 0, 0] : f32 from vector<1x1x1xf32>
    %c2_81 = arith.constant 2 : index
    %c3_82 = arith.constant 3 : index
    %261 = memref.load %arg2[%c2_81, %c3_82] : memref<10x4xf32, #tpu.memory_space<smem>>
    memref.store %260, %arg2[%c2_81, %c3_82] : memref<10x4xf32, #tpu.memory_space<smem>>
    %262 = vector.extract_strided_slice %226 {offsets = [0, 127], sizes = [32, 1], strides = [1, 1]} : vector<32x128xf32> to vector<32x1xf32>
    %263 = vector.extract_strided_slice %226 {offsets = [0, 0], sizes = [32, 127], strides = [1, 1]} : vector<32x128xf32> to vector<32x127xf32>
    %264 = tpu.concatenate %262, %263 in 1 : vector<32x1xf32>, vector<32x127xf32> -> vector<32x128xf32>
    %265 = vector.extract_strided_slice %226 {offsets = [0, 31], sizes = [32, 1], strides = [1, 1]} : vector<32x128xf32> to vector<32x1xf32>
    %266 = vector.broadcast %265 : vector<32x1xf32> to vector<32x128xf32>
    %267 = vector.broadcast %127 : vector<1x128xf32> to vector<32x128xf32>
    %268 = arith.mulf %266, %267 : vector<32x128xf32>
    %269 = arith.addf %264, %268 : vector<32x128xf32>
    %270 = arith.mulf %269, %140 : vector<32x128xf32>
    %271 = vector.shape_cast %270 : vector<32x128xf32> to vector<4x8x128xf32>
    %cst_83 = arith.constant 0.000000e+00 : f32
    %272 = vector.broadcast %cst_83 : f32 to vector<4x8x128xf32>
    %273 = arith.minimumf %271, %272 : vector<4x8x128xf32>
    %274 = arith.mulf %273, %273 : vector<4x8x128xf32>
    %cst_84 = arith.constant dense<0.000000e+00> : vector<8x128xf32>
    %275 = vector.multi_reduction <add>, %274, %cst_84 [0] : vector<4x8x128xf32> to vector<8x128xf32>
    %276 = vector.shape_cast %275 : vector<8x128xf32> to vector<1x8x128xf32>
    %cst_85 = arith.constant dense<0.000000e+00> : vector<1xf32>
    %277 = vector.multi_reduction <add>, %276, %cst_85 [1, 2] : vector<1x8x128xf32> to vector<1xf32>
    %278 = vector.shape_cast %277 : vector<1xf32> to vector<1x1x1xf32>
    %279 = vector.extract %278[0, 0, 0] : f32 from vector<1x1x1xf32>
    %c3_86 = arith.constant 3 : index
    %c0_87 = arith.constant 0 : index
    %280 = memref.load %arg2[%c3_86, %c0_87] : memref<10x4xf32, #tpu.memory_space<smem>>
    memref.store %279, %arg2[%c3_86, %c0_87] : memref<10x4xf32, #tpu.memory_space<smem>>
    %cst_88 = arith.constant 0.000000e+00 : f32
    %281 = vector.broadcast %cst_88 : f32 to vector<4x8x128xf32>
    %282 = arith.cmpf olt, %271, %281 : vector<4x8x128xf32>
    %283 = arith.extui %282 : vector<4x8x128xi1> to vector<4x8x128xi32>
    %284 = arith.sitofp %283 : vector<4x8x128xi32> to vector<4x8x128xf32>
    %cst_89 = arith.constant dense<0.000000e+00> : vector<8x128xf32>
    %285 = vector.multi_reduction <add>, %284, %cst_89 [0] : vector<4x8x128xf32> to vector<8x128xf32>
    %286 = vector.shape_cast %285 : vector<8x128xf32> to vector<1x8x128xf32>
    %cst_90 = arith.constant dense<0.000000e+00> : vector<1xf32>
    %287 = vector.multi_reduction <add>, %286, %cst_90 [1, 2] : vector<1x8x128xf32> to vector<1xf32>
    %288 = vector.shape_cast %287 : vector<1xf32> to vector<1x1x1xf32>
    %289 = vector.extract %288[0, 0, 0] : f32 from vector<1x1x1xf32>
    %c3_91 = arith.constant 3 : index
    %c1_92 = arith.constant 1 : index
    %290 = memref.load %arg2[%c3_91, %c1_92] : memref<10x4xf32, #tpu.memory_space<smem>>
    memref.store %289, %arg2[%c3_91, %c1_92] : memref<10x4xf32, #tpu.memory_space<smem>>
    %291 = math.absf %271 : vector<4x8x128xf32>
    %cst_93 = arith.constant dense<0.000000e+00> : vector<8x128xf32>
    %292 = vector.multi_reduction <add>, %291, %cst_93 [0] : vector<4x8x128xf32> to vector<8x128xf32>
    %293 = vector.shape_cast %292 : vector<8x128xf32> to vector<1x8x128xf32>
    %cst_94 = arith.constant dense<0.000000e+00> : vector<1xf32>
    %294 = vector.multi_reduction <add>, %293, %cst_94 [1, 2] : vector<1x8x128xf32> to vector<1xf32>
    %295 = vector.shape_cast %294 : vector<1xf32> to vector<1x1x1xf32>
    %296 = vector.extract %295[0, 0, 0] : f32 from vector<1x1x1xf32>
    %c3_95 = arith.constant 3 : index
    %c2_96 = arith.constant 2 : index
    %297 = memref.load %arg2[%c3_95, %c2_96] : memref<10x4xf32, #tpu.memory_space<smem>>
    memref.store %296, %arg2[%c3_95, %c2_96] : memref<10x4xf32, #tpu.memory_space<smem>>
    %298 = arith.mulf %271, %271 : vector<4x8x128xf32>
    %cst_97 = arith.constant dense<0.000000e+00> : vector<8x128xf32>
    %299 = vector.multi_reduction <add>, %298, %cst_97 [0] : vector<4x8x128xf32> to vector<8x128xf32>
    %300 = vector.shape_cast %299 : vector<8x128xf32> to vector<1x8x128xf32>
    %cst_98 = arith.constant dense<0.000000e+00> : vector<1xf32>
    %301 = vector.multi_reduction <add>, %300, %cst_98 [1, 2] : vector<1x8x128xf32> to vector<1xf32>
    %302 = vector.shape_cast %301 : vector<1xf32> to vector<1x1x1xf32>
    %303 = vector.extract %302[0, 0, 0] : f32 from vector<1x1x1xf32>
    %c3_99 = arith.constant 3 : index
    %c3_100 = arith.constant 3 : index
    %304 = memref.load %arg2[%c3_99, %c3_100] : memref<10x4xf32, #tpu.memory_space<smem>>
    memref.store %303, %arg2[%c3_99, %c3_100] : memref<10x4xf32, #tpu.memory_space<smem>>
    %305 = vector.extract_strided_slice %226 {offsets = [0, 1], sizes = [32, 127], strides = [1, 1]} : vector<32x128xf32> to vector<32x127xf32>
    %306 = vector.extract_strided_slice %226 {offsets = [0, 0], sizes = [32, 1], strides = [1, 1]} : vector<32x128xf32> to vector<32x1xf32>
    %307 = tpu.concatenate %305, %306 in 1 : vector<32x127xf32>, vector<32x1xf32> -> vector<32x128xf32>
    %308 = vector.extract_strided_slice %226 {offsets = [0, 0], sizes = [32, 1], strides = [1, 1]} : vector<32x128xf32> to vector<32x1xf32>
    %309 = vector.broadcast %308 : vector<32x1xf32> to vector<32x128xf32>
    %310 = vector.broadcast %131 : vector<1x128xf32> to vector<32x128xf32>
    %311 = arith.mulf %309, %310 : vector<32x128xf32>
    %312 = arith.addf %307, %311 : vector<32x128xf32>
    %313 = arith.mulf %312, %140 : vector<32x128xf32>
    %314 = vector.shape_cast %313 : vector<32x128xf32> to vector<4x8x128xf32>
    %cst_101 = arith.constant 0.000000e+00 : f32
    %315 = vector.broadcast %cst_101 : f32 to vector<4x8x128xf32>
    %316 = arith.minimumf %314, %315 : vector<4x8x128xf32>
    %317 = arith.mulf %316, %316 : vector<4x8x128xf32>
    %cst_102 = arith.constant dense<0.000000e+00> : vector<8x128xf32>
    %318 = vector.multi_reduction <add>, %317, %cst_102 [0] : vector<4x8x128xf32> to vector<8x128xf32>
    %319 = vector.shape_cast %318 : vector<8x128xf32> to vector<1x8x128xf32>
    %cst_103 = arith.constant dense<0.000000e+00> : vector<1xf32>
    %320 = vector.multi_reduction <add>, %319, %cst_103 [1, 2] : vector<1x8x128xf32> to vector<1xf32>
    %321 = vector.shape_cast %320 : vector<1xf32> to vector<1x1x1xf32>
    %322 = vector.extract %321[0, 0, 0] : f32 from vector<1x1x1xf32>
    %c4 = arith.constant 4 : index
    %c0_104 = arith.constant 0 : index
    %323 = memref.load %arg2[%c4, %c0_104] : memref<10x4xf32, #tpu.memory_space<smem>>
    memref.store %322, %arg2[%c4, %c0_104] : memref<10x4xf32, #tpu.memory_space<smem>>
    %cst_105 = arith.constant 0.000000e+00 : f32
    %324 = vector.broadcast %cst_105 : f32 to vector<4x8x128xf32>
    %325 = arith.cmpf olt, %314, %324 : vector<4x8x128xf32>
    %326 = arith.extui %325 : vector<4x8x128xi1> to vector<4x8x128xi32>
    %327 = arith.sitofp %326 : vector<4x8x128xi32> to vector<4x8x128xf32>
    %cst_106 = arith.constant dense<0.000000e+00> : vector<8x128xf32>
    %328 = vector.multi_reduction <add>, %327, %cst_106 [0] : vector<4x8x128xf32> to vector<8x128xf32>
    %329 = vector.shape_cast %328 : vector<8x128xf32> to vector<1x8x128xf32>
    %cst_107 = arith.constant dense<0.000000e+00> : vector<1xf32>
    %330 = vector.multi_reduction <add>, %329, %cst_107 [1, 2] : vector<1x8x128xf32> to vector<1xf32>
    %331 = vector.shape_cast %330 : vector<1xf32> to vector<1x1x1xf32>
    %332 = vector.extract %331[0, 0, 0] : f32 from vector<1x1x1xf32>
    %c4_108 = arith.constant 4 : index
    %c1_109 = arith.constant 1 : index
    %333 = memref.load %arg2[%c4_108, %c1_109] : memref<10x4xf32, #tpu.memory_space<smem>>
    memref.store %332, %arg2[%c4_108, %c1_109] : memref<10x4xf32, #tpu.memory_space<smem>>
    %334 = math.absf %314 : vector<4x8x128xf32>
    %cst_110 = arith.constant dense<0.000000e+00> : vector<8x128xf32>
    %335 = vector.multi_reduction <add>, %334, %cst_110 [0] : vector<4x8x128xf32> to vector<8x128xf32>
    %336 = vector.shape_cast %335 : vector<8x128xf32> to vector<1x8x128xf32>
    %cst_111 = arith.constant dense<0.000000e+00> : vector<1xf32>
    %337 = vector.multi_reduction <add>, %336, %cst_111 [1, 2] : vector<1x8x128xf32> to vector<1xf32>
    %338 = vector.shape_cast %337 : vector<1xf32> to vector<1x1x1xf32>
    %339 = vector.extract %338[0, 0, 0] : f32 from vector<1x1x1xf32>
    %c4_112 = arith.constant 4 : index
    %c2_113 = arith.constant 2 : index
    %340 = memref.load %arg2[%c4_112, %c2_113] : memref<10x4xf32, #tpu.memory_space<smem>>
    memref.store %339, %arg2[%c4_112, %c2_113] : memref<10x4xf32, #tpu.memory_space<smem>>
    %341 = arith.mulf %314, %314 : vector<4x8x128xf32>
    %cst_114 = arith.constant dense<0.000000e+00> : vector<8x128xf32>
    %342 = vector.multi_reduction <add>, %341, %cst_114 [0] : vector<4x8x128xf32> to vector<8x128xf32>
    %343 = vector.shape_cast %342 : vector<8x128xf32> to vector<1x8x128xf32>
    %cst_115 = arith.constant dense<0.000000e+00> : vector<1xf32>
    %344 = vector.multi_reduction <add>, %343, %cst_115 [1, 2] : vector<1x8x128xf32> to vector<1xf32>
    %345 = vector.shape_cast %344 : vector<1xf32> to vector<1x1x1xf32>
    %346 = vector.extract %345[0, 0, 0] : f32 from vector<1x1x1xf32>
    %c4_116 = arith.constant 4 : index
    %c3_117 = arith.constant 3 : index
    %347 = memref.load %arg2[%c4_116, %c3_117] : memref<10x4xf32, #tpu.memory_space<smem>>
    memref.store %346, %arg2[%c4_116, %c3_117] : memref<10x4xf32, #tpu.memory_space<smem>>
    %c8_118 = arith.constant 8 : index
    %c0_119 = arith.constant 0 : index
    %348 = vector.load %arg1[%c8_118, %c0_119] : memref<32x128xf32, #tpu.memory_space<vmem>>, vector<16x128xf32>
    %cst_120 = arith.constant 0.342631519 : f32
    %349 = vector.broadcast %cst_120 : f32 to vector<16x128xf32>
    %350 = arith.mulf %348, %349 : vector<16x128xf32>
    %351 = arith.mulf %348, %348 : vector<16x128xf32>
    %cst_121 = arith.constant 0.342631519 : f32
    %352 = vector.broadcast %cst_121 : f32 to vector<16x128xf32>
    %353 = arith.mulf %351, %352 : vector<16x128xf32>
    %c7_122 = arith.constant 7 : index
    %c0_123 = arith.constant 0 : index
    %354 = vector.load %arg1[%c7_122, %c0_123] : memref<32x128xf32, #tpu.memory_space<vmem>>, vector<16x128xf32>
    %c9_124 = arith.constant 9 : index
    %c0_125 = arith.constant 0 : index
    %355 = vector.load %arg1[%c9_124, %c0_125] : memref<32x128xf32, #tpu.memory_space<vmem>>, vector<16x128xf32>
    %356 = arith.addf %354, %355 : vector<16x128xf32>
    %cst_126 = arith.constant 0.237296075 : f32
    %357 = vector.broadcast %cst_126 : f32 to vector<16x128xf32>
    %358 = arith.mulf %357, %356 : vector<16x128xf32>
    %359 = arith.addf %350, %358 : vector<16x128xf32>
    %360 = arith.mulf %354, %354 : vector<16x128xf32>
    %361 = arith.mulf %355, %355 : vector<16x128xf32>
    %362 = arith.addf %360, %361 : vector<16x128xf32>
    %cst_127 = arith.constant 0.237296075 : f32
    %363 = vector.broadcast %cst_127 : f32 to vector<16x128xf32>
    %364 = arith.mulf %363, %362 : vector<16x128xf32>
    %365 = arith.addf %353, %364 : vector<16x128xf32>
    %c6_128 = arith.constant 6 : index
    %c0_129 = arith.constant 0 : index
    %366 = vector.load %arg1[%c6_128, %c0_129] : memref<32x128xf32, #tpu.memory_space<vmem>>, vector<16x128xf32>
    %c10_130 = arith.constant 10 : index
    %c0_131 = arith.constant 0 : index
    %367 = vector.load %arg1[%c10_130, %c0_131] : memref<32x128xf32, #tpu.memory_space<vmem>>, vector<16x128xf32>
    %368 = arith.addf %366, %367 : vector<16x128xf32>
    %cst_132 = arith.constant 0.0788279623 : f32
    %369 = vector.broadcast %cst_132 : f32 to vector<16x128xf32>
    %370 = arith.mulf %369, %368 : vector<16x128xf32>
    %371 = arith.addf %359, %370 : vector<16x128xf32>
    %372 = arith.mulf %366, %366 : vector<16x128xf32>
    %373 = arith.mulf %367, %367 : vector<16x128xf32>
    %374 = arith.addf %372, %373 : vector<16x128xf32>
    %cst_133 = arith.constant 0.0788279623 : f32
    %375 = vector.broadcast %cst_133 : f32 to vector<16x128xf32>
    %376 = arith.mulf %375, %374 : vector<16x128xf32>
    %377 = arith.addf %365, %376 : vector<16x128xf32>
    %c5_134 = arith.constant 5 : index
    %c0_135 = arith.constant 0 : index
    %378 = vector.load %arg1[%c5_134, %c0_135] : memref<32x128xf32, #tpu.memory_space<vmem>>, vector<16x128xf32>
    %c11_136 = arith.constant 11 : index
    %c0_137 = arith.constant 0 : index
    %379 = vector.load %arg1[%c11_136, %c0_137] : memref<32x128xf32, #tpu.memory_space<vmem>>, vector<16x128xf32>
    %380 = arith.addf %378, %379 : vector<16x128xf32>
    %cst_138 = arith.constant 0.0125602009 : f32
    %381 = vector.broadcast %cst_138 : f32 to vector<16x128xf32>
    %382 = arith.mulf %381, %380 : vector<16x128xf32>
    %383 = arith.addf %371, %382 : vector<16x128xf32>
    %384 = arith.mulf %378, %378 : vector<16x128xf32>
    %385 = arith.mulf %379, %379 : vector<16x128xf32>
    %386 = arith.addf %384, %385 : vector<16x128xf32>
    %cst_139 = arith.constant 0.0125602009 : f32
    %387 = vector.broadcast %cst_139 : f32 to vector<16x128xf32>
    %388 = arith.mulf %387, %386 : vector<16x128xf32>
    %389 = arith.addf %377, %388 : vector<16x128xf32>
    %cst_140 = arith.constant 0.342631519 : f32
    %390 = vector.broadcast %cst_140 : f32 to vector<16x128xf32>
    %391 = arith.mulf %383, %390 : vector<16x128xf32>
    %cst_141 = arith.constant 0.342631519 : f32
    %392 = vector.broadcast %cst_141 : f32 to vector<16x128xf32>
    %393 = arith.mulf %389, %392 : vector<16x128xf32>
    %394 = vector.extract_strided_slice %383 {offsets = [0, 127], sizes = [16, 1], strides = [1, 1]} : vector<16x128xf32> to vector<16x1xf32>
    %395 = vector.extract_strided_slice %383 {offsets = [0, 0], sizes = [16, 127], strides = [1, 1]} : vector<16x128xf32> to vector<16x127xf32>
    %396 = tpu.concatenate %394, %395 in 1 : vector<16x1xf32>, vector<16x127xf32> -> vector<16x128xf32>
    %397 = vector.extract_strided_slice %383 {offsets = [0, 1], sizes = [16, 127], strides = [1, 1]} : vector<16x128xf32> to vector<16x127xf32>
    %398 = vector.extract_strided_slice %383 {offsets = [0, 0], sizes = [16, 1], strides = [1, 1]} : vector<16x128xf32> to vector<16x1xf32>
    %399 = tpu.concatenate %397, %398 in 1 : vector<16x127xf32>, vector<16x1xf32> -> vector<16x128xf32>
    %400 = arith.addf %396, %399 : vector<16x128xf32>
    %cst_142 = arith.constant 0.237296075 : f32
    %401 = vector.broadcast %cst_142 : f32 to vector<16x128xf32>
    %402 = arith.mulf %401, %400 : vector<16x128xf32>
    %403 = arith.addf %391, %402 : vector<16x128xf32>
    %404 = vector.extract_strided_slice %389 {offsets = [0, 127], sizes = [16, 1], strides = [1, 1]} : vector<16x128xf32> to vector<16x1xf32>
    %405 = vector.extract_strided_slice %389 {offsets = [0, 0], sizes = [16, 127], strides = [1, 1]} : vector<16x128xf32> to vector<16x127xf32>
    %406 = tpu.concatenate %404, %405 in 1 : vector<16x1xf32>, vector<16x127xf32> -> vector<16x128xf32>
    %407 = vector.extract_strided_slice %389 {offsets = [0, 1], sizes = [16, 127], strides = [1, 1]} : vector<16x128xf32> to vector<16x127xf32>
    %408 = vector.extract_strided_slice %389 {offsets = [0, 0], sizes = [16, 1], strides = [1, 1]} : vector<16x128xf32> to vector<16x1xf32>
    %409 = tpu.concatenate %407, %408 in 1 : vector<16x127xf32>, vector<16x1xf32> -> vector<16x128xf32>
    %410 = arith.addf %406, %409 : vector<16x128xf32>
    %cst_143 = arith.constant 0.237296075 : f32
    %411 = vector.broadcast %cst_143 : f32 to vector<16x128xf32>
    %412 = arith.mulf %411, %410 : vector<16x128xf32>
    %413 = arith.addf %393, %412 : vector<16x128xf32>
    %414 = vector.extract_strided_slice %383 {offsets = [0, 126], sizes = [16, 2], strides = [1, 1]} : vector<16x128xf32> to vector<16x2xf32>
    %415 = vector.extract_strided_slice %383 {offsets = [0, 0], sizes = [16, 126], strides = [1, 1]} : vector<16x128xf32> to vector<16x126xf32>
    %416 = tpu.concatenate %414, %415 in 1 : vector<16x2xf32>, vector<16x126xf32> -> vector<16x128xf32>
    %417 = vector.extract_strided_slice %383 {offsets = [0, 2], sizes = [16, 126], strides = [1, 1]} : vector<16x128xf32> to vector<16x126xf32>
    %418 = vector.extract_strided_slice %383 {offsets = [0, 0], sizes = [16, 2], strides = [1, 1]} : vector<16x128xf32> to vector<16x2xf32>
    %419 = tpu.concatenate %417, %418 in 1 : vector<16x126xf32>, vector<16x2xf32> -> vector<16x128xf32>
    %420 = arith.addf %416, %419 : vector<16x128xf32>
    %cst_144 = arith.constant 0.0788279623 : f32
    %421 = vector.broadcast %cst_144 : f32 to vector<16x128xf32>
    %422 = arith.mulf %421, %420 : vector<16x128xf32>
    %423 = arith.addf %403, %422 : vector<16x128xf32>
    %424 = vector.extract_strided_slice %389 {offsets = [0, 126], sizes = [16, 2], strides = [1, 1]} : vector<16x128xf32> to vector<16x2xf32>
    %425 = vector.extract_strided_slice %389 {offsets = [0, 0], sizes = [16, 126], strides = [1, 1]} : vector<16x128xf32> to vector<16x126xf32>
    %426 = tpu.concatenate %424, %425 in 1 : vector<16x2xf32>, vector<16x126xf32> -> vector<16x128xf32>
    %427 = vector.extract_strided_slice %389 {offsets = [0, 2], sizes = [16, 126], strides = [1, 1]} : vector<16x128xf32> to vector<16x126xf32>
    %428 = vector.extract_strided_slice %389 {offsets = [0, 0], sizes = [16, 2], strides = [1, 1]} : vector<16x128xf32> to vector<16x2xf32>
    %429 = tpu.concatenate %427, %428 in 1 : vector<16x126xf32>, vector<16x2xf32> -> vector<16x128xf32>
    %430 = arith.addf %426, %429 : vector<16x128xf32>
    %cst_145 = arith.constant 0.0788279623 : f32
    %431 = vector.broadcast %cst_145 : f32 to vector<16x128xf32>
    %432 = arith.mulf %431, %430 : vector<16x128xf32>
    %433 = arith.addf %413, %432 : vector<16x128xf32>
    %434 = vector.extract_strided_slice %383 {offsets = [0, 125], sizes = [16, 3], strides = [1, 1]} : vector<16x128xf32> to vector<16x3xf32>
    %435 = vector.extract_strided_slice %383 {offsets = [0, 0], sizes = [16, 125], strides = [1, 1]} : vector<16x128xf32> to vector<16x125xf32>
    %436 = tpu.concatenate %434, %435 in 1 : vector<16x3xf32>, vector<16x125xf32> -> vector<16x128xf32>
    %437 = vector.extract_strided_slice %383 {offsets = [0, 3], sizes = [16, 125], strides = [1, 1]} : vector<16x128xf32> to vector<16x125xf32>
    %438 = vector.extract_strided_slice %383 {offsets = [0, 0], sizes = [16, 3], strides = [1, 1]} : vector<16x128xf32> to vector<16x3xf32>
    %439 = tpu.concatenate %437, %438 in 1 : vector<16x125xf32>, vector<16x3xf32> -> vector<16x128xf32>
    %440 = arith.addf %436, %439 : vector<16x128xf32>
    %cst_146 = arith.constant 0.0125602009 : f32
    %441 = vector.broadcast %cst_146 : f32 to vector<16x128xf32>
    %442 = arith.mulf %441, %440 : vector<16x128xf32>
    %443 = arith.addf %423, %442 : vector<16x128xf32>
    %444 = vector.extract_strided_slice %389 {offsets = [0, 125], sizes = [16, 3], strides = [1, 1]} : vector<16x128xf32> to vector<16x3xf32>
    %445 = vector.extract_strided_slice %389 {offsets = [0, 0], sizes = [16, 125], strides = [1, 1]} : vector<16x128xf32> to vector<16x125xf32>
    %446 = tpu.concatenate %444, %445 in 1 : vector<16x3xf32>, vector<16x125xf32> -> vector<16x128xf32>
    %447 = vector.extract_strided_slice %389 {offsets = [0, 3], sizes = [16, 125], strides = [1, 1]} : vector<16x128xf32> to vector<16x125xf32>
    %448 = vector.extract_strided_slice %389 {offsets = [0, 0], sizes = [16, 3], strides = [1, 1]} : vector<16x128xf32> to vector<16x3xf32>
    %449 = tpu.concatenate %447, %448 in 1 : vector<16x125xf32>, vector<16x3xf32> -> vector<16x128xf32>
    %450 = arith.addf %446, %449 : vector<16x128xf32>
    %cst_147 = arith.constant 0.0125602009 : f32
    %451 = vector.broadcast %cst_147 : f32 to vector<16x128xf32>
    %452 = arith.mulf %451, %450 : vector<16x128xf32>
    %453 = arith.addf %433, %452 : vector<16x128xf32>
    %454 = arith.mulf %443, %443 : vector<16x128xf32>
    %455 = arith.subf %453, %454 : vector<16x128xf32>
    %456 = math.absf %455 : vector<16x128xf32>
    %457 = math.sqrt %456 : vector<16x128xf32>
    %458 = tpu.iota {dimensions = array<i32: 0>} : vector<16x1xi32>
    %459 = tpu.iota {dimensions = array<i32: 1>} : vector<1x128xi32>
    %c16_i32 = arith.constant 16 : i32
    %460 = vector.broadcast %c16_i32 : i32 to vector<16x1xi32>
    %461 = arith.cmpi slt, %458, %460 : vector<16x1xi32>
    %462 = arith.extui %461 : vector<16x1xi1> to vector<16x1xi32>
    %463 = arith.sitofp %462 : vector<16x1xi32> to vector<16x1xf32>
    %c16_i32_148 = arith.constant 16 : i32
    %464 = vector.broadcast %c16_i32_148 : i32 to vector<1x128xi32>
    %465 = arith.cmpi slt, %459, %464 : vector<1x128xi32>
    %466 = arith.extui %465 : vector<1x128xi1> to vector<1x128xi32>
    %467 = arith.sitofp %466 : vector<1x128xi32> to vector<1x128xf32>
    %c0_i32_149 = arith.constant 0 : i32
    %468 = vector.broadcast %c0_i32_149 : i32 to vector<16x1xi32>
    %469 = arith.cmpi eq, %458, %468 : vector<16x1xi32>
    %470 = arith.extui %469 : vector<16x1xi1> to vector<16x1xi32>
    %471 = arith.sitofp %470 : vector<16x1xi32> to vector<16x1xf32>
    %c0_i32_150 = arith.constant 0 : i32
    %472 = vector.broadcast %c0_i32_150 : i32 to vector<1x128xi32>
    %473 = arith.cmpi eq, %459, %472 : vector<1x128xi32>
    %474 = arith.extui %473 : vector<1x128xi1> to vector<1x128xi32>
    %475 = arith.sitofp %474 : vector<1x128xi32> to vector<1x128xf32>
    %c15_i32 = arith.constant 15 : i32
    %476 = vector.broadcast %c15_i32 : i32 to vector<1x128xi32>
    %477 = arith.cmpi eq, %459, %476 : vector<1x128xi32>
    %478 = arith.extui %477 : vector<1x128xi1> to vector<1x128xi32>
    %479 = arith.sitofp %478 : vector<1x128xi32> to vector<1x128xf32>
    %480 = arith.subf %348, %443 : vector<16x128xf32>
    %cst_151 = arith.constant 1.000000e+00 : f32
    %481 = vector.broadcast %cst_151 : f32 to vector<16x128xf32>
    %482 = arith.addf %457, %481 : vector<16x128xf32>
    %483 = tpu.reciprocal %482 {approx = true} : vector<16x128xf32> -> vector<16x128xf32>
    %484 = arith.mulf %480, %483 : vector<16x128xf32>
    %485 = vector.broadcast %463 : vector<16x1xf32> to vector<16x128xf32>
    %486 = arith.mulf %484, %485 : vector<16x128xf32>
    %487 = vector.broadcast %467 : vector<1x128xf32> to vector<16x128xf32>
    %488 = arith.mulf %486, %487 : vector<16x128xf32>
    %cst_152 = arith.constant 0.000000e+00 : f32
    %489 = vector.broadcast %cst_152 : f32 to vector<8x128xf32>
    %c0_153 = arith.constant 0 : index
    %c0_154 = arith.constant 0 : index
    %490 = vector.load %arg4[%c0_153, %c0_154] : memref<24x128xf32, #tpu.memory_space<vmem>>, vector<8x128xf32>
    tpu.vector_store %arg4[%c0_153, %c0_154], %489 {strides = array<i32>} : memref<24x128xf32, #tpu.memory_space<vmem>>, vector<8x128xf32>,
    %c8_155 = arith.constant 8 : index
    %c0_156 = arith.constant 0 : index
    %491 = vector.load %arg4[%c8_155, %c0_156] : memref<24x128xf32, #tpu.memory_space<vmem>>, vector<16x128xf32>
    tpu.vector_store %arg4[%c8_155, %c0_156], %488 {strides = array<i32>} : memref<24x128xf32, #tpu.memory_space<vmem>>, vector<16x128xf32>,
    %c23 = arith.constant 23 : index
    %c0_157 = arith.constant 0 : index
    %492 = vector.load %arg4[%c23, %c0_157] : memref<24x128xf32, #tpu.memory_space<vmem>>, vector<1x128xf32>
    %493 = vector.extract_strided_slice %488 {offsets = [0, 15], sizes = [16, 1], strides = [1, 1]} : vector<16x128xf32> to vector<16x1xf32>
    %494 = vector.shape_cast %488 : vector<16x128xf32> to vector<2x8x128xf32>
    %cst_158 = arith.constant 0.000000e+00 : f32
    %495 = vector.broadcast %cst_158 : f32 to vector<2x8x128xf32>
    %496 = arith.minimumf %494, %495 : vector<2x8x128xf32>
    %497 = arith.mulf %496, %496 : vector<2x8x128xf32>
    %cst_159 = arith.constant dense<0.000000e+00> : vector<8x128xf32>
    %498 = vector.multi_reduction <add>, %497, %cst_159 [0] : vector<2x8x128xf32> to vector<8x128xf32>
    %499 = vector.shape_cast %498 : vector<8x128xf32> to vector<1x8x128xf32>
    %cst_160 = arith.constant dense<0.000000e+00> : vector<1xf32>
    %500 = vector.multi_reduction <add>, %499, %cst_160 [1, 2] : vector<1x8x128xf32> to vector<1xf32>
    %501 = vector.shape_cast %500 : vector<1xf32> to vector<1x1x1xf32>
    %502 = vector.extract %501[0, 0, 0] : f32 from vector<1x1x1xf32>
    %c5_161 = arith.constant 5 : index
    %c0_162 = arith.constant 0 : index
    %503 = memref.load %arg2[%c5_161, %c0_162] : memref<10x4xf32, #tpu.memory_space<smem>>
    memref.store %502, %arg2[%c5_161, %c0_162] : memref<10x4xf32, #tpu.memory_space<smem>>
    %cst_163 = arith.constant 0.000000e+00 : f32
    %504 = vector.broadcast %cst_163 : f32 to vector<2x8x128xf32>
    %505 = arith.cmpf olt, %494, %504 : vector<2x8x128xf32>
    %506 = arith.extui %505 : vector<2x8x128xi1> to vector<2x8x128xi32>
    %507 = arith.sitofp %506 : vector<2x8x128xi32> to vector<2x8x128xf32>
    %cst_164 = arith.constant dense<0.000000e+00> : vector<8x128xf32>
    %508 = vector.multi_reduction <add>, %507, %cst_164 [0] : vector<2x8x128xf32> to vector<8x128xf32>
    %509 = vector.shape_cast %508 : vector<8x128xf32> to vector<1x8x128xf32>
    %cst_165 = arith.constant dense<0.000000e+00> : vector<1xf32>
    %510 = vector.multi_reduction <add>, %509, %cst_165 [1, 2] : vector<1x8x128xf32> to vector<1xf32>
    %511 = vector.shape_cast %510 : vector<1xf32> to vector<1x1x1xf32>
    %512 = vector.extract %511[0, 0, 0] : f32 from vector<1x1x1xf32>
    %c5_166 = arith.constant 5 : index
    %c1_167 = arith.constant 1 : index
    %513 = memref.load %arg2[%c5_166, %c1_167] : memref<10x4xf32, #tpu.memory_space<smem>>
    memref.store %512, %arg2[%c5_166, %c1_167] : memref<10x4xf32, #tpu.memory_space<smem>>
    %514 = math.absf %494 : vector<2x8x128xf32>
    %cst_168 = arith.constant dense<0.000000e+00> : vector<8x128xf32>
    %515 = vector.multi_reduction <add>, %514, %cst_168 [0] : vector<2x8x128xf32> to vector<8x128xf32>
    %516 = vector.shape_cast %515 : vector<8x128xf32> to vector<1x8x128xf32>
    %cst_169 = arith.constant dense<0.000000e+00> : vector<1xf32>
    %517 = vector.multi_reduction <add>, %516, %cst_169 [1, 2] : vector<1x8x128xf32> to vector<1xf32>
    %518 = vector.shape_cast %517 : vector<1xf32> to vector<1x1x1xf32>
    %519 = vector.extract %518[0, 0, 0] : f32 from vector<1x1x1xf32>
    %c5_170 = arith.constant 5 : index
    %c2_171 = arith.constant 2 : index
    %520 = memref.load %arg2[%c5_170, %c2_171] : memref<10x4xf32, #tpu.memory_space<smem>>
    memref.store %519, %arg2[%c5_170, %c2_171] : memref<10x4xf32, #tpu.memory_space<smem>>
    %521 = arith.mulf %494, %494 : vector<2x8x128xf32>
    %cst_172 = arith.constant dense<0.000000e+00> : vector<8x128xf32>
    %522 = vector.multi_reduction <add>, %521, %cst_172 [0] : vector<2x8x128xf32> to vector<8x128xf32>
    %523 = vector.shape_cast %522 : vector<8x128xf32> to vector<1x8x128xf32>
    %cst_173 = arith.constant dense<0.000000e+00> : vector<1xf32>
    %524 = vector.multi_reduction <add>, %523, %cst_173 [1, 2] : vector<1x8x128xf32> to vector<1xf32>
    %525 = vector.shape_cast %524 : vector<1xf32> to vector<1x1x1xf32>
    %526 = vector.extract %525[0, 0, 0] : f32 from vector<1x1x1xf32>
    %c5_174 = arith.constant 5 : index
    %c3_175 = arith.constant 3 : index
    %527 = memref.load %arg2[%c5_174, %c3_175] : memref<10x4xf32, #tpu.memory_space<smem>>
    memref.store %526, %arg2[%c5_174, %c3_175] : memref<10x4xf32, #tpu.memory_space<smem>>
    %528 = vector.extract_strided_slice %488 {offsets = [0, 127], sizes = [16, 1], strides = [1, 1]} : vector<16x128xf32> to vector<16x1xf32>
    %529 = vector.extract_strided_slice %488 {offsets = [0, 0], sizes = [16, 127], strides = [1, 1]} : vector<16x128xf32> to vector<16x127xf32>
    %530 = tpu.concatenate %528, %529 in 1 : vector<16x1xf32>, vector<16x127xf32> -> vector<16x128xf32>
    %531 = vector.broadcast %493 : vector<16x1xf32> to vector<16x128xf32>
    %532 = vector.broadcast %475 : vector<1x128xf32> to vector<16x128xf32>
    %533 = arith.mulf %531, %532 : vector<16x128xf32>
    %534 = arith.addf %530, %533 : vector<16x128xf32>
    %535 = arith.mulf %534, %488 : vector<16x128xf32>
    %536 = vector.shape_cast %535 : vector<16x128xf32> to vector<2x8x128xf32>
    %cst_176 = arith.constant 0.000000e+00 : f32
    %537 = vector.broadcast %cst_176 : f32 to vector<2x8x128xf32>
    %538 = arith.minimumf %536, %537 : vector<2x8x128xf32>
    %539 = arith.mulf %538, %538 : vector<2x8x128xf32>
    %cst_177 = arith.constant dense<0.000000e+00> : vector<8x128xf32>
    %540 = vector.multi_reduction <add>, %539, %cst_177 [0] : vector<2x8x128xf32> to vector<8x128xf32>
    %541 = vector.shape_cast %540 : vector<8x128xf32> to vector<1x8x128xf32>
    %cst_178 = arith.constant dense<0.000000e+00> : vector<1xf32>
    %542 = vector.multi_reduction <add>, %541, %cst_178 [1, 2] : vector<1x8x128xf32> to vector<1xf32>
    %543 = vector.shape_cast %542 : vector<1xf32> to vector<1x1x1xf32>
    %544 = vector.extract %543[0, 0, 0] : f32 from vector<1x1x1xf32>
    %c6_179 = arith.constant 6 : index
    %c0_180 = arith.constant 0 : index
    %545 = memref.load %arg2[%c6_179, %c0_180] : memref<10x4xf32, #tpu.memory_space<smem>>
    memref.store %544, %arg2[%c6_179, %c0_180] : memref<10x4xf32, #tpu.memory_space<smem>>
    %cst_181 = arith.constant 0.000000e+00 : f32
    %546 = vector.broadcast %cst_181 : f32 to vector<2x8x128xf32>
    %547 = arith.cmpf olt, %536, %546 : vector<2x8x128xf32>
    %548 = arith.extui %547 : vector<2x8x128xi1> to vector<2x8x128xi32>
    %549 = arith.sitofp %548 : vector<2x8x128xi32> to vector<2x8x128xf32>
    %cst_182 = arith.constant dense<0.000000e+00> : vector<8x128xf32>
    %550 = vector.multi_reduction <add>, %549, %cst_182 [0] : vector<2x8x128xf32> to vector<8x128xf32>
    %551 = vector.shape_cast %550 : vector<8x128xf32> to vector<1x8x128xf32>
    %cst_183 = arith.constant dense<0.000000e+00> : vector<1xf32>
    %552 = vector.multi_reduction <add>, %551, %cst_183 [1, 2] : vector<1x8x128xf32> to vector<1xf32>
    %553 = vector.shape_cast %552 : vector<1xf32> to vector<1x1x1xf32>
    %554 = vector.extract %553[0, 0, 0] : f32 from vector<1x1x1xf32>
    %c6_184 = arith.constant 6 : index
    %c1_185 = arith.constant 1 : index
    %555 = memref.load %arg2[%c6_184, %c1_185] : memref<10x4xf32, #tpu.memory_space<smem>>
    memref.store %554, %arg2[%c6_184, %c1_185] : memref<10x4xf32, #tpu.memory_space<smem>>
    %556 = math.absf %536 : vector<2x8x128xf32>
    %cst_186 = arith.constant dense<0.000000e+00> : vector<8x128xf32>
    %557 = vector.multi_reduction <add>, %556, %cst_186 [0] : vector<2x8x128xf32> to vector<8x128xf32>
    %558 = vector.shape_cast %557 : vector<8x128xf32> to vector<1x8x128xf32>
    %cst_187 = arith.constant dense<0.000000e+00> : vector<1xf32>
    %559 = vector.multi_reduction <add>, %558, %cst_187 [1, 2] : vector<1x8x128xf32> to vector<1xf32>
    %560 = vector.shape_cast %559 : vector<1xf32> to vector<1x1x1xf32>
    %561 = vector.extract %560[0, 0, 0] : f32 from vector<1x1x1xf32>
    %c6_188 = arith.constant 6 : index
    %c2_189 = arith.constant 2 : index
    %562 = memref.load %arg2[%c6_188, %c2_189] : memref<10x4xf32, #tpu.memory_space<smem>>
    memref.store %561, %arg2[%c6_188, %c2_189] : memref<10x4xf32, #tpu.memory_space<smem>>
    %563 = arith.mulf %536, %536 : vector<2x8x128xf32>
    %cst_190 = arith.constant dense<0.000000e+00> : vector<8x128xf32>
    %564 = vector.multi_reduction <add>, %563, %cst_190 [0] : vector<2x8x128xf32> to vector<8x128xf32>
    %565 = vector.shape_cast %564 : vector<8x128xf32> to vector<1x8x128xf32>
    %cst_191 = arith.constant dense<0.000000e+00> : vector<1xf32>
    %566 = vector.multi_reduction <add>, %565, %cst_191 [1, 2] : vector<1x8x128xf32> to vector<1xf32>
    %567 = vector.shape_cast %566 : vector<1xf32> to vector<1x1x1xf32>
    %568 = vector.extract %567[0, 0, 0] : f32 from vector<1x1x1xf32>
    %c6_192 = arith.constant 6 : index
    %c3_193 = arith.constant 3 : index
    %569 = memref.load %arg2[%c6_192, %c3_193] : memref<10x4xf32, #tpu.memory_space<smem>>
    memref.store %568, %arg2[%c6_192, %c3_193] : memref<10x4xf32, #tpu.memory_space<smem>>
    %c7_194 = arith.constant 7 : index
    %c0_195 = arith.constant 0 : index
    %570 = vector.load %arg4[%c7_194, %c0_195] : memref<24x128xf32, #tpu.memory_space<vmem>>, vector<16x128xf32>
    %571 = vector.broadcast %471 : vector<16x1xf32> to vector<16x128xf32>
    %572 = vector.broadcast %492 : vector<1x128xf32> to vector<16x128xf32>
    %573 = arith.mulf %571, %572 : vector<16x128xf32>
    %574 = arith.addf %570, %573 : vector<16x128xf32>
    %575 = arith.mulf %574, %488 : vector<16x128xf32>
    %576 = vector.shape_cast %575 : vector<16x128xf32> to vector<2x8x128xf32>
    %cst_196 = arith.constant 0.000000e+00 : f32
    %577 = vector.broadcast %cst_196 : f32 to vector<2x8x128xf32>
    %578 = arith.minimumf %576, %577 : vector<2x8x128xf32>
    %579 = arith.mulf %578, %578 : vector<2x8x128xf32>
    %cst_197 = arith.constant dense<0.000000e+00> : vector<8x128xf32>
    %580 = vector.multi_reduction <add>, %579, %cst_197 [0] : vector<2x8x128xf32> to vector<8x128xf32>
    %581 = vector.shape_cast %580 : vector<8x128xf32> to vector<1x8x128xf32>
    %cst_198 = arith.constant dense<0.000000e+00> : vector<1xf32>
    %582 = vector.multi_reduction <add>, %581, %cst_198 [1, 2] : vector<1x8x128xf32> to vector<1xf32>
    %583 = vector.shape_cast %582 : vector<1xf32> to vector<1x1x1xf32>
    %584 = vector.extract %583[0, 0, 0] : f32 from vector<1x1x1xf32>
    %c7_199 = arith.constant 7 : index
    %c0_200 = arith.constant 0 : index
    %585 = memref.load %arg2[%c7_199, %c0_200] : memref<10x4xf32, #tpu.memory_space<smem>>
    memref.store %584, %arg2[%c7_199, %c0_200] : memref<10x4xf32, #tpu.memory_space<smem>>
    %cst_201 = arith.constant 0.000000e+00 : f32
    %586 = vector.broadcast %cst_201 : f32 to vector<2x8x128xf32>
    %587 = arith.cmpf olt, %576, %586 : vector<2x8x128xf32>
    %588 = arith.extui %587 : vector<2x8x128xi1> to vector<2x8x128xi32>
    %589 = arith.sitofp %588 : vector<2x8x128xi32> to vector<2x8x128xf32>
    %cst_202 = arith.constant dense<0.000000e+00> : vector<8x128xf32>
    %590 = vector.multi_reduction <add>, %589, %cst_202 [0] : vector<2x8x128xf32> to vector<8x128xf32>
    %591 = vector.shape_cast %590 : vector<8x128xf32> to vector<1x8x128xf32>
    %cst_203 = arith.constant dense<0.000000e+00> : vector<1xf32>
    %592 = vector.multi_reduction <add>, %591, %cst_203 [1, 2] : vector<1x8x128xf32> to vector<1xf32>
    %593 = vector.shape_cast %592 : vector<1xf32> to vector<1x1x1xf32>
    %594 = vector.extract %593[0, 0, 0] : f32 from vector<1x1x1xf32>
    %c7_204 = arith.constant 7 : index
    %c1_205 = arith.constant 1 : index
    %595 = memref.load %arg2[%c7_204, %c1_205] : memref<10x4xf32, #tpu.memory_space<smem>>
    memref.store %594, %arg2[%c7_204, %c1_205] : memref<10x4xf32, #tpu.memory_space<smem>>
    %596 = math.absf %576 : vector<2x8x128xf32>
    %cst_206 = arith.constant dense<0.000000e+00> : vector<8x128xf32>
    %597 = vector.multi_reduction <add>, %596, %cst_206 [0] : vector<2x8x128xf32> to vector<8x128xf32>
    %598 = vector.shape_cast %597 : vector<8x128xf32> to vector<1x8x128xf32>
    %cst_207 = arith.constant dense<0.000000e+00> : vector<1xf32>
    %599 = vector.multi_reduction <add>, %598, %cst_207 [1, 2] : vector<1x8x128xf32> to vector<1xf32>
    %600 = vector.shape_cast %599 : vector<1xf32> to vector<1x1x1xf32>
    %601 = vector.extract %600[0, 0, 0] : f32 from vector<1x1x1xf32>
    %c7_208 = arith.constant 7 : index
    %c2_209 = arith.constant 2 : index
    %602 = memref.load %arg2[%c7_208, %c2_209] : memref<10x4xf32, #tpu.memory_space<smem>>
    memref.store %601, %arg2[%c7_208, %c2_209] : memref<10x4xf32, #tpu.memory_space<smem>>
    %603 = arith.mulf %576, %576 : vector<2x8x128xf32>
    %cst_210 = arith.constant dense<0.000000e+00> : vector<8x128xf32>
    %604 = vector.multi_reduction <add>, %603, %cst_210 [0] : vector<2x8x128xf32> to vector<8x128xf32>
    %605 = vector.shape_cast %604 : vector<8x128xf32> to vector<1x8x128xf32>
    %cst_211 = arith.constant dense<0.000000e+00> : vector<1xf32>
    %606 = vector.multi_reduction <add>, %605, %cst_211 [1, 2] : vector<1x8x128xf32> to vector<1xf32>
    %607 = vector.shape_cast %606 : vector<1xf32> to vector<1x1x1xf32>
    %608 = vector.extract %607[0, 0, 0] : f32 from vector<1x1x1xf32>
    %c7_212 = arith.constant 7 : index
    %c3_213 = arith.constant 3 : index
    %609 = memref.load %arg2[%c7_212, %c3_213] : memref<10x4xf32, #tpu.memory_space<smem>>
    memref.store %608, %arg2[%c7_212, %c3_213] : memref<10x4xf32, #tpu.memory_space<smem>>
    %610 = vector.extract_strided_slice %574 {offsets = [0, 127], sizes = [16, 1], strides = [1, 1]} : vector<16x128xf32> to vector<16x1xf32>
    %611 = vector.extract_strided_slice %574 {offsets = [0, 0], sizes = [16, 127], strides = [1, 1]} : vector<16x128xf32> to vector<16x127xf32>
    %612 = tpu.concatenate %610, %611 in 1 : vector<16x1xf32>, vector<16x127xf32> -> vector<16x128xf32>
    %613 = vector.extract_strided_slice %574 {offsets = [0, 15], sizes = [16, 1], strides = [1, 1]} : vector<16x128xf32> to vector<16x1xf32>
    %614 = vector.broadcast %613 : vector<16x1xf32> to vector<16x128xf32>
    %615 = vector.broadcast %475 : vector<1x128xf32> to vector<16x128xf32>
    %616 = arith.mulf %614, %615 : vector<16x128xf32>
    %617 = arith.addf %612, %616 : vector<16x128xf32>
    %618 = arith.mulf %617, %488 : vector<16x128xf32>
    %619 = vector.shape_cast %618 : vector<16x128xf32> to vector<2x8x128xf32>
    %cst_214 = arith.constant 0.000000e+00 : f32
    %620 = vector.broadcast %cst_214 : f32 to vector<2x8x128xf32>
    %621 = arith.minimumf %619, %620 : vector<2x8x128xf32>
    %622 = arith.mulf %621, %621 : vector<2x8x128xf32>
    %cst_215 = arith.constant dense<0.000000e+00> : vector<8x128xf32>
    %623 = vector.multi_reduction <add>, %622, %cst_215 [0] : vector<2x8x128xf32> to vector<8x128xf32>
    %624 = vector.shape_cast %623 : vector<8x128xf32> to vector<1x8x128xf32>
    %cst_216 = arith.constant dense<0.000000e+00> : vector<1xf32>
    %625 = vector.multi_reduction <add>, %624, %cst_216 [1, 2] : vector<1x8x128xf32> to vector<1xf32>
    %626 = vector.shape_cast %625 : vector<1xf32> to vector<1x1x1xf32>
    %627 = vector.extract %626[0, 0, 0] : f32 from vector<1x1x1xf32>
    %c8_217 = arith.constant 8 : index
    %c0_218 = arith.constant 0 : index
    %628 = memref.load %arg2[%c8_217, %c0_218] : memref<10x4xf32, #tpu.memory_space<smem>>
    memref.store %627, %arg2[%c8_217, %c0_218] : memref<10x4xf32, #tpu.memory_space<smem>>
    %cst_219 = arith.constant 0.000000e+00 : f32
    %629 = vector.broadcast %cst_219 : f32 to vector<2x8x128xf32>
    %630 = arith.cmpf olt, %619, %629 : vector<2x8x128xf32>
    %631 = arith.extui %630 : vector<2x8x128xi1> to vector<2x8x128xi32>
    %632 = arith.sitofp %631 : vector<2x8x128xi32> to vector<2x8x128xf32>
    %cst_220 = arith.constant dense<0.000000e+00> : vector<8x128xf32>
    %633 = vector.multi_reduction <add>, %632, %cst_220 [0] : vector<2x8x128xf32> to vector<8x128xf32>
    %634 = vector.shape_cast %633 : vector<8x128xf32> to vector<1x8x128xf32>
    %cst_221 = arith.constant dense<0.000000e+00> : vector<1xf32>
    %635 = vector.multi_reduction <add>, %634, %cst_221 [1, 2] : vector<1x8x128xf32> to vector<1xf32>
    %636 = vector.shape_cast %635 : vector<1xf32> to vector<1x1x1xf32>
    %637 = vector.extract %636[0, 0, 0] : f32 from vector<1x1x1xf32>
    %c8_222 = arith.constant 8 : index
    %c1_223 = arith.constant 1 : index
    %638 = memref.load %arg2[%c8_222, %c1_223] : memref<10x4xf32, #tpu.memory_space<smem>>
    memref.store %637, %arg2[%c8_222, %c1_223] : memref<10x4xf32, #tpu.memory_space<smem>>
    %639 = math.absf %619 : vector<2x8x128xf32>
    %cst_224 = arith.constant dense<0.000000e+00> : vector<8x128xf32>
    %640 = vector.multi_reduction <add>, %639, %cst_224 [0] : vector<2x8x128xf32> to vector<8x128xf32>
    %641 = vector.shape_cast %640 : vector<8x128xf32> to vector<1x8x128xf32>
    %cst_225 = arith.constant dense<0.000000e+00> : vector<1xf32>
    %642 = vector.multi_reduction <add>, %641, %cst_225 [1, 2] : vector<1x8x128xf32> to vector<1xf32>
    %643 = vector.shape_cast %642 : vector<1xf32> to vector<1x1x1xf32>
    %644 = vector.extract %643[0, 0, 0] : f32 from vector<1x1x1xf32>
    %c8_226 = arith.constant 8 : index
    %c2_227 = arith.constant 2 : index
    %645 = memref.load %arg2[%c8_226, %c2_227] : memref<10x4xf32, #tpu.memory_space<smem>>
    memref.store %644, %arg2[%c8_226, %c2_227] : memref<10x4xf32, #tpu.memory_space<smem>>
    %646 = arith.mulf %619, %619 : vector<2x8x128xf32>
    %cst_228 = arith.constant dense<0.000000e+00> : vector<8x128xf32>
    %647 = vector.multi_reduction <add>, %646, %cst_228 [0] : vector<2x8x128xf32> to vector<8x128xf32>
    %648 = vector.shape_cast %647 : vector<8x128xf32> to vector<1x8x128xf32>
    %cst_229 = arith.constant dense<0.000000e+00> : vector<1xf32>
    %649 = vector.multi_reduction <add>, %648, %cst_229 [1, 2] : vector<1x8x128xf32> to vector<1xf32>
    %650 = vector.shape_cast %649 : vector<1xf32> to vector<1x1x1xf32>
    %651 = vector.extract %650[0, 0, 0] : f32 from vector<1x1x1xf32>
    %c8_230 = arith.constant 8 : index
    %c3_231 = arith.constant 3 : index
    %652 = memref.load %arg2[%c8_230, %c3_231] : memref<10x4xf32, #tpu.memory_space<smem>>
    memref.store %651, %arg2[%c8_230, %c3_231] : memref<10x4xf32, #tpu.memory_space<smem>>
    %653 = vector.extract_strided_slice %574 {offsets = [0, 1], sizes = [16, 127], strides = [1, 1]} : vector<16x128xf32> to vector<16x127xf32>
    %654 = vector.extract_strided_slice %574 {offsets = [0, 0], sizes = [16, 1], strides = [1, 1]} : vector<16x128xf32> to vector<16x1xf32>
    %655 = tpu.concatenate %653, %654 in 1 : vector<16x127xf32>, vector<16x1xf32> -> vector<16x128xf32>
    %656 = vector.extract_strided_slice %574 {offsets = [0, 0], sizes = [16, 1], strides = [1, 1]} : vector<16x128xf32> to vector<16x1xf32>
    %657 = vector.broadcast %656 : vector<16x1xf32> to vector<16x128xf32>
    %658 = vector.broadcast %479 : vector<1x128xf32> to vector<16x128xf32>
    %659 = arith.mulf %657, %658 : vector<16x128xf32>
    %660 = arith.addf %655, %659 : vector<16x128xf32>
    %661 = arith.mulf %660, %488 : vector<16x128xf32>
    %662 = vector.shape_cast %661 : vector<16x128xf32> to vector<2x8x128xf32>
    %cst_232 = arith.constant 0.000000e+00 : f32
    %663 = vector.broadcast %cst_232 : f32 to vector<2x8x128xf32>
    %664 = arith.minimumf %662, %663 : vector<2x8x128xf32>
    %665 = arith.mulf %664, %664 : vector<2x8x128xf32>
    %cst_233 = arith.constant dense<0.000000e+00> : vector<8x128xf32>
    %666 = vector.multi_reduction <add>, %665, %cst_233 [0] : vector<2x8x128xf32> to vector<8x128xf32>
    %667 = vector.shape_cast %666 : vector<8x128xf32> to vector<1x8x128xf32>
    %cst_234 = arith.constant dense<0.000000e+00> : vector<1xf32>
    %668 = vector.multi_reduction <add>, %667, %cst_234 [1, 2] : vector<1x8x128xf32> to vector<1xf32>
    %669 = vector.shape_cast %668 : vector<1xf32> to vector<1x1x1xf32>
    %670 = vector.extract %669[0, 0, 0] : f32 from vector<1x1x1xf32>
    %c9_235 = arith.constant 9 : index
    %c0_236 = arith.constant 0 : index
    %671 = memref.load %arg2[%c9_235, %c0_236] : memref<10x4xf32, #tpu.memory_space<smem>>
    memref.store %670, %arg2[%c9_235, %c0_236] : memref<10x4xf32, #tpu.memory_space<smem>>
    %cst_237 = arith.constant 0.000000e+00 : f32
    %672 = vector.broadcast %cst_237 : f32 to vector<2x8x128xf32>
    %673 = arith.cmpf olt, %662, %672 : vector<2x8x128xf32>
    %674 = arith.extui %673 : vector<2x8x128xi1> to vector<2x8x128xi32>
    %675 = arith.sitofp %674 : vector<2x8x128xi32> to vector<2x8x128xf32>
    %cst_238 = arith.constant dense<0.000000e+00> : vector<8x128xf32>
    %676 = vector.multi_reduction <add>, %675, %cst_238 [0] : vector<2x8x128xf32> to vector<8x128xf32>
    %677 = vector.shape_cast %676 : vector<8x128xf32> to vector<1x8x128xf32>
    %cst_239 = arith.constant dense<0.000000e+00> : vector<1xf32>
    %678 = vector.multi_reduction <add>, %677, %cst_239 [1, 2] : vector<1x8x128xf32> to vector<1xf32>
    %679 = vector.shape_cast %678 : vector<1xf32> to vector<1x1x1xf32>
    %680 = vector.extract %679[0, 0, 0] : f32 from vector<1x1x1xf32>
    %c9_240 = arith.constant 9 : index
    %c1_241 = arith.constant 1 : index
    %681 = memref.load %arg2[%c9_240, %c1_241] : memref<10x4xf32, #tpu.memory_space<smem>>
    memref.store %680, %arg2[%c9_240, %c1_241] : memref<10x4xf32, #tpu.memory_space<smem>>
    %682 = math.absf %662 : vector<2x8x128xf32>
    %cst_242 = arith.constant dense<0.000000e+00> : vector<8x128xf32>
    %683 = vector.multi_reduction <add>, %682, %cst_242 [0] : vector<2x8x128xf32> to vector<8x128xf32>
    %684 = vector.shape_cast %683 : vector<8x128xf32> to vector<1x8x128xf32>
    %cst_243 = arith.constant dense<0.000000e+00> : vector<1xf32>
    %685 = vector.multi_reduction <add>, %684, %cst_243 [1, 2] : vector<1x8x128xf32> to vector<1xf32>
    %686 = vector.shape_cast %685 : vector<1xf32> to vector<1x1x1xf32>
    %687 = vector.extract %686[0, 0, 0] : f32 from vector<1x1x1xf32>
    %c9_244 = arith.constant 9 : index
    %c2_245 = arith.constant 2 : index
    %688 = memref.load %arg2[%c9_244, %c2_245] : memref<10x4xf32, #tpu.memory_space<smem>>
    memref.store %687, %arg2[%c9_244, %c2_245] : memref<10x4xf32, #tpu.memory_space<smem>>
    %689 = arith.mulf %662, %662 : vector<2x8x128xf32>
    %cst_246 = arith.constant dense<0.000000e+00> : vector<8x128xf32>
    %690 = vector.multi_reduction <add>, %689, %cst_246 [0] : vector<2x8x128xf32> to vector<8x128xf32>
    %691 = vector.shape_cast %690 : vector<8x128xf32> to vector<1x8x128xf32>
    %cst_247 = arith.constant dense<0.000000e+00> : vector<1xf32>
    %692 = vector.multi_reduction <add>, %691, %cst_247 [1, 2] : vector<1x8x128xf32> to vector<1xf32>
    %693 = vector.shape_cast %692 : vector<1xf32> to vector<1x1x1xf32>
    %694 = vector.extract %693[0, 0, 0] : f32 from vector<1x1x1xf32>
    %c9_248 = arith.constant 9 : index
    %c3_249 = arith.constant 3 : index
    %695 = memref.load %arg2[%c9_248, %c3_249] : memref<10x4xf32, #tpu.memory_space<smem>>
    memref.store %694, %arg2[%c9_248, %c3_249] : memref<10x4xf32, #tpu.memory_space<smem>>
    return
  }
}

</mosaic_0001>

<bundles_post_ra>
// kernel: brisque_pallas.1
= control target key start
LH: loop header
LB: loop body
LE: loop exit
PB: predicated region body
PF: predicated region fallthrough
CT: control target
= control target key end

     0   :  { %7 = vsyncpa [#allocation5], 0  ;;  %s2685_s0 = inlined_call_operand.hbm [shape: f32[48,128], index: 0, kind: input, shape index: {}]   ;;  %s2686_s1 = inlined_call_operand.hbm [shape: f32[32,128], index: 1, kind: input, shape index: {}]   ;;  %s2687_s2 = inlined_call_operand.hbm [shape: f32[10,4], index: 2, kind: output, shape index: {}]  }
   0x1   :  { %8 = vsyncpa [#allocation8], 0 }
   0x2   :  { %9 = vsyncpa [#allocation6], 0  ;;  %s1950_s9 = smov [#allocation4]   ;;  %s1890_s13 = scalar_lea.hbm %s2685_s0, 768 }
   0x3   :  { %s15_s10 = sshll.u32 %s1950_s9, 4  ;;  %p1891_p0 = scmp.ne.s32.totalorder %s2685_s0, %s1890_s13  ;;  %s16_s10 = int_to_ptr.vmem [resolvable:$true] %s15_s10 }
   0x4   :  { %p1894_p1 = scmp.lt.u32.totalorder %s1890_s13, %s2685_s0 }
   0x6   :  { %p1896_p2 = pnand %p1894_p1, %p1891_p0 }
   0x8   :  { %1899 = shalt.err (!%p1896_p2)
}
   0x9   :  { %s1900_s18 = scalar_lea.vmem %s16_s10, 768  ;;  %p1905_p4 = scmp.lt.s32.totalorder %s16_s10, %s16_s10 }
   0xa   :  { %p1901_p3 = scmp.ne.s32.totalorder %s16_s10, %s1900_s18  ;;  %p1906_p5 = scmp.lt.s32.totalorder %s1900_s18, %s1900_s18 }
   0xc   :  { %p1907_p6 = por %p1906_p5, %p1905_p4 }
   0xe   :  { %p1908_p7 = pnand %p1907_p6, %p1901_p3 }
  0x10   :  { %1911 = shalt.err (!%p1908_p7)
}
  0x11   :  { %s1951_s19 = smov 128   ;;  %s1952_s20 = smov 8  }
  0x12   :  { %21 = dma.hbm_to_vmem [thread:$0]  %s2685_s0, 768, %s16_s10, [#allocation5], %s1951_s19, %s1951_s19, %s1952_s20  }
  0x13   :  { %s1953_s23 = smov [#allocation7]   ;;  %s1912_s27 = scalar_lea.hbm %s2686_s1, 512 }
  0x14   :  { %s27_s24 = sshll.u32 %s1953_s23, 4  ;;  %p1913_p8 = scmp.ne.s32.totalorder %s2686_s1, %s1912_s27  ;;  %s28_s24 = int_to_ptr.vmem [resolvable:$true] %s27_s24 }
  0x15   :  { %p1916_p9 = scmp.lt.u32.totalorder %s1912_s27, %s2686_s1 }
  0x17   :  { %p1918_p10 = pnand %p1916_p9, %p1913_p8 }
  0x19   :  { %1921 = shalt.err (!%p1918_p10)
}
  0x1a   :  { %s1922_s4 = scalar_lea.vmem %s28_s24, 512  ;;  %p1927_p12 = scmp.lt.s32.totalorder %s28_s24, %s28_s24 }
  0x1b   :  { %p1923_p11 = scmp.ne.s32.totalorder %s28_s24, %s1922_s4  ;;  %p1928_p13 = scmp.lt.s32.totalorder %s1922_s4, %s1922_s4 }
  0x1d   :  { %p1929_p0 = por %p1928_p13, %p1927_p12 }
  0x1f   :  { %p1930_p1 = pnand %p1929_p0, %p1923_p11 }
  0x21   :  { %1933 = shalt.err (!%p1930_p1)
}
  0x22   :  { %33 = dma.hbm_to_vmem [thread:$0]  %s2686_s1, 512, %s28_s24, [#allocation8], %s1951_s19, %s1951_s19, %s1952_s20  }
  0x23   :  { %1944 = dma.done.wait [#allocation5], 768  }
  0x24   :  { %1945 = vsyncadd [#allocation5], 4294966528 }
  0x25   :  { %1946 = dma.done.wait [#allocation8], 512  }
  0x26   :  { %1947 = vsyncadd [#allocation8], 4294966784  ;;  %v2010_v0 = vld [vmem:[#allocation4 + $0x18] sm:$0xff]  ;;  %v2024_v11 = vld [vmem:[#allocation4 + $0x8] sm:$0xff]  ;;  %s1954_s1 = smov 1   ;;  %s1955_s6 = smov 127  }
  0x27   :  { %2697 = vst [vmem:[#allocation13_spill] sm:$0xff] %v2010_v0  ;;  %v58_v1 = vld [vmem:[#allocation4 + $0x17] sm:$0xff]  ;;  %v46_v3 = vmul.f32 0.34263152, %v2010_v0  ;;  %v2019_v8 = vmul.f32 %v2010_v0, %v2010_v0  ;;  %v56_v12 = vld [vmem:[#allocation4 + $0x7] sm:$0xff]  ;;  %v2037_v21 = vmul.f32 %v2024_v11, %v2024_v11  ;;  %v2050_v34 = vld [vmem:[#allocation4 + $0x1f] sm:$0xff] }
  0x28   :  { %v62_v2 = vld [vmem:[#allocation4 + $0x19] sm:$0xff]  ;;  %v2026_v13 = vmul.f32 %v58_v1, %v58_v1  ;;  %v44_v18 = vmul.f32 0.34263152, %v2024_v11  ;;  %v60_v19 = vld [vmem:[#allocation4 + $0x9] sm:$0xff]  ;;  %v76_v27 = vmul.f32 %v56_v12, %v56_v12  ;;  %v2052_v35 = vld [vmem:[#allocation4 + $0x21] sm:$0xff]  ;;  %s1956_s7 = smov 2  }
  0x29   :  { %v66_v4 = vadd.f32 %v62_v2, %v58_v1  ;;  %v98_v5 = vld [vmem:[#allocation4 + $0x16] sm:$0xff]  ;;  %v2028_v14 = vmul.f32 %v62_v2, %v62_v2  ;;  %v96_v20 = vld [vmem:[#allocation4 + $0x6] sm:$0xff]  ;;  %v64_v23 = vadd.f32 %v60_v19, %v56_v12  ;;  %v80_v28 = vmul.f32 %v60_v19, %v60_v19  ;;  %v2057_v39 = vld [vmem:[#allocation4 + $0x1e] sm:$0xff]  ;;  %s1957_s8 = smov 126   ;;  %s1958_s9 = smov 3  }
  0x2a   :  { %v2013_v6 = vld [vmem:[#allocation4 + $0x1a] sm:$0xff]  ;;  %v2030_v15 = vmul.f32 %v98_v5, %v98_v5  ;;  %v2039_v24 = vld [vmem:[#allocation4 + $0xa] sm:$0xff]  ;;  %v67_v38 = vadd.f32 %v2052_v35, %v2050_v34  ;;  %v2059_v40 = vld [vmem:[#allocation4 + $0x22] sm:$0xff]  ;;  %v116_v54 = vmul.f32 %v96_v20, %v96_v20  ;;  %s1959_s10 = smov 125  }
  0x2b   :  { %v2015_v7 = vld [vmem:[#allocation4 + $0x15] sm:$0xff]  ;;  %v106_v9 = vadd.f32 %v2013_v6, %v98_v5  ;;  %v70_v16 = vmul.f32 0.23729607, %v66_v4  ;;  %v2041_v25 = vld [vmem:[#allocation4 + $0x5] sm:$0xff]  ;;  %v104_v31 = vadd.f32 %v2039_v24, %v96_v20  ;;  %v68_v36 = vmul.f32 0.23729607, %v64_v23 }
  0x2c   :  { %v2022_v10 = vld [vmem:[#allocation4 + $0x1b] sm:$0xff]  ;;  %v2043_v26 = vld [vmem:[#allocation4 + $0xb] sm:$0xff]  ;;  %v84_v41 = vadd.f32 %v80_v28, %v76_v27  ;;  %v107_v45 = vadd.f32 %v2059_v40, %v2057_v39  ;;  %v2065_v47 = vld [vmem:[#allocation4 + $0x23] sm:$0xff]  ;;  %v71_v49 = vmul.f32 0.23729607, %v67_v38 }
  0x2d   :  { %v146_v17 = vadd.f32 %v2022_v10, %v2015_v7  ;;  %v110_v22 = vmul.f32 0.07882796, %v106_v9  ;;  %v74_v29 = vadd.f32 %v70_v16, %v46_v3  ;;  %v144_v32 = vadd.f32 %v2043_v26, %v2041_v25  ;;  %v2048_v33 = vld [vmem:[#allocation4 + $0x20] sm:$0xff]  ;;  %v2069_v51 = vld [vmem:[#allocation4 + $0x10] sm:$0xff] }
  0x2e   :  { %v47_v37 = vmul.f32 0.34263152, %v2048_v33  ;;  %v108_v43 = vmul.f32 0.07882796, %v104_v31  ;;  %v2063_v46 = vld [vmem:[#allocation4 + $0x1d] sm:$0xff]  ;;  %v72_v48 = vadd.f32 %v68_v36, %v44_v18  ;;  %v57_v52 = vld [vmem:[#allocation4 + $0xf] sm:$0xff]  ;;  %v49_v9 = vmul.f32 %v2069_v51, %v2069_v51 }
  0x2f   :  { %v150_v30 = vmul.f32 0.012560201, %v146_v17  ;;  %v114_v42 = vadd.f32 %v110_v22, %v74_v29  ;;  %v148_v44 = vmul.f32 0.012560201, %v144_v32  ;;  %v147_v50 = vadd.f32 %v2065_v47, %v2063_v46  ;;  %v61_v53 = vld [vmem:[#allocation4 + $0x11] sm:$0xff] }
  0x30   :  { %v111_v56 = vmul.f32 0.07882796, %v107_v45  ;;  %v45_v57 = vmul.f32 0.34263152, %v2069_v51  ;;  %v65_v58 = vadd.f32 %v61_v53, %v57_v52  ;;  %v97_v59 = vld [vmem:[#allocation4 + $0xe] sm:$0xff]  ;;  %v112_v61 = vadd.f32 %v108_v43, %v72_v48 }
  0x31   :  { %v2071_v55 = vadd.f32 %v150_v30, %v114_v42  ;;  %v101_v60 = vld [vmem:[#allocation4 + $0x12] sm:$0xff]  ;;  %v75_v62 = vadd.f32 %v71_v49, %v47_v37  ;;  %v151_v63 = vmul.f32 0.012560201, %v147_v50  ;;  %v77_v12 = vmul.f32 %v57_v52, %v57_v52 }
  0x32   :  { %v105_v1 = vadd.f32 %v101_v60, %v97_v59  ;;  %v137_v2 = vld [vmem:[#allocation4 + $0xd] sm:$0xff]  ;;  %v69_v4 = vmul.f32 0.23729607, %v65_v58  ;;  %v2078_v16 = vadd.f32 %v148_v44, %v112_v61  ;;  %v81_v19 = vmul.f32 %v61_v53, %v61_v53 }
  0x33   :  { %v141_v3 = vld [vmem:[#allocation4 + $0x13] sm:$0xff]  ;;  %192 = vrot.lane.b32.xlu1 %v2071_v55, %s1954_s1  ;;  %v115_v17 = vadd.f32 %v111_v56, %v75_v62  ;;  %v53_v23 = vmul.f32 0.34263152, %v49_v9  ;;  %v117_v27 = vmul.f32 %v97_v59, %v97_v59  ;;  %v121_v30 = vmul.f32 %v101_v60, %v101_v60 }
  0x34   :  { %v145_v5 = vadd.f32 %v141_v3, %v137_v2  ;;  %v109_v18 = vmul.f32 0.07882796, %v105_v1  ;;  %v73_v20 = vadd.f32 %v69_v4, %v45_v57  ;;  %188 = vrot.lane.b32.xlu0 %v2078_v16, %s1954_s1  ;;  %v85_v29 = vadd.f32 %v81_v19, %v77_v12 }
  0x35   :  { %v2082_v28 = vadd.f32 %v151_v63, %v115_v17  ;;  %v157_v31 = vmul.f32 %v137_v2, %v137_v2  ;;  %v161_v36 = vmul.f32 %v141_v3, %v141_v3  ;;  %v52_v37 = vmul.f32 0.34263152, %v2037_v21 }
  0x36   :  { %v149_v22 = vmul.f32 0.012560201, %v145_v5  ;;  %v113_v32 = vadd.f32 %v109_v18, %v73_v20  ;;  %v88_v38 = vmul.f32 0.23729607, %v84_v41  ;;  %v89_v42 = vmul.f32 0.23729607, %v85_v29 }
  0x37   :  { %194 = vrot.lane.b32.xlu1 %v2082_v28, %s1954_s1  ;;  %v125_v43 = vadd.f32 %v121_v30, %v117_v27  ;;  %v120_v44 = vmul.f32 %v2039_v24, %v2039_v24  ;;  %v156_v45 = vmul.f32 %v2041_v25, %v2041_v25  ;;  %v165_v49 = vadd.f32 %v161_v36, %v157_v31  ;;  %v1095_v29 = vld [vmem:[#allocation7 + $0xf] sm:$0xff] }
  0x38   :  { %v2091_v48 = vadd.f32 %v149_v22, %v113_v32  ;;  %v92_v50 = vadd.f32 %v88_v38, %v52_v37  ;;  %v160_v52 = vmul.f32 %v2043_v26, %v2043_v26  ;;  %v93_v21 = vadd.f32 %v89_v42, %v53_v23  ;;  %v1097_v30 = vld [vmem:[#allocation7 + $0x11] sm:$0xff] }
  0x39   :  { %v129_v41 = vmul.f32 0.07882796, %v125_v43  ;;  %v124_v53 = vadd.f32 %v120_v44, %v116_v54  ;;  %v51_v56 = vmul.f32 %v2048_v33, %v2048_v33  ;;  %v79_v25 = vmul.f32 %v2050_v34, %v2050_v34  ;;  %v1087_v32 = vld [vmem:[#allocation7 + $0x10] sm:$0xff] }
  0x3a   :  { %190 = vrot.lane.b32.xlu0 %v2091_v48, %s1954_s1  ;;  %v164_v24 = vadd.f32 %v160_v52, %v156_v45  ;;  %v83_v57 = vmul.f32 %v2052_v35, %v2052_v35  ;;  %v122_v58 = vmul.f32 %v2013_v6, %v2013_v6  ;;  %v169_v54 = vmul.f32 0.012560201, %v165_v49  ;;  %v1115_v36 = vld [vmem:[#allocation7 + $0xe] sm:$0xff] }
  0x3b   :  { %202 = vrot.lane.b32.xlu1 %v2091_v48, %s1955_s6  ;;  %v133_v26 = vadd.f32 %v129_v41, %v93_v21  ;;  %v128_v59 = vmul.f32 0.07882796, %v124_v53  ;;  %v119_v60 = vmul.f32 %v2057_v39, %v2057_v39  ;;  %v55_v61 = vmul.f32 0.34263152, %v51_v56  ;;  %v1117_v37 = vld [vmem:[#allocation7 + $0x12] sm:$0xff]  ;;  %v1094_v49 = vld [vmem:[#allocation7 + $0x7] sm:$0xff] }
  0x3c   :  { %v87_v62 = vadd.f32 %v83_v57, %v79_v25  ;;  %v123_v34 = vmul.f32 %v2059_v40, %v2059_v40  ;;  %v159_v35 = vmul.f32 %v2063_v46, %v2063_v46  ;;  %v168_v6 = vmul.f32 0.012560201, %v164_v24  ;;  %v1135_v44 = vld [vmem:[#allocation7 + $0xd] sm:$0xff] }
  0x3d   :  { %v132_v63 = vadd.f32 %v128_v59, %v92_v50  ;;  %v163_v1 = vmul.f32 %v2065_v47, %v2065_v47  ;;  %v54_v2 = vmul.f32 0.34263152, %v2019_v8  ;;  %v86_v4 = vadd.f32 %v2028_v14, %v2026_v13  ;;  %v1137_v45 = vld [vmem:[#allocation7 + $0x13] sm:$0xff]  ;;  %v1096_v41 = vld [vmem:[#allocation7 + $0x9] sm:$0xff] }
  0x3e   :  { %200 = vrot.lane.b32.xlu0 %v2078_v16, %s1955_s6  ;;  %v91_v3 = vmul.f32 0.23729607, %v87_v62  ;;  %v127_v39 = vadd.f32 %v123_v34, %v119_v60  ;;  %v126_v40 = vadd.f32 %v122_v58, %v2030_v15  ;;  %v2123_v46 = vadd.f32 %v169_v54, %v133_v26  ;;  %v1086_v53 = vld [vmem:[#allocation7 + $0x8] sm:$0xff] }
  0x3f   :  { %206 = vrot.lane.b32.xlu1 %v2082_v28, %s1955_s6  ;;  %v167_v5 = vadd.f32 %v163_v1, %v159_v35  ;;  %v158_v47 = vmul.f32 %v2015_v7, %v2015_v7  ;;  %v162_v8 = vmul.f32 %v2022_v10, %v2022_v10  ;;  %v90_v17 = vmul.f32 0.23729607, %v86_v4  ;;  %v1114_v24 = vld [vmem:[#allocation7 + $0x6] sm:$0xff] }
  0x40   :  { %v95_v9 = vadd.f32 %v91_v3, %v55_v61  ;;  %v131_v12 = vmul.f32 0.07882796, %v127_v39  ;;  %v130_v18 = vmul.f32 0.07882796, %v126_v40  ;;  %v2131_v14 = vadd.f32 %v168_v6, %v132_v63  ;;  %v1116_v25 = vld [vmem:[#allocation7 + $0xa] sm:$0xff] }
  0x41   :  { %v171_v19 = vmul.f32 0.012560201, %v167_v5  ;;  %v166_v13 = vadd.f32 %v162_v8, %v158_v47  ;;  %v94_v20 = vadd.f32 %v90_v17, %v54_v2  ;;  %v2688_v27 = vmov 0.0   ;;  %v1134_v60 = vld [vmem:[#allocation7 + $0x5] sm:$0xff] }
  0x42   :  { %204 = vrot.lane.b32.xlu0 %v2071_v55, %s1955_s6  ;;  %v135_v15 = vadd.f32 %v131_v12, %v95_v9  ;;  %512 = vst [vmem:[#allocation2] sm:$0xff] %v2688_v27  ;;  %1314 = vst [vmem:[#allocation3] sm:$0xff] %v2688_v27  ;;  %v1099_v31 = vadd.f32 %v1097_v30, %v1095_v29  ;;  %v1089_v38 = vmul.f32 0.34263152, %v1087_v32  ;;  %v1088_v26 = vmul.f32 0.34263152, %v1086_v53 }
  0x43   :  { %230 = vrot.lane.b32.xlu1 %v2123_v46, %s1954_s1  ;;  %v170_v7 = vmul.f32 0.012560201, %v166_v13  ;;  %v134_v10 = vadd.f32 %v130_v18, %v94_v20  ;;  %v1119_v43 = vadd.f32 %v1117_v37, %v1115_v36  ;;  %v1139_v21 = vadd.f32 %v1137_v45, %v1135_v44  ;;  %v1136_v61 = vld [vmem:[#allocation7 + $0xb] sm:$0xff] }
  0x44   :  { %v2135_v22 = vadd.f32 %v171_v19, %v135_v15  ;;  %v1101_v42 = vmul.f32 0.23729607, %v1099_v31  ;;  %v1098_v56 = vadd.f32 %v1096_v41, %v1094_v49  ;;  %v1118_v54 = vadd.f32 %v1116_v25, %v1114_v24 }
  0x45   :  { %v2139_v23 = vadd.f32 %v170_v7, %v134_v10  ;;  %v1121_v52 = vmul.f32 0.07882796, %v1119_v43  ;;  %v1141_v58 = vmul.f32 0.012560201, %v1139_v21  ;;  %v1105_v62 = vmul.f32 %v1095_v29, %v1095_v29 }
  0x46   :  { %228 = vrot.lane.b32.xlu0 %v2131_v14, %s1954_s1  ;;  %v1103_v50 = vadd.f32 %v1101_v42, %v1089_v38  ;;  %v1100_v59 = vmul.f32 0.23729607, %v1098_v56  ;;  %v1107_v34 = vmul.f32 %v1097_v30, %v1097_v30  ;;  %v1120_v63 = vmul.f32 0.07882796, %v1118_v54 }
  0x47   :  { %234 = vrot.lane.b32.xlu1 %v2135_v22, %s1954_s1  ;;  %v1138_v6 = vadd.f32 %v1136_v61, %v1134_v60  ;;  %v1091_v1 = vmul.f32 %v1087_v32, %v1087_v32  ;;  %v1125_v39 = vmul.f32 %v1115_v36, %v1115_v36  ;;  %v1127_v4 = vmul.f32 %v1117_v37, %v1117_v37 }
  0x48   :  { %v1123_v57 = vadd.f32 %v1121_v52, %v1103_v50  ;;  %v1102_v2 = vadd.f32 %v1100_v59, %v1088_v26  ;;  %v1109_v3 = vadd.f32 %v1107_v34, %v1105_v62  ;;  %v1145_v47 = vmul.f32 %v1135_v44, %v1135_v44 }
  0x49   :  { %v1140_v40 = vmul.f32 0.012560201, %v1138_v6  ;;  %v1093_v5 = vmul.f32 0.34263152, %v1091_v1  ;;  %v1147_v8 = vmul.f32 %v1137_v45, %v1137_v45  ;;  %v1129_v17 = vadd.f32 %v1127_v4, %v1125_v39 }
  0x4a   :  { %232 = vrot.lane.b32.xlu0 %v2139_v23, %s1954_s1  ;;  %v2213_v35 = vadd.f32 %v1141_v58, %v1123_v57  ;;  %v1122_v9 = vadd.f32 %v1120_v63, %v1102_v2  ;;  %v1111_v12 = vmul.f32 0.23729607, %v1109_v3  ;;  %v1104_v29 = vmul.f32 %v1094_v49, %v1094_v49 }
  0x4b   :  { %242 = vrot.lane.b32.xlu1 %v2123_v46, %s1955_s6  ;;  %v1149_v18 = vadd.f32 %v1147_v8, %v1145_v47  ;;  %v1131_v13 = vmul.f32 0.07882796, %v1129_v17  ;;  %v1106_v30 = vmul.f32 %v1096_v41, %v1096_v41  ;;  %v1090_v31 = vmul.f32 %v1086_v53, %v1086_v53 }
  0x4c   :  { %v1113_v19 = vadd.f32 %v1111_v12, %v1093_v5  ;;  %v2223_v15 = vadd.f32 %v1140_v40, %v1122_v9  ;;  %v1124_v36 = vmul.f32 %v1114_v24, %v1114_v24  ;;  %v1126_v37 = vmul.f32 %v1116_v25, %v1116_v25 }
  0x4d   :  { %v1151_v20 = vmul.f32 0.012560201, %v1149_v18  ;;  %v1108_v32 = vadd.f32 %v1106_v30, %v1104_v29  ;;  %v1092_v38 = vmul.f32 0.34263152, %v1090_v31  ;;  %v1144_v44 = vmul.f32 %v1134_v60, %v1134_v60 }
  0x4e   :  { %240 = vrot.lane.b32.xlu0 %v2131_v14, %s1955_s6  ;;  %2698 = vst [vmem:[#allocation14_spill] sm:$0xff] %v2223_v15  ;;  %v1133_v7 = vadd.f32 %v1131_v13, %v1113_v19  ;;  %v1128_v43 = vadd.f32 %v1126_v37, %v1124_v36  ;;  %v1146_v45 = vmul.f32 %v1136_v61, %v1136_v61  ;;  %v179_v27 = vmul.f32 0.34263152, %v2082_v28 }
  0x4f   :  { %246 = vrot.lane.b32.xlu1 %v2135_v22, %s1955_s6  ;;  %v1110_v42 = vmul.f32 0.23729607, %v1108_v32  ;;  %v178_v0 = vmul.f32 0.34263152, %v2071_v55 }
  0x50   :  { %v2229_v10 = vadd.f32 %v1151_v20, %v1133_v7  ;;  %v1130_v50 = vmul.f32 0.07882796, %v1128_v43  ;;  %v1148_v21 = vadd.f32 %v1146_v45, %v1144_v44 }
  0x51   :  { %v1112_v49 = vadd.f32 %v1110_v42, %v1092_v38 }
  0x52   :  { %244 = vrot.lane.b32.xlu0 %v2139_v23, %s1955_s6  ;;  %2699 = vst [vmem:[#allocation15_spill] sm:$0xff] %v2229_v10  ;;  %v1150_v56 = vmul.f32 0.012560201, %v1148_v21 }
  0x53   :  { %266 = vrot.lane.b32.xlu1 %v2091_v48, %s1956_s7  ;;  %v1132_v41 = vadd.f32 %v1130_v50, %v1112_v49  ;;  %v177_v50 = vmul.f32 0.34263152, %v2091_v48 }
  0x55   :  { %v2241_v58 = vadd.f32 %v1150_v56, %v1132_v41  ;;  %v176_v56 = vmul.f32 0.34263152, %v2078_v16 }
  0x56   :  { %264 = vrot.lane.b32.xlu0 %v2078_v16, %s1956_s7 }
  0x57   :  { %270 = vrot.lane.b32.xlu1 %v2082_v28, %s1956_s7  ;;  %2700 = vst [vmem:[#allocation16_spill] sm:$0xff] %v2241_v58 }
  0x5a   :  { %268 = vrot.lane.b32.xlu0 %v2071_v55, %s1956_s7 }
  0x5b   :  { %278 = vrot.lane.b32.xlu1 %v2091_v48, %s1957_s8 }
  0x5e   :  { %276 = vrot.lane.b32.xlu0 %v2078_v16, %s1957_s8 }
  0x5f   :  { %282 = vrot.lane.b32.xlu1 %v2082_v28, %s1957_s8 }
  0x62   :  { %280 = vrot.lane.b32.xlu0 %v2071_v55, %s1957_s8 }
  0x63   :  { %302 = vrot.lane.b32.xlu1 %v2123_v46, %s1956_s7 }
  0x66   :  { %300 = vrot.lane.b32.xlu0 %v2131_v14, %s1956_s7 }
  0x67   :  { %306 = vrot.lane.b32.xlu1 %v2135_v22, %s1956_s7 }
  0x6a   :  { %304 = vrot.lane.b32.xlu0 %v2139_v23, %s1956_s7 }
  0x6b   :  { %314 = vrot.lane.b32.xlu1 %v2123_v46, %s1957_s8 }
  0x6e   :  { %312 = vrot.lane.b32.xlu0 %v2131_v14, %s1957_s8 }
  0x6f   :  { %318 = vrot.lane.b32.xlu1 %v2135_v22, %s1957_s8 }
  0x72   :  { %316 = vrot.lane.b32.xlu0 %v2139_v23, %s1957_s8 }
  0x73   :  { %338 = vrot.lane.b32.xlu1 %v2091_v48, %s1958_s9 }
  0x76   :  { %336 = vrot.lane.b32.xlu0 %v2078_v16, %s1958_s9 }
  0x77   :  { %342 = vrot.lane.b32.xlu1 %v2082_v28, %s1958_s9 }
  0x7a   :  { %340 = vrot.lane.b32.xlu0 %v2071_v55, %s1958_s9 }
  0x7b   :  { %350 = vrot.lane.b32.xlu1 %v2091_v48, %s1959_s10 }
  0x7e   :  { %348 = vrot.lane.b32.xlu0 %v2078_v16, %s1959_s10  ;;  %v183_v16 = vmul.f32 0.34263152, %v2135_v22 }
  0x7f   :  { %354 = vrot.lane.b32.xlu1 %v2082_v28, %s1959_s10 }
  0x82   :  { %352 = vrot.lane.b32.xlu0 %v2071_v55, %s1959_s10 }
  0x83   :  { %374 = vrot.lane.b32.xlu1 %v2123_v46, %s1958_s9 }
  0x86   :  { %372 = vrot.lane.b32.xlu0 %v2131_v14, %s1958_s9 }
  0x87   :  { %378 = vrot.lane.b32.xlu1 %v2135_v22, %s1958_s9 }
  0x8a   :  { %376 = vrot.lane.b32.xlu0 %v2139_v23, %s1958_s9 }
  0x8b   :  { %386 = vrot.lane.b32.xlu1 %v2123_v46, %s1959_s10 }
  0x8e   :  { %384 = vrot.lane.b32.xlu0 %v2131_v14, %s1959_s10 }
  0x8f   :  { %390 = vrot.lane.b32.xlu1 %v2135_v22, %s1959_s10 }
  0x92   :  { %388 = vrot.lane.b32.xlu0 %v2139_v23, %s1959_s10 }
  0x93   :  { %1168 = vrot.lane.b32.xlu1 %v2213_v35, %s1955_s6 }
  0x96   :  { %1162 = vrot.lane.b32.xlu0 %v2213_v35, %s1954_s1 }
  0x97   :  { %1160 = vrot.lane.b32.xlu1 %v2223_v15, %s1954_s1 }
  0x9a   :  { %1166 = vrot.lane.b32.xlu0 %v2223_v15, %s1955_s6 }
  0x9b   :  { %1182 = vrot.lane.b32.xlu1 %v2229_v10, %s1954_s1 }
  0x9e   :  { %1188 = vrot.lane.b32.xlu0 %v2229_v10, %s1955_s6 }
  0x9f   :  { %1200 = vrot.lane.b32.xlu1 %v2213_v35, %s1956_s7 }
  0xa2   :  { %1206 = vrot.lane.b32.xlu0 %v2213_v35, %s1957_s8 }
  0xa3   :  { %1180 = vrot.lane.b32.xlu1 %v2241_v58, %s1954_s1 }
  0xa5   :  { %v193_v52 = vpop.permute.xlu1 %192 }
  0xa6   :  { %v189_v57 = vpop.permute.xlu0 %188  ;;  %1186 = vrot.lane.b32.xlu0 %v2241_v58, %s1955_s6 }
  0xa9   :  { %v195_v53 = vpop.permute.xlu1 %194 }
  0xac   :  { %v191_v24 = vpop.permute.xlu0 %190 }
  0xad   :  { %v203_v25 = vpop.permute.xlu1 %202 }
  0xae   :  { %v213_v38 = vadd.f32 %v203_v25, %v191_v24  ;;  %v181_v24 = vmul.f32 0.34263152, %v2123_v46 }
  0xb0   :  { %v201_v26 = vpop.permute.xlu0 %200  ;;  %v217_v41 = vmul.f32 0.23729607, %v213_v38 }
  0xb1   :  { %v207_v54 = vpop.permute.xlu1 %206  ;;  %v212_v43 = vadd.f32 %v201_v26, %v189_v57 }
  0xb2   :  { %v215_v45 = vadd.f32 %v207_v54, %v195_v53  ;;  %v221_v28 = vadd.f32 %v217_v41, %v177_v50 }
  0xb3   :  { %v216_v15 = vmul.f32 0.23729607, %v212_v43 }
  0xb4   :  { %v205_v59 = vpop.permute.xlu0 %204  ;;  %v219_v26 = vmul.f32 0.23729607, %v215_v45 }
  0xb5   :  { %v231_v60 = vpop.permute.xlu1 %230  ;;  %v214_v49 = vadd.f32 %v205_v59, %v193_v52  ;;  %v180_v59 = vmul.f32 0.34263152, %v2131_v14  ;;  %v220_v38 = vadd.f32 %v216_v15, %v176_v56 }
  0xb6   :  { %v223_v45 = vadd.f32 %v219_v26, %v179_v27 }
  0xb7   :  { %v218_v53 = vmul.f32 0.23729607, %v214_v49 }
  0xb8   :  { %v229_v61 = vpop.permute.xlu0 %228 }
  0xb9   :  { %v235_v62 = vpop.permute.xlu1 %234 }
  0xbc   :  { %v2247_v34 = vpop.permute.xlu0 %232 }
  0xbd   :  { %v243_v63 = vpop.permute.xlu1 %242 }
  0xbe   :  { %v253_v21 = vadd.f32 %v243_v63, %v231_v60  ;;  %v182_v63 = vmul.f32 0.34263152, %v2139_v23 }
  0xc0   :  { %v241_v6 = vpop.permute.xlu0 %240  ;;  %v257_v48 = vmul.f32 0.23729607, %v253_v21 }
  0xc1   :  { %v247_v1 = vpop.permute.xlu1 %246  ;;  %v252_v25 = vadd.f32 %v241_v6, %v229_v61 }
  0xc2   :  { %v255_v52 = vadd.f32 %v247_v1, %v235_v62  ;;  %v222_v62 = vadd.f32 %v218_v53, %v178_v0 }
  0xc3   :  { %v256_v46 = vmul.f32 0.23729607, %v252_v25 }
  0xc4   :  { %v2249_v2 = vpop.permute.xlu0 %244  ;;  %v259_v1 = vmul.f32 0.23729607, %v255_v52 }
  0xc5   :  { %v267_v3 = vpop.permute.xlu1 %266  ;;  %v254_v15 = vadd.f32 %v2249_v2, %v2247_v34 }
  0xc6   :  { %v263_v0 = vadd.f32 %v259_v1, %v183_v16 }
  0xc7   :  { %v258_v34 = vmul.f32 0.23729607, %v254_v15  ;;  %v1155_v15 = vmul.f32 0.34263152, %v2213_v35 }
  0xc8   :  { %v265_v39 = vpop.permute.xlu0 %264 }
  0xc9   :  { %v271_v4 = vpop.permute.xlu1 %270 }
  0xcc   :  { %v2251_v40 = vpop.permute.xlu0 %268 }
  0xcd   :  { %v279_v5 = vpop.permute.xlu1 %278 }
  0xce   :  { %v289_v58 = vadd.f32 %v279_v5, %v267_v3 }
  0xd0   :  { %v277_v47 = vpop.permute.xlu0 %276  ;;  %v293_v3 = vmul.f32 0.07882796, %v289_v58 }
  0xd1   :  { %v283_v8 = vpop.permute.xlu1 %282  ;;  %v288_v60 = vadd.f32 %v277_v47, %v265_v39 }
  0xd2   :  { %v291_v61 = vadd.f32 %v283_v8, %v271_v4  ;;  %v297_v39 = vadd.f32 %v293_v3, %v221_v28 }
  0xd3   :  { %v292_v14 = vmul.f32 0.07882796, %v288_v60  ;;  %v262_v60 = vadd.f32 %v258_v34, %v182_v63 }
  0xd4   :  { %v281_v9 = vpop.permute.xlu0 %280  ;;  %v295_v4 = vmul.f32 0.07882796, %v291_v61 }
  0xd5   :  { %v303_v12 = vpop.permute.xlu1 %302  ;;  %v290_v47 = vadd.f32 %v281_v9, %v2251_v40 }
  0xd6   :  { %v299_v2 = vadd.f32 %v295_v4, %v223_v45 }
  0xd8   :  { %v301_v17 = vpop.permute.xlu0 %300 }
  0xd9   :  { %v307_v18 = vpop.permute.xlu1 %306 }
  0xdc   :  { %v2253_v19 = vpop.permute.xlu0 %304 }
  0xdd   :  { %v315_v13 = vpop.permute.xlu1 %314 }
  0xde   :  { %v325_v5 = vadd.f32 %v315_v13, %v303_v12  ;;  %v260_v13 = vadd.f32 %v256_v46, %v180_v59 }
  0xe0   :  { %v313_v20 = vpop.permute.xlu0 %312  ;;  %v329_v23 = vmul.f32 0.07882796, %v325_v5 }
  0xe1   :  { %v319_v7 = vpop.permute.xlu1 %318  ;;  %v324_v49 = vadd.f32 %v313_v20, %v301_v17  ;;  %v296_v17 = vadd.f32 %v292_v14, %v220_v38 }
  0xe2   :  { %v327_v58 = vadd.f32 %v319_v7, %v307_v18  ;;  %v294_v18 = vmul.f32 0.07882796, %v290_v47 }
  0xe3   :  { %v328_v20 = vmul.f32 0.07882796, %v324_v49 }
  0xe4   :  { %v2255_v29 = vpop.permute.xlu0 %316  ;;  %v298_v52 = vadd.f32 %v294_v18, %v222_v62 }
  0xe5   :  { %v339_v30 = vpop.permute.xlu1 %338  ;;  %v326_v40 = vadd.f32 %v2255_v29, %v2253_v19  ;;  %v332_v26 = vadd.f32 %v328_v20, %v260_v13 }
  0xe7   :  { %v330_v19 = vmul.f32 0.07882796, %v326_v40 }
  0xe8   :  { %v337_v31 = vpop.permute.xlu0 %336 }
  0xe9   :  { %v343_v32 = vpop.permute.xlu1 %342 }
  0xec   :  { %v341_v36 = vpop.permute.xlu0 %340 }
  0xed   :  { %v351_v37 = vpop.permute.xlu1 %350 }
  0xee   :  { %v361_v54 = vadd.f32 %v351_v37, %v339_v30  ;;  %v261_v37 = vadd.f32 %v257_v48, %v181_v24 }
  0xf0   :  { %v349_v42 = vpop.permute.xlu0 %348  ;;  %v365_v30 = vmul.f32 0.012560201, %v361_v54  ;;  %v333_v7 = vadd.f32 %v329_v23, %v261_v37 }
  0xf1   :  { %v355_v44 = vpop.permute.xlu1 %354  ;;  %v360_v6 = vadd.f32 %v349_v42, %v337_v31 }
  0xf2   :  { %v363_v22 = vadd.f32 %v355_v44, %v343_v32  ;;  %v2268_v31 = vadd.f32 %v365_v30, %v297_v39  ;;  %v331_v32 = vmul.f32 0.07882796, %v327_v58 }
  0xf3   :  { %v364_v8 = vmul.f32 0.012560201, %v360_v6  ;;  %v334_v6 = vadd.f32 %v330_v19, %v262_v60 }
  0xf4   :  { %v353_v10 = vpop.permute.xlu0 %352  ;;  %v367_v9 = vmul.f32 0.012560201, %v363_v22  ;;  %v335_v54 = vadd.f32 %v331_v32, %v263_v0 }
  0xf5   :  { %v375_v57 = vpop.permute.xlu1 %374  ;;  %v362_v42 = vadd.f32 %v353_v10, %v341_v36  ;;  %v2272_v41 = vadd.f32 %v364_v8, %v296_v17  ;;  %v409_v10 = vmul.f32 %v2268_v31, %v2268_v31 }
  0xf6   :  { %v2276_v29 = vadd.f32 %v367_v9, %v299_v2  ;;  %v448_v2 = vlaneseq }
  0xf7   :  { %v366_v36 = vmul.f32 0.012560201, %v362_v42  ;;  %v408_v28 = vmul.f32 %v2272_v41, %v2272_v41 }
  0xf8   :  { %v373_v55 = vpop.permute.xlu0 %372 }
  0xf9   :  { %v379_v43 = vpop.permute.xlu1 %378  ;;  %v2280_v38 = vadd.f32 %v366_v36, %v298_v52 }
  0xfb   :  { %v410_v49 = vmul.f32 %v2280_v38, %v2280_v38 }
  0xfc   :  { %v377_v12 = vpop.permute.xlu0 %376 }
  0xfd   :  { %v387_v27 = vpop.permute.xlu1 %386 }
  0xfe   :  { %v397_v50 = vadd.f32 %v387_v27, %v375_v57 }
 0x100   :  { %v401_v44 = vmul.f32 0.012560201, %v397_v50  ;;  %v385_v21 = vpop.permute.xlu0 %384 }
 0x101   :  { %v396_v56 = vadd.f32 %v385_v21, %v373_v55  ;;  %v391_v24 = vpop.permute.xlu1 %390 }
 0x102   :  { %v405_v25 = vadd.f32 %v401_v44, %v333_v7  ;;  %v399_v57 = vadd.f32 %v391_v24, %v379_v43  ;;  %v411_v43 = vmul.f32 %v2276_v29, %v2276_v29 }
 0x103   :  { %v400_v53 = vmul.f32 0.012560201, %v396_v56 }
 0x104   :  { %v413_v48 = vsub.f32 %v405_v25, %v409_v10  ;;  %v403_v59 = vmul.f32 0.012560201, %v399_v57  ;;  %v389_v16 = vpop.permute.xlu0 %388 }
 0x105   :  { %v404_v3 = vadd.f32 %v400_v53, %v332_v26  ;;  %v398_v5 = vadd.f32 %v389_v16, %v377_v12  ;;  %v1169_v55 = vpop.permute.xlu1 %1168  ;;  %v2297_v53 = vand.u32 127, %v448_v2 }
 0x106   :  { %v417_v46 = vand.u32 2147483647, %v413_v48  ;;  %v407_v61 = vadd.f32 %v403_v59, %v335_v54 }
 0x107   :  { %v412_v45 = vsub.f32 %v404_v3, %v408_v28  ;;  %v402_v62 = vmul.f32 0.012560201, %v398_v5  ;;  %vm467_vm8 = vcmp.lt.s32.totalorder %v2297_v53, 32  ;;  %v489_v3 = vsub.f32 %v2069_v51, %v2268_v31 }
 0x108   :  { %1859 = vrsqrt.f32 %v417_v46  ;;  %v1163_v1 = vpop.permute.xlu0 %1162  ;;  %v415_v63 = vsub.f32 %v407_v61, %v411_v43  ;;  %vm429_vm0 = vcmp.eq.f32.partialorder %v417_v46, inf  ;;  %v432_v42 = vand.u32 2147483648, %v417_v46 }
 0x109   :  { %v416_v30 = vand.u32 2147483647, %v412_v45  ;;  %v406_v37 = vadd.f32 %v402_v62, %v334_v6  ;;  %v2284_v14 = vpop.permute.xlu1 %1160  ;;  %v1173_v23 = vadd.f32 %v1169_v55, %v1163_v1  ;;  %vm431_vm1 = vcmp.eq.f32.partialorder %v417_v46, 0.0 }
 0x10a   :  { %v419_v22 = vand.u32 2147483647, %v415_v63  ;;  %v2701_v55 = vmov 0.0   ;;  %v488_v6 = vsub.f32 %v2024_v11, %v2272_v41  ;;  %v491_v1 = vsub.f32 %v2048_v33, %v2276_v29  ;;  %v2702_v63 = vld [vmem:[#allocation13_spill] sm:$0xff] }
 0x10b   :  { %1861 = vrsqrt.f32 %v416_v30  ;;  %v414_v39 = vsub.f32 %v406_v37, %v410_v49  ;;  %v1175_v4 = vmul.f32 0.23729607, %v1173_v23  ;;  %vm422_vm2 = vcmp.eq.f32.partialorder %v416_v30, inf }
 0x10c   :  { %v2288_v47 = vpop.permute.xlu0 %1166  ;;  %1863 = vrsqrt.f32 %v419_v22  ;;  %v425_v44 = vand.u32 2147483648, %v416_v30  ;;  %vm424_vm3 = vcmp.eq.f32.partialorder %v416_v30, 0.0  ;;  %vm443_vm4 = vcmp.eq.f32.partialorder %v419_v22, inf }
 0x10d   :  { %v2290_v58 = vpop.permute.xlu1 %1182  ;;  %v418_v12 = vand.u32 2147483647, %v414_v39  ;;  %v1177_v40 = vadd.f32 %v1175_v4, %v1155_v15  ;;  %v446_v57 = vand.u32 2147483648, %v419_v22  ;;  %vm445_vm5 = vcmp.eq.f32.partialorder %v419_v22, 0.0 }
 0x10e   :  { %v490_v37 = vsub.f32 %v2702_v63, %v2280_v38  ;;  %v449_v33 = vshrl.u32 %v448_v2, 7 }
 0x10f   :  { %1865 = vrsqrt.f32 %v418_v12  ;;  %vm436_vm6 = vcmp.eq.f32.partialorder %v418_v12, inf  ;;  %v439_v59 = vand.u32 2147483648, %v418_v12  ;;  %vm438_vm7 = vcmp.eq.f32.partialorder %v418_v12, 0.0 }
 0x110   :  { %v2292_v13 = vpop.permute.xlu0 %1188  ;;  %vm470_vm9 = vcmp.eq.s32.totalorder %v449_v33, 0 }
 0x111   :  { %v1201_v27 = vpop.permute.xlu1 %1200  ;;  %v2328_v38 = vsel %vm470_vm9, 1.0, %v2701_v55 }
 0x112   :  { %v1860_v8 = vpop.eup %1859 }
 0x113   :  { %v428_v0 = vmul.f32 %v1860_v8, %v417_v46 }
 0x114   :  { %v1207_v50 = vpop.permute.xlu0 %1206 }
 0x115   :  { %v1862_v17 = vpop.eup %1861  ;;  %v430_v20 = vsel %vm429_vm0, %v417_v46, %v428_v0  ;;  %v1211_v9 = vadd.f32 %v1207_v50, %v1201_v27  ;;  %v1721_v46 = vsel %vm467_vm8, 1.0, %v2701_v55 }
 0x116   :  { %v433_v18 = vsel %vm431_vm1, %v432_v42, %v430_v20  ;;  %v421_v7 = vmul.f32 %v1862_v17, %v416_v30  ;;  %v1864_v34 = vpop.eup %1863 }
 0x117   :  { %v493_v32 = vadd.f32 1.0, %v433_v18  ;;  %v1213_v21 = vmul.f32 0.07882796, %v1211_v9  ;;  %v442_v10 = vmul.f32 %v1864_v34, %v419_v22 }
 0x118   :  { %v423_v56 = vsel %vm422_vm2, %v416_v30, %v421_v7 }
 0x119   :  { %1867 = vrcp.f32 %v493_v32  ;;  %v426_v24 = vsel %vm424_vm3, %v425_v44, %v423_v56  ;;  %v2295_v36 = vadd.f32 %v1213_v21, %v1177_v40  ;;  %v1866_v26 = vpop.eup %1865  ;;  %v444_v19 = vsel %vm443_vm4, %v419_v22, %v442_v10 }
 0x11a   :  { %v492_v25 = vadd.f32 1.0, %v426_v24  ;;  %v447_v52 = vsel %vm445_vm5, %v446_v57, %v444_v19  ;;  %v435_v54 = vmul.f32 %v1866_v26, %v418_v12 }
 0x11b   :  { %v495_v48 = vadd.f32 1.0, %v447_v52 }
 0x11c   :  { %1869 = vrcp.f32 %v492_v25  ;;  %v437_v16 = vsel %vm436_vm6, %v418_v12, %v435_v54  ;;  %vm1296_vm6 = vcmp.lt.s32.totalorder %v2297_v53, 16 }
 0x11d   :  { %1871 = vrcp.f32 %v495_v48  ;;  %v440_v60 = vsel %vm438_vm7, %v439_v59, %v437_v16  ;;  %vm482_vm7 = vcmp.eq.s32.totalorder %v2297_v53, 0 }
 0x11e   :  { %v494_v28 = vadd.f32 1.0, %v440_v60 }
 0x120   :  { %1873 = vrcp.f32 %v494_v28 }
 0x123   :  { %v1868_v5 = vpop.eup %1867 }
 0x124   :  { %v501_v61 = vmul.f32 %v1868_v5, %v489_v3 }
 0x126   :  { %v1870_v43 = vpop.eup %1869  ;;  %v2305_v45 = vmul.f32 %v1721_v46, %v501_v61 }
 0x127   :  { %v500_v62 = vmul.f32 %v1870_v43, %v488_v6  ;;  %v1872_v51 = vpop.eup %1871 }
 0x128   :  { %514 = vst [vmem:[#allocation2 + $0x10] sm:$0xff] %v2305_v45  ;;  %608 = vrot.lane.b32.xlu0 %v2305_v45, %s1954_s1  ;;  %v503_v30 = vmul.f32 %v1872_v51, %v491_v1  ;;  %v567_v50 = vand.u32 2147483647, %v2305_v45  ;;  %v585_v32 = vmul.f32 %v2305_v45, %v2305_v45  ;;  %v519_v44 = vmin.f32 %v2305_v45, 0.0 }
 0x129   :  { %v2312_v31 = vmul.f32 %v1721_v46, %v500_v62  ;;  %vm541_vm11 = vcmp.lt.f32.partialorder %v2305_v45, 0.0 }
 0x12a   :  { %v1874_v11 = vpop.eup %1873  ;;  %v2319_v41 = vmul.f32 %v1721_v46, %v503_v30  ;;  %v523_v48 = vmul.f32 %v519_v44, %v519_v44  ;;  %v1961_v44 = vmov 31  }
 0x12b   :  { %513 = vst [vmem:[#allocation2 + $0x8] sm:$0xff] %v2312_v31  ;;  %606 = vrot.lane.b32.xlu1 %v2312_v31, %s1954_s1  ;;  %v502_v29 = vmul.f32 %v1874_v11, %v490_v37  ;;  %v566_v42 = vand.u32 2147483647, %v2312_v31  ;;  %v584_v7 = vmul.f32 %v2312_v31, %v2312_v31  ;;  %v518_v2 = vmin.f32 %v2312_v31, 0.0  ;;  %1855 = vset.pattern.permute.xlu0 %v1961_v44 }
 0x12c   :  { %516 = vst [vmem:[#allocation2 + $0x20] sm:$0xff] %v2319_v41  ;;  %v569_v60 = vand.u32 2147483647, %v2319_v41  ;;  %v587_v63 = vmul.f32 %v2319_v41, %v2319_v41  ;;  %v521_v37 = vmin.f32 %v2319_v41, 0.0  ;;  %vm540_vm10 = vcmp.lt.f32.partialorder %v2312_v31, 0.0  ;;  %1854 = vset.pattern.permute.xlu1 %v1961_v44 }
 0x12d   :  { %v2322_v49 = vmul.f32 %v1721_v46, %v502_v29  ;;  %v570_v34 = vadd.f32 %v567_v50, %v566_v42  ;;  %v588_v54 = vadd.f32 %v585_v32, %v584_v7  ;;  %v522_v28 = vmul.f32 %v518_v2, %v518_v2  ;;  %v2703_v7 = vld [vmem:[#allocation14_spill] sm:$0xff]  ;;  %v2704_v32 = vld [vmem:[#allocation15_spill] sm:$0xff] }
 0x12e   :  { %vm543_vm13 = vcmp.lt.f32.partialorder %v2319_v41, 0.0 }
 0x12f   :  { %515 = vst [vmem:[#allocation2 + $0x18] sm:$0xff] %v2322_v49  ;;  %610 = vrot.lane.b32.xlu1 %v2322_v49, %s1954_s1  ;;  %v568_v18 = vand.u32 2147483647, %v2322_v49  ;;  %v586_v56 = vmul.f32 %v2322_v49, %v2322_v49  ;;  %v520_v26 = vmin.f32 %v2322_v49, 0.0  ;;  %v526_v11 = vadd.f32 %v523_v48, %v522_v28 }
 0x130   :  { %vm542_vm12 = vcmp.lt.f32.partialorder %v2322_v49, 0.0 }
 0x131   :  { %v571_v57 = vadd.f32 %v570_v34, %v568_v18  ;;  %v589_v46 = vadd.f32 %v588_v54, %v586_v56  ;;  %v524_v62 = vmul.f32 %v520_v26, %v520_v26 }
 0x132   :  { %v730_v12 = vld [vmem:[#allocation2 + $0x7] sm:$0xff]  ;;  %v731_v15 = vld [vmem:[#allocation2 + $0xf] sm:$0xff] }
 0x133   :  { %612 = vrot.lane.b32.xlu1 %v2319_v41, %s1954_s1  ;;  %v1733_v22 = vld [vmem:[#allocation2 + $0x27] ss:$0 sm:$0xff]  ;;  %v572_v43 = vadd.f32 %v571_v57, %v569_v60  ;;  %v590_v29 = vadd.f32 %v589_v46, %v587_v63 }
 0x134   :  { %v738_v39 = vmul.f32 %v1733_v22, %v2328_v38  ;;  %v739_v23 = vmul.f32 0.0, %v1733_v22  ;;  %v527_v22 = vadd.f32 %v526_v11, %v524_v62 }
 0x136   :  { %v2333_v4 = vadd.f32 %v738_v39, %v730_v12  ;;  %v2335_v8 = vadd.f32 %v739_v23, %v731_v15  ;;  %v732_v27 = vld [vmem:[#allocation2 + $0x17] sm:$0xff]  ;;  %v733_v17 = vld [vmem:[#allocation2 + $0x1f] sm:$0xff]  ;;  %v525_v39 = vmul.f32 %v521_v37, %v521_v37  ;;  %v1725_v12 = vsel %vm540_vm10, 1.0, %v2701_v55 }
 0x137   :  { %v2337_v0 = vadd.f32 %v739_v23, %v732_v27  ;;  %v2341_v20 = vadd.f32 %v739_v23, %v733_v17  ;;  %v1726_v15 = vsel %vm541_vm11, 1.0, %v2701_v55  ;;  %v1727_v27 = vsel %vm542_vm12, 1.0, %v2701_v55 }
 0x138   :  { %v2345_v40 = vmul.f32 %v2333_v4, %v2312_v31  ;;  %v2349_v9 = vmul.f32 %v2335_v8, %v2305_v45  ;;  %v528_v23 = vadd.f32 %v527_v22, %v525_v39  ;;  %v552_v42 = vadd.f32 %v1726_v15, %v1725_v12 }
 0x139   :  { %v2359_v21 = vmul.f32 %v2337_v0, %v2322_v49  ;;  %v2366_v24 = vmul.f32 %v2341_v20, %v2319_v41  ;;  %v1728_v17 = vsel %vm543_vm13, 1.0, %v2701_v55 }
 0x13a   :  { %v816_v10 = vmul.f32 %v2345_v40, %v2345_v40  ;;  %v817_v25 = vmul.f32 %v2349_v9, %v2349_v9  ;;  %v798_v19 = vand.u32 2147483647, %v2345_v40  ;;  %v799_v52 = vand.u32 2147483647, %v2349_v9 }
 0x13b   :  { %v818_v59 = vmul.f32 %v2359_v21, %v2359_v21  ;;  %v800_v3 = vand.u32 2147483647, %v2359_v21  ;;  %v819_v61 = vmul.f32 %v2366_v24, %v2366_v24  ;;  %v801_v1 = vand.u32 2147483647, %v2366_v24 }
 0x13c   :  { %v820_v16 = vadd.f32 %v817_v25, %v816_v10  ;;  %v802_v5 = vadd.f32 %v799_v52, %v798_v19  ;;  %v553_v50 = vadd.f32 %v1727_v27, %v552_v42  ;;  %v750_v34 = vmin.f32 %v2345_v40, 0.0 }
 0x13d   :  { %v751_v2 = vmin.f32 %v2349_v9, 0.0  ;;  %v752_v25 = vmin.f32 %v2359_v21, 0.0  ;;  %v753_v26 = vmin.f32 %v2366_v24, 0.0  ;;  %vm772_vm14 = vcmp.lt.f32.partialorder %v2345_v40, 0.0  ;;  %v2705_v40 = vld [vmem:[#allocation16_spill] sm:$0xff] }
 0x13e   :  { %v821_v6 = vadd.f32 %v820_v16, %v818_v59  ;;  %v803_v51 = vadd.f32 %v802_v5, %v800_v3  ;;  %v554_v18 = vadd.f32 %v1728_v17, %v553_v50  ;;  %v754_v56 = vmul.f32 %v750_v34, %v750_v34 }
 0x13f   :  { %v755_v10 = vmul.f32 %v751_v2, %v751_v2  ;;  %v756_v19 = vmul.f32 %v752_v25, %v752_v25  ;;  %v757_v54 = vmul.f32 %v753_v26, %v753_v26  ;;  %vm773_vm15 = vcmp.lt.f32.partialorder %v2349_v9, 0.0 }
 0x140   :  { %v2382_v30 = vadd.f32 %v821_v6, %v819_v61  ;;  %v2387_v33 = vadd.f32 %v803_v51, %v801_v1  ;;  %v1734_v59 = vsel %vm772_vm14, 1.0, %v2701_v55  ;;  %v1735_v16 = vsel %vm773_vm15, 1.0, %v2701_v55 }
 0x141   :  { %v758_v57 = vadd.f32 %v755_v10, %v754_v56  ;;  %vm774_vm0 = vcmp.lt.f32.partialorder %v2359_v21, 0.0  ;;  %v784_v60 = vadd.f32 %v1735_v16, %v1734_v59  ;;  %vm775_vm1 = vcmp.lt.f32.partialorder %v2366_v24, 0.0 }
 0x142   :  { %v1736_v28 = vsel %vm774_vm0, 1.0, %v2701_v55  ;;  %v1737_v5 = vsel %vm775_vm1, 1.0, %v2701_v55  ;;  %v2440_v55 = vpop.permute.xlu1 %1180  ;;  %vm485_vm0 = vcmp.eq.s32.totalorder %v2297_v53, 31  ;;  %vm1299_vm1 = vcmp.eq.s32.totalorder %v2297_v53, 15 }
 0x143   :  { %v759_v52 = vadd.f32 %v758_v57, %v756_v19  ;;  %v785_v3 = vadd.f32 %v1736_v28, %v784_v60 }
 0x145   :  { %v760_v48 = vadd.f32 %v759_v52, %v757_v54  ;;  %v786_v46 = vadd.f32 %v1737_v5, %v785_v3  ;;  %v1193_v3 = vadd.f32 %v2292_v13, %v2290_v58 }
 0x147   :  { %573 = vadd.xlane.f32.xlu0 %v572_v43 }
 0x14b   :  { %591 = vadd.xlane.f32.xlu0 %v590_v29 }
 0x14f   :  { %529 = vadd.xlane.f32.xlu0 %v528_v23 }
 0x157   :  { %555 = vadd.xlane.f32.xlu1 %v554_v18 }
 0x165   :  { %1204 = vrot.lane.b32.xlu0 %v2703_v7, %s1957_s8 }
 0x168   :  { %1198 = vrot.lane.b32.xlu1 %v2703_v7, %s1956_s7 }
 0x169   :  { %1224 = vrot.lane.b32.xlu0 %v2704_v32, %s1957_s8 }
 0x16c   :  { %1218 = vrot.lane.b32.xlu1 %v2704_v32, %s1956_s7 }
 0x170   :  { %1236 = vrot.lane.b32.xlu1 %v2213_v35, %s1958_s9 }
 0x188   :  { %761 = vadd.xlane.f32.xlu0 %v760_v48 }
 0x194   :  { %787 = vadd.xlane.f32.xlu1 %v786_v46 }
 0x19d   :  { %v2444_v24 = vpop.permute.xlu1 %606 }
 0x19e   :  { %1242 = vrot.lane.b32.xlu0 %v2213_v35, %s1959_s10  ;;  %v2437_v35 = vpop.permute.xlu0 %1186 }
 0x1a1   :  { %v2447_v6 = vpop.permute.xlu1 %610 }
 0x1a2   :  { %1222 = vrot.lane.b32.xlu0 %v2705_v40, %s1957_s8  ;;  %v2442_v9 = vpop.permute.xlu0 %608 }
 0x1a5   :  { %1216 = vrot.lane.b32.xlu1 %v2705_v40, %s1956_s7  ;;  %v2449_v11 = vpop.permute.xlu1 %612 }
 0x1a6   :  { %1240 = vrot.lane.b32.xlu0 %v2703_v7, %s1959_s10 }
 0x1a9   :  { %1234 = vrot.lane.b32.xlu1 %v2703_v7, %s1958_s9 }
 0x1aa   :  { %1260 = vrot.lane.b32.xlu0 %v2704_v32, %s1959_s10 }
 0x1ad   :  { %1254 = vrot.lane.b32.xlu1 %v2704_v32, %s1958_s9 }
 0x1ae   :  { %1258 = vrot.lane.b32.xlu0 %v2705_v40, %s1959_s10 }
 0x1b1   :  { %1252 = vrot.lane.b32.xlu1 %v2705_v40, %s1958_s9 }
 0x1cd   :  { %823 = vadd.xlane.f32.xlu0 %v2382_v30 }
 0x1d4   :  { %v574_v21 = vpop.xlane.xlu0 %573 }
 0x1d5   :  { %805 = vadd.xlane.f32.xlu1 %v2387_v33  ;;  %v575_v1 = vrot.slane %v574_v21, 4 }
 0x1d7   :  { %v576_v30 = vadd.f32 %v575_v1, %v574_v21  ;;  %v1195_v1 = vmul.f32 0.23729607, %v1193_v3 }
 0x1d8   :  { %v592_v61 = vpop.xlane.xlu0 %591 }
 0x1d9   :  { %v593_v51 = vrot.slane %v592_v61, 4  ;;  %v577_v23 = vrot.slane %v576_v30, 2 }
 0x1db   :  { %v594_v29 = vadd.f32 %v593_v51, %v592_v61  ;;  %v578_v50 = vadd.f32 %v577_v23, %v576_v30  ;;  %v1172_v61 = vadd.f32 %v2288_v47, %v2284_v14  ;;  %v1156_v47 = vmul.f32 0.34263152, %v2705_v40 }
 0x1dc   :  { %v530_v43 = vpop.xlane.xlu0 %529 }
 0x1dd   :  { %v531_v62 = vrot.slane %v530_v43, 4  ;;  %v595_v33 = vrot.slane %v594_v29, 2  ;;  %v579_v34 = vrot.slane %v578_v50, 1  ;;  %v1174_v58 = vmul.f32 0.23729607, %v1172_v61 }
 0x1df   :  { %v532_v63 = vadd.f32 %v531_v62, %v530_v43  ;;  %v596_v18 = vadd.f32 %v595_v33, %v594_v29  ;;  %v580_v25 = vadd.f32 %v579_v34, %v578_v50  ;;  %v1157_v62 = vmul.f32 0.34263152, %v2704_v32 }
 0x1e0   :  { %v1205_v26 = vpop.permute.xlu0 %1204  ;;  %v1154_v29 = vmul.f32 0.34263152, %v2703_v7 }
 0x1e1   :  { %v533_v37 = vrot.slane %v532_v63, 2  ;;  %v597_v56 = vrot.slane %v596_v18, 1 }
 0x1e3   :  { %619 = vperm.xlu0 %1855, %v2312_v31   ;;  %v534_v22 = vadd.f32 %v533_v37, %v532_v63  ;;  %v598_v57 = vadd.f32 %v597_v56, %v596_v18  ;;  %v1192_v37 = vadd.f32 %v2437_v35, %v2440_v55 }
 0x1e4   :  { %v556_v12 = vpop.xlane.xlu1 %555  ;;  %v1225_v19 = vpop.permute.xlu0 %1224 }
 0x1e5   :  { %v535_v39 = vrot.slane %v534_v22, 1  ;;  %v557_v15 = vrot.slane %v556_v12, 4  ;;  %v1194_v32 = vmul.f32 0.23729607, %v1192_v37  ;;  %v1883_v37 = vld [vmem:[#allocation7 + $0x10] sm:$0xff] }
 0x1e6   :  { %623 = vperm.xlu1 %1854, %v2305_v45  }
 0x1e7   :  { %631 = vperm.xlu0 %1855, %v2319_v41   ;;  %v536_v27 = vadd.f32 %v535_v39, %v534_v22  ;;  %v558_v42 = vadd.f32 %v557_v15, %v556_v12  ;;  %v1197_v12 = vadd.f32 %v1195_v1, %v1157_v62  ;;  %v1196_v34 = vadd.f32 %v1194_v32, %v1156_v47 }
 0x1e8   :  { %v1199_v52 = vpop.permute.xlu1 %1198 }
 0x1e9   :  { %1759 = vpush %v536_v27  ;;  %v559_v17 = vrot.slane %v558_v42, 2  ;;  %v1210_v51 = vadd.f32 %v1205_v26, %v1199_v52 }
 0x1ea   :  { %627 = vperm.xlu1 %1854, %v2322_v49  }
 0x1eb   :  { %838 = vrot.lane.b32.xlu0 %v2333_v4, %s1954_s1  ;;  %v560_v44 = vadd.f32 %v559_v17, %v558_v42  ;;  %v1212_v33 = vmul.f32 0.07882796, %v1210_v51  ;;  %v1176_v42 = vadd.f32 %v1174_v58, %v1154_v29  ;;  %v2476_v58 = vld [vmem:[#allocation2] sm:$0xff] }
 0x1ec   :  { %v1219_v48 = vpop.permute.xlu1 %1218 }
 0x1ed   :  { %v561_v2 = vrot.slane %v560_v44, 1  ;;  %v1229_v43 = vadd.f32 %v1225_v19, %v1219_v48  ;;  %v1214_v7 = vadd.f32 %v1212_v33, %v1176_v42 }
 0x1ee   :  { %840 = vrot.lane.b32.xlu1 %v2335_v8, %s1954_s1 }
 0x1ef   :  { %v562_v10 = vadd.f32 %v561_v2, %v560_v44  ;;  %v1231_v39 = vmul.f32 0.07882796, %v1229_v43 }
 0x1f0   :  { %v1237_v16 = vpop.permute.xlu1 %1236 }
 0x1f1   :  { %1761 = vpush %v562_v10  ;;  %v1233_v35 = vadd.f32 %v1231_v39, %v1197_v12 }
 0x1f2   :  { %1763 = vpush %v580_v25  ;;  %842 = vrot.lane.b32.xlu1 %v2337_v0, %s1954_s1 }
 0x1f3   :  { %1765 = vpush %v598_v57 }
 0x215   :  { %v2461_v54 = vpop.xlane.xlu0 %761 }
 0x219   :  { %v1243_v59 = vpop.permute.xlu0 %1242 }
 0x21a   :  { %s1760_s11 = spop %1759  ;;  %v1247_v21 = vadd.f32 %v1243_v59, %v1237_v16 }
 0x21b   :  { %539 = sst [smem:[#allocation9]] %s1760_s11 }
 0x21c   :  { %v1249_v30 = vmul.f32 0.012560201, %v1247_v21 }
 0x21d   :  { %v1223_v60 = vpop.permute.xlu0 %1222 }
 0x21e   :  { %v1251_v15 = vadd.f32 %v1249_v30, %v2295_v36 }
 0x220   :  { %v1271_v2 = vmul.f32 %v1251_v15, %v1251_v15  ;;  %v1303_v30 = vsub.f32 %v1883_v37, %v1251_v15  ;;  %v2489_v15 = vsel %vm482_vm7, 1.0, %v2476_v58 }
 0x221   :  { %v2463_v28 = vpop.xlane.xlu1 %787  ;;  %v1241_v5 = vpop.permute.xlu0 %1240 }
 0x222   :  { %s1762_s12 = spop %1761 }
 0x223   :  { %565 = sst [smem:[#allocation9 + $0x1]] %s1762_s12  ;;  %s1764_s13 = spop %1763 }
 0x224   :  { %583 = sst [smem:[#allocation9 + $0x2]] %s1764_s13  ;;  %s1766_s14 = spop %1765 }
 0x225   :  { %601 = sst [smem:[#allocation9 + $0x3]] %s1766_s14  ;;  %v1217_v46 = vpop.permute.xlu1 %1216  ;;  %v1261_v13 = vpop.permute.xlu0 %1260 }
 0x226   :  { %v1228_v23 = vadd.f32 %v1223_v60, %v1217_v46 }
 0x228   :  { %v1230_v55 = vmul.f32 0.07882796, %v1228_v23  ;;  %v1885_v23 = vld [vmem:[#allocation7 + $0x8] sm:$0xff] }
 0x229   :  { %v1235_v63 = vpop.permute.xlu1 %1234  ;;  %v1259_v18 = vpop.permute.xlu0 %1258 }
 0x22a   :  { %v1246_v22 = vadd.f32 %v1241_v5, %v1235_v63  ;;  %v1232_v57 = vadd.f32 %v1230_v55, %v1196_v34 }
 0x22c   :  { %v1248_v50 = vmul.f32 0.012560201, %v1246_v22 }
 0x22d   :  { %v1255_v14 = vpop.permute.xlu1 %1254 }
 0x22e   :  { %v1265_v27 = vadd.f32 %v1261_v13, %v1255_v14  ;;  %v1250_v25 = vadd.f32 %v1248_v50, %v1214_v7  ;;  %v1746_v13 = vsel %vm1296_vm6, 1.0, %v2476_v58 }
 0x230   :  { %v1267_v17 = vmul.f32 0.012560201, %v1265_v27  ;;  %v1270_v36 = vmul.f32 %v1250_v25, %v1250_v25  ;;  %v1302_v12 = vsub.f32 %v1885_v23, %v1250_v25 }
 0x231   :  { %v1253_v44 = vpop.permute.xlu1 %1252 }
 0x232   :  { %v1269_v56 = vadd.f32 %v1267_v17, %v1233_v35  ;;  %v1264_v10 = vadd.f32 %v1259_v18, %v1253_v44 }
 0x234   :  { %v1273_v26 = vsub.f32 %v1269_v56, %v1271_v2  ;;  %v1266_v40 = vmul.f32 0.012560201, %v1264_v10 }
 0x236   :  { %v1275_v19 = vand.u32 2147483647, %v1273_v26  ;;  %v1268_v52 = vadd.f32 %v1266_v40, %v1232_v57 }
 0x238   :  { %1875 = vrsqrt.f32 %v1275_v19  ;;  %v1272_v48 = vsub.f32 %v1268_v52, %v1270_v36  ;;  %vm1285_vm2 = vcmp.eq.f32.partialorder %v1275_v19, inf  ;;  %v1288_v3 = vand.u32 2147483648, %v1275_v19 }
 0x239   :  { %vm1287_vm3 = vcmp.eq.f32.partialorder %v1275_v19, 0.0 }
 0x23a   :  { %v1274_v59 = vand.u32 2147483647, %v1272_v48 }
 0x23c   :  { %1877 = vrsqrt.f32 %v1274_v59  ;;  %vm1278_vm4 = vcmp.eq.f32.partialorder %v1274_v59, inf  ;;  %v1281_v62 = vand.u32 2147483648, %v1274_v59  ;;  %vm1280_vm5 = vcmp.eq.f32.partialorder %v1274_v59, 0.0 }
 0x242   :  { %v1876_v16 = vpop.eup %1875 }
 0x243   :  { %v1284_v60 = vmul.f32 %v1876_v16, %v1275_v19 }
 0x245   :  { %v1286_v5 = vsel %vm1285_vm2, %v1275_v19, %v1284_v60 }
 0x246   :  { %v1289_v46 = vsel %vm1287_vm3, %v1288_v3, %v1286_v5  ;;  %v1878_v21 = vpop.eup %1877 }
 0x247   :  { %v1305_v61 = vadd.f32 1.0, %v1289_v46  ;;  %v1277_v43 = vmul.f32 %v1878_v21, %v1274_v59 }
 0x249   :  { %1879 = vrcp.f32 %v1305_v61  ;;  %v1279_v1 = vsel %vm1278_vm4, %v1274_v59, %v1277_v43 }
 0x24a   :  { %v1282_v51 = vsel %vm1280_vm5, %v1281_v62, %v1279_v1 }
 0x24b   :  { %v1304_v63 = vadd.f32 1.0, %v1282_v51 }
 0x24d   :  { %1881 = vrcp.f32 %v1304_v63 }
 0x253   :  { %v1880_v29 = vpop.eup %1879 }
 0x254   :  { %v1309_v22 = vmul.f32 %v1880_v29, %v1303_v30 }
 0x256   :  { %v2479_v39 = vmul.f32 %v1746_v13, %v1309_v22 }
 0x257   :  { %v1882_v33 = vpop.eup %1881 }
 0x258   :  { %1316 = vst [vmem:[#allocation3 + $0x10] sm:$0xff] %v2479_v39  ;;  %v1308_v14 = vmul.f32 %v1882_v33, %v1302_v12  ;;  %vm1335_vm7 = vcmp.lt.f32.partialorder %v2479_v39, 0.0 }
 0x25a   :  { %v2482_v47 = vmul.f32 %v1746_v13, %v1308_v14  ;;  %v2485_v32 = vpop.xlane.xlu0 %823 }
 0x25c   :  { %1315 = vst [vmem:[#allocation3 + $0x8] sm:$0xff] %v2482_v47  ;;  %vm1334_vm6 = vcmp.lt.f32.partialorder %v2482_v47, 0.0 }
 0x262   :  { %v620_v27 = vpop.permute.xlu0 %619  ;;  %v2492_v50 = vpop.xlane.xlu1 %805 }
 0x263   :  { %v634_v42 = vmul.f32 %v2489_v15, %v620_v27 }
 0x265   :  { %v638_v35 = vadd.f32 %v634_v42, %v2444_v24 }
 0x266   :  { %v632_v55 = vpop.permute.xlu0 %631  ;;  %v624_v18 = vpop.permute.xlu1 %623 }
 0x267   :  { %v637_v17 = vmul.f32 %v2489_v15, %v632_v55  ;;  %v642_v7 = vmul.f32 %v638_v35, %v2312_v31  ;;  %v635_v44 = vmul.f32 %v2489_v15, %v624_v18  ;;  %v1962_v35 = vmov 15   ;;  %v1752_v55 = vld [vmem:[#allocation3 + $0x17] ss:$0 sm:$0xff] }
 0x269   :  { %v641_v34 = vadd.f32 %v637_v17, %v2449_v11  ;;  %v639_v2 = vadd.f32 %v635_v44, %v2442_v9  ;;  %vm668_vm8 = vcmp.lt.f32.partialorder %v642_v7, 0.0  ;;  %v646_v57 = vmin.f32 %v642_v7, 0.0  ;;  %v1464_v17 = vld [vmem:[#allocation3 + $0x7] sm:$0xff] }
 0x26a   :  { %v628_v56 = vpop.permute.xlu1 %627  ;;  %v712_v26 = vmul.f32 %v642_v7, %v642_v7  ;;  %v1729_v52 = vsel %vm668_vm8, 1.0, %v2476_v58  ;;  %v694_v36 = vand.u32 2147483647, %v642_v7  ;;  %v1470_v7 = vmul.f32 %v1752_v55, %v2328_v38 }
 0x26b   :  { %v643_v10 = vmul.f32 %v639_v2, %v2305_v45  ;;  %v636_v25 = vmul.f32 %v2489_v15, %v628_v56  ;;  %v645_v24 = vmul.f32 %v641_v34, %v2319_v41  ;;  %v650_v16 = vmul.f32 %v646_v57, %v646_v57  ;;  %v1465_v34 = vld [vmem:[#allocation3 + $0xf] sm:$0xff] }
 0x26c   :  { %v2518_v18 = vadd.f32 %v1470_v7, %v1464_v17  ;;  %v1963_v44 = vmov 0   ;;  %v1471_v2 = vmul.f32 0.0, %v1752_v55  ;;  %v763_v57 = vrot.slane %v2461_v54, 4 }
 0x26d   :  { %v640_v40 = vadd.f32 %v636_v25, %v2447_v6  ;;  %v713_v19 = vmul.f32 %v643_v10, %v643_v10  ;;  %vm669_vm9 = vcmp.lt.f32.partialorder %v643_v10, 0.0  ;;  %v695_v9 = vand.u32 2147483647, %v643_v10 }
 0x26e   :  { %v1730_v11 = vsel %vm669_vm9, 1.0, %v2476_v58  ;;  %v647_v48 = vmin.f32 %v643_v10, 0.0  ;;  %vm671_vm10 = vcmp.lt.f32.partialorder %v645_v24, 0.0  ;;  %v715_v61 = vmul.f32 %v645_v24, %v645_v24  ;;  %v2539_v38 = vpop.permute.xlu1 %840  ;;  %v839_v10 = vpop.permute.xlu0 %838 }
 0x26f   :  { %v644_v59 = vmul.f32 %v640_v40, %v2322_v49  ;;  %v716_v60 = vadd.f32 %v713_v19, %v712_v26  ;;  %v680_v3 = vadd.f32 %v1730_v11, %v1729_v52  ;;  %v698_v62 = vadd.f32 %v695_v9, %v694_v36 }
 0x270   :  { %v651_v5 = vmul.f32 %v647_v48, %v647_v48  ;;  %v649_v1 = vmin.f32 %v645_v24, 0.0  ;;  %v1732_v29 = vsel %vm671_vm10, 1.0, %v2476_v58  ;;  %v697_v33 = vand.u32 2147483647, %v645_v24 }
 0x271   :  { %v714_v46 = vmul.f32 %v644_v59, %v644_v59  ;;  %vm670_vm11 = vcmp.lt.f32.partialorder %v644_v59, 0.0  ;;  %v696_v21 = vand.u32 2147483647, %v644_v59  ;;  %v648_v6 = vmin.f32 %v644_v59, 0.0 }
 0x272   :  { %v1731_v43 = vsel %vm670_vm11, 1.0, %v2476_v58  ;;  %v654_v30 = vadd.f32 %v651_v5, %v650_v16  ;;  %v653_v14 = vmul.f32 %v649_v1, %v649_v1  ;;  %v2526_v56 = vadd.f32 %v1471_v2, %v1465_v34  ;;  %v843_v25 = vpop.permute.xlu1 %842 }
 0x273   :  { %v717_v51 = vadd.f32 %v716_v60, %v714_v46  ;;  %v681_v63 = vadd.f32 %v1731_v43, %v680_v3  ;;  %v652_v37 = vmul.f32 %v648_v6, %v648_v6  ;;  %v699_v23 = vadd.f32 %v698_v62, %v696_v21 }
 0x274   :  { %v825_v24 = vrot.slane %v2485_v32, 4  ;;  %v807_v40 = vrot.slane %v2492_v50, 4  ;;  %v764_v11 = vadd.f32 %v763_v57, %v2461_v54 }
 0x275   :  { %v718_v13 = vadd.f32 %v717_v51, %v715_v61  ;;  %v682_v22 = vadd.f32 %v1732_v29, %v681_v63  ;;  %v655_v12 = vadd.f32 %v654_v30, %v652_v37  ;;  %v700_v27 = vadd.f32 %v699_v23, %v697_v33 }
 0x276   :  { %v826_v59 = vadd.f32 %v825_v24, %v2485_v32  ;;  %v808_v3 = vadd.f32 %v807_v40, %v2492_v50  ;;  %v765_v61 = vrot.slane %v764_v11, 2 }
 0x277   :  { %719 = vadd.xlane.f32.xlu1 %v718_v13  ;;  %683 = vadd.xlane.f32.xlu0 %v682_v22  ;;  %v656_v42 = vadd.f32 %v655_v12, %v653_v14 }
 0x278   :  { %v827_v51 = vrot.slane %v826_v59, 2  ;;  %v809_v37 = vrot.slane %v808_v3, 2  ;;  %v766_v23 = vadd.f32 %v765_v61, %v764_v11 }
 0x27a   :  { %v810_v7 = vadd.f32 %v809_v37, %v808_v3 }
 0x27b   :  { %701 = vadd.xlane.f32.xlu0 %v700_v27  ;;  %657 = vadd.xlane.f32.xlu1 %v656_v42  ;;  %v828_v42 = vadd.f32 %v827_v51, %v826_v59 }
 0x27d   :  { %v829_v40 = vrot.slane %v828_v42, 1 }
 0x28c   :  { %851 = vperm.xlu1 %1854, %v2333_v4  }
 0x290   :  { %859 = vperm.xlu1 %1854, %v2337_v0  }
 0x291   :  { %844 = vrot.lane.b32.xlu0 %v2341_v20, %s1954_s1 }
 0x294   :  { %1858 = vset.pattern.permute.xlu1 %v1962_v35 }
 0x295   :  { %855 = vperm.xlu0 %1855, %v2335_v8  }
 0x299   :  { %863 = vperm.xlu0 %1855, %v2341_v20  }
 0x29d   :  { %1856 = vset.pattern.permute.xlu0 %v1962_v35 }
 0x29e   :  { %1389 = vperm.xlu0 %1856, %v2482_v47  }
 0x2a2   :  { %1393 = vperm.xlu0 %1856, %v2479_v39  }
 0x2a6   :  { %1547 = vperm.xlu0 %1856, %v2518_v18  }
 0x2aa   :  { %1857 = vset.pattern.permute.xlu0 %v1963_v44 }
 0x2ab   :  { %975 = vperm.xlu0 %1857, %v2333_v4  }
 0x2af   :  { %979 = vperm.xlu0 %1857, %v2335_v8  }
 0x2b3   :  { %983 = vperm.xlu0 %1857, %v2337_v0  }
 0x2b7   :  { %987 = vperm.xlu0 %1857, %v2341_v20  }
 0x2bb   :  { %1629 = vperm.xlu0 %1857, %v2518_v18  }
 0x2bf   :  { %1633 = vperm.xlu0 %1857, %v2526_v56  }
 0x2c3   :  { %962 = vrot.lane.b32.xlu0 %v2333_v4, %s1955_s6  ;;  %v789_v4 = vrot.slane %v2463_v28, 4 }
 0x2c5   :  { %v790_v48 = vadd.f32 %v789_v4, %v2463_v28 }
 0x2c7   :  { %966 = vrot.lane.b32.xlu0 %v2337_v0, %s1955_s6  ;;  %v791_v1 = vrot.slane %v790_v48, 2 }
 0x2c9   :  { %v792_v27 = vadd.f32 %v791_v1, %v790_v48  ;;  %v830_v48 = vadd.f32 %v829_v40, %v828_v42 }
 0x2cb   :  { %1382 = vrot.lane.b32.xlu0 %v2482_v47, %s1954_s1 }
 0x2cf   :  { %1540 = vrot.lane.b32.xlu0 %v2518_v18, %s1954_s1 }
 0x2d3   :  { %1622 = vrot.lane.b32.xlu0 %v2518_v18, %s1955_s6 }
 0x304   :  { %v720_v0 = vpop.xlane.xlu1 %719  ;;  %v684_v26 = vpop.xlane.xlu0 %683 }
 0x305   :  { %v721_v19 = vrot.slane %v720_v0, 4  ;;  %v685_v52 = vrot.slane %v684_v26, 4 }
 0x307   :  { %v722_v36 = vadd.f32 %v721_v19, %v720_v0  ;;  %v686_v9 = vadd.f32 %v685_v52, %v684_v26  ;;  %v793_v26 = vrot.slane %v792_v27, 1  ;;  %v811_v52 = vrot.slane %v810_v7, 1 }
 0x308   :  { %v658_v16 = vpop.xlane.xlu1 %657  ;;  %v702_v60 = vpop.xlane.xlu0 %701 }
 0x309   :  { %v687_v5 = vrot.slane %v686_v9, 2  ;;  %v659_v46 = vrot.slane %v658_v16, 4  ;;  %v703_v21 = vrot.slane %v702_v60, 4  ;;  %v723_v6 = vrot.slane %v722_v36, 2 }
 0x30a   :  { %v812_v3 = vadd.f32 %v811_v52, %v810_v7 }
 0x30b   :  { %v660_v43 = vadd.f32 %v659_v46, %v658_v16  ;;  %v704_v62 = vadd.f32 %v703_v21, %v702_v60  ;;  %v688_v63 = vadd.f32 %v687_v5, %v686_v9  ;;  %v724_v29 = vadd.f32 %v723_v6, %v722_v36 }
 0x30c   :  { %v852_v54 = vpop.permute.xlu1 %851  ;;  %v845_v12 = vpop.permute.xlu0 %844  ;;  %v794_v9 = vadd.f32 %v793_v26, %v792_v27 }
 0x30d   :  { %v661_v30 = vrot.slane %v660_v43, 2  ;;  %v705_v28 = vrot.slane %v704_v62, 2  ;;  %v866_v32 = vmul.f32 %v2489_v15, %v852_v54  ;;  %v689_v14 = vrot.slane %v688_v63, 1 }
 0x30e   :  { %v725_v34 = vrot.slane %v724_v29, 1 }
 0x30f   :  { %v870_v13 = vadd.f32 %v866_v32, %v839_v10  ;;  %v662_v22 = vadd.f32 %v661_v30, %v660_v43  ;;  %v706_v50 = vadd.f32 %v705_v28, %v704_v62  ;;  %v767_v10 = vrot.slane %v766_v23, 1 }
 0x310   :  { %v860_v33 = vpop.permute.xlu1 %859  ;;  %v690_v0 = vadd.f32 %v689_v14, %v688_v63  ;;  %v726_v36 = vadd.f32 %v725_v34, %v724_v29 }
 0x311   :  { %v868_v35 = vmul.f32 %v2489_v15, %v860_v33  ;;  %v663_v55 = vrot.slane %v662_v22, 1  ;;  %v707_v17 = vrot.slane %v706_v50, 1  ;;  %v874_v44 = vmul.f32 %v870_v13, %v2312_v31 }
 0x313   :  { %v872_v2 = vadd.f32 %v868_v35, %v843_v25  ;;  %v664_v57 = vadd.f32 %v663_v55, %v662_v22  ;;  %v708_v4 = vadd.f32 %v707_v17, %v706_v50  ;;  %vm900_vm12 = vcmp.lt.f32.partialorder %v874_v44, 0.0 }
 0x314   :  { %v856_v24 = vpop.permute.xlu0 %855  ;;  %v768_v25 = vadd.f32 %v767_v10, %v766_v23  ;;  %v878_v16 = vmin.f32 %v874_v44, 0.0  ;;  %v944_v21 = vmul.f32 %v874_v44, %v874_v44 }
 0x315   :  { %v867_v19 = vmul.f32 %v2489_v15, %v856_v24  ;;  %1767 = vpush %v664_v57  ;;  %v876_v11 = vmul.f32 %v872_v2, %v2322_v49  ;;  %v1738_v49 = vsel %vm900_vm12, 1.0, %v2476_v58 }
 0x316   :  { %1769 = vpush %v690_v0 }
 0x317   :  { %v871_v31 = vadd.f32 %v867_v19, %v2539_v38  ;;  %1771 = vpush %v708_v4  ;;  %vm902_vm13 = vcmp.lt.f32.partialorder %v876_v11, 0.0  ;;  %v880_v46 = vmin.f32 %v876_v11, 0.0  ;;  %v926_v38 = vand.u32 2147483647, %v874_v44 }
 0x318   :  { %1773 = vpush %v726_v36  ;;  %v864_v59 = vpop.permute.xlu0 %863  ;;  %v946_v1 = vmul.f32 %v876_v11, %v876_v11  ;;  %v1740_v28 = vsel %vm902_vm13, 1.0, %v2476_v58  ;;  %v928_v29 = vand.u32 2147483647, %v876_v11  ;;  %v1724_v11 = vsel %vm485_vm0, 1.0, %v2476_v58 }
 0x319   :  { %v875_v60 = vmul.f32 %v871_v31, %v2305_v45  ;;  %1775 = vpush %v768_v25  ;;  %v869_v5 = vmul.f32 %v2489_v15, %v864_v59  ;;  %v882_v45 = vmul.f32 %v878_v16, %v878_v16  ;;  %v884_v32 = vmul.f32 %v880_v46, %v880_v46  ;;  %v1886_v46 = vld [vmem:[#allocation2 + $0x8] sm:$0xff] }
 0x31a   :  { %1777 = vpush %v794_v9 }
 0x31b   :  { %1779 = vpush %v812_v3  ;;  %v873_v6 = vadd.f32 %v869_v5, %v845_v12  ;;  %vm901_vm14 = vcmp.lt.f32.partialorder %v875_v60, 0.0  ;;  %v879_v61 = vmin.f32 %v875_v60, 0.0  ;;  %v945_v43 = vmul.f32 %v875_v60, %v875_v60 }
 0x31c   :  { %1781 = vpush %v830_v48  ;;  %v1739_v62 = vsel %vm901_vm14, 1.0, %v2476_v58  ;;  %v927_v51 = vand.u32 2147483647, %v875_v60 }
 0x31d   :  { %v877_v54 = vmul.f32 %v873_v6, %v2319_v41  ;;  %v912_v63 = vadd.f32 %v1739_v62, %v1738_v49  ;;  %v883_v37 = vmul.f32 %v879_v61, %v879_v61  ;;  %v948_v30 = vadd.f32 %v945_v43, %v944_v21  ;;  %v1887_v62 = vld [vmem:[#allocation2 + $0x18] sm:$0xff] }
 0x31e   :  { %v930_v13 = vadd.f32 %v927_v51, %v926_v38 }
 0x31f   :  { %vm903_vm15 = vcmp.lt.f32.partialorder %v877_v54, 0.0  ;;  %v913_v22 = vadd.f32 %v1740_v28, %v912_v63  ;;  %v881_v50 = vmin.f32 %v877_v54, 0.0  ;;  %v886_v23 = vadd.f32 %v883_v37, %v882_v45 }
 0x320   :  { %v1741_v12 = vsel %vm903_vm15, 1.0, %v2476_v58  ;;  %v947_v33 = vmul.f32 %v877_v54, %v877_v54  ;;  %v949_v14 = vadd.f32 %v948_v30, %v946_v1  ;;  %v929_v27 = vand.u32 2147483647, %v877_v54 }
 0x321   :  { %v914_v42 = vadd.f32 %v1741_v12, %v913_v22  ;;  %v885_v41 = vmul.f32 %v881_v50, %v881_v50  ;;  %v887_v35 = vadd.f32 %v886_v23, %v884_v32  ;;  %v931_v55 = vadd.f32 %v930_v13, %v928_v29 }
 0x322   :  { %v950_v44 = vadd.f32 %v949_v14, %v947_v33  ;;  %v1747_v54 = vsel %vm1299_vm1, 1.0, %v2476_v58  ;;  %v1318_v63 = vmin.f32 %v2482_v47, 0.0  ;;  %v1319_v37 = vmin.f32 %v2479_v39, 0.0 }
 0x323   :  { %915 = vadd.xlane.f32.xlu0 %v914_v42  ;;  %v888_v17 = vadd.f32 %v887_v35, %v885_v41  ;;  %v932_v7 = vadd.f32 %v931_v55, %v929_v27  ;;  %v1888_v35 = vld [vmem:[#allocation2 + $0x10] sm:$0xff] }
 0x325   :  { %889 = vadd.xlane.f32.xlu1 %v888_v17 }
 0x327   :  { %951 = vadd.xlane.f32.xlu0 %v950_v44 }
 0x336   :  { %1551 = vperm.xlu1 %1858, %v2526_v56  }
 0x33a   :  { %964 = vrot.lane.b32.xlu1 %v2335_v8, %s1955_s6  ;;  %v1390_v8 = vpop.permute.xlu0 %1389 }
 0x33b   :  { %v1396_v49 = vmul.f32 %v2489_v15, %v1390_v8 }
 0x33e   :  { %968 = vrot.lane.b32.xlu1 %v2341_v20, %s1955_s6  ;;  %v1394_v20 = vpop.permute.xlu0 %1393 }
 0x33f   :  { %v1397_v32 = vmul.f32 %v2489_v15, %v1394_v20 }
 0x342   :  { %1384 = vrot.lane.b32.xlu1 %v2479_v39, %s1954_s1  ;;  %v2574_v34 = vpop.permute.xlu0 %1547 }
 0x346   :  { %s1768_s15 = spop %1767  ;;  %1542 = vrot.lane.b32.xlu1 %v2526_v56, %s1954_s1  ;;  %v976_v2 = vpop.permute.xlu0 %975 }
 0x347   :  { %667 = sst [smem:[#allocation9 + $0x80]] %s1768_s15  ;;  %s1770_s16 = spop %1769  ;;  %v990_v31 = vmul.f32 %v1724_v11, %v976_v2 }
 0x348   :  { %693 = sst [smem:[#allocation9 + $0x81]] %s1770_s16  ;;  %s1772_s17 = spop %1771 }
 0x349   :  { %711 = sst [smem:[#allocation9 + $0x82]] %s1772_s17  ;;  %s1774_s18 = spop %1773 }
 0x34a   :  { %729 = sst [smem:[#allocation9 + $0x83]] %s1774_s18  ;;  %s1776_s21 = spop %1775  ;;  %1624 = vrot.lane.b32.xlu1 %v2526_v56, %s1955_s6  ;;  %v980_v57 = vpop.permute.xlu0 %979 }
 0x34b   :  { %771 = sst [smem:[#allocation9 + $0x100]] %s1776_s21  ;;  %s1778_s22 = spop %1777  ;;  %v991_v53 = vmul.f32 %v1724_v11, %v980_v57 }
 0x34c   :  { %797 = sst [smem:[#allocation9 + $0x101]] %s1778_s22  ;;  %s1780_s23 = spop %1779 }
 0x34d   :  { %815 = sst [smem:[#allocation9 + $0x102]] %s1780_s23  ;;  %s1782_s24 = spop %1781 }
 0x34e   :  { %833 = sst [smem:[#allocation9 + $0x103]] %s1782_s24  ;;  %v984_v4 = vpop.permute.xlu0 %983 }
 0x34f   :  { %v992_v9 = vmul.f32 %v1724_v11, %v984_v4 }
 0x352   :  { %v988_v10 = vpop.permute.xlu0 %987 }
 0x353   :  { %v993_v29 = vmul.f32 %v1724_v11, %v988_v10  ;;  %v1889_v11 = vld [vmem:[#allocation2 + $0x20] sm:$0xff] }
 0x356   :  { %v1630_v24 = vpop.permute.xlu0 %1629 }
 0x357   :  { %v1636_v23 = vmul.f32 %v1747_v54, %v1630_v24 }
 0x35a   :  { %v1634_v0 = vpop.permute.xlu0 %1633 }
 0x35b   :  { %v2600_v14 = vmul.f32 %v1747_v54, %v1634_v0 }
 0x35e   :  { %v963_v26 = vpop.permute.xlu0 %962 }
 0x35f   :  { %v994_v48 = vadd.f32 %v990_v31, %v963_v26 }
 0x361   :  { %v2584_v21 = vmul.f32 %v1886_v46, %v994_v48 }
 0x362   :  { %v967_v40 = vpop.permute.xlu0 %966 }
 0x363   :  { %v996_v60 = vadd.f32 %v992_v9, %v967_v40  ;;  %vm1024_vm2 = vcmp.lt.f32.partialorder %v2584_v21, 0.0  ;;  %v1002_v28 = vmin.f32 %v2584_v21, 0.0  ;;  %v1068_v41 = vmul.f32 %v2584_v21, %v2584_v21 }
 0x364   :  { %v1742_v27 = vsel %vm1024_vm2, 1.0, %v2476_v58  ;;  %v1050_v44 = vand.u32 2147483647, %v2584_v21 }
 0x365   :  { %v2588_v45 = vmul.f32 %v1887_v62, %v996_v60 }
 0x366   :  { %v1383_v19 = vpop.permute.xlu0 %1382 }
 0x367   :  { %v1398_v61 = vadd.f32 %v1396_v49, %v1383_v19  ;;  %vm1026_vm3 = vcmp.lt.f32.partialorder %v2588_v45, 0.0  ;;  %v1004_v42 = vmin.f32 %v2588_v45, 0.0  ;;  %v1070_v57 = vmul.f32 %v2588_v45, %v2588_v45 }
 0x368   :  { %v1744_v2 = vsel %vm1026_vm3, 1.0, %v2476_v58  ;;  %v1052_v19 = vand.u32 2147483647, %v2588_v45 }
 0x369   :  { %v2597_v13 = vmul.f32 %v1398_v61, %v2482_v47  ;;  %v1008_v26 = vmul.f32 %v1004_v42, %v1004_v42 }
 0x36a   :  { %v2576_v52 = vpop.permute.xlu0 %1540 }
 0x36b   :  { %vm1418_vm4 = vcmp.lt.f32.partialorder %v2597_v13, 0.0 }
 0x36c   :  { %v1750_v60 = vsel %vm1418_vm4, 1.0, %v2476_v58 }
 0x36e   :  { %933 = vadd.xlane.f32.xlu1 %v932_v7  ;;  %v2580_v36 = vpop.permute.xlu0 %1622  ;;  %v1006_v7 = vmul.f32 %v1002_v28, %v1002_v28 }
 0x3b0   :  { %v916_v25 = vpop.xlane.xlu0 %915 }
 0x3b1   :  { %v917_v59 = vrot.slane %v916_v25, 4 }
 0x3b2   :  { %v890_v16 = vpop.xlane.xlu1 %889 }
 0x3b3   :  { %v918_v3 = vadd.f32 %v917_v59, %v916_v25  ;;  %v891_v5 = vrot.slane %v890_v16, 4  ;;  %v1638_v59 = vadd.f32 %v1636_v23, %v2580_v36 }
 0x3b5   :  { %v919_v38 = vrot.slane %v918_v3, 2  ;;  %v892_v6 = vadd.f32 %v891_v5, %v890_v16  ;;  %v1450_v5 = vmul.f32 %v2597_v13, %v2597_v13  ;;  %v1640_v54 = vmul.f32 %v1638_v59, %v2482_v47 }
 0x3b6   :  { %v2586_v43 = vpop.permute.xlu1 %1551 }
 0x3b7   :  { %v893_v1 = vrot.slane %v892_v6, 2  ;;  %v920_v51 = vadd.f32 %v919_v38, %v918_v3  ;;  %v1402_v3 = vmin.f32 %v2597_v13, 0.0  ;;  %vm1658_vm10 = vcmp.lt.f32.partialorder %v1640_v54, 0.0 }
 0x3b9   :  { %v894_v30 = vadd.f32 %v893_v1, %v892_v6  ;;  %v921_v50 = vrot.slane %v920_v51, 1  ;;  %v1404_v28 = vmul.f32 %v1402_v3, %v1402_v3 }
 0x3ba   :  { %v965_v22 = vpop.permute.xlu1 %964 }
 0x3bb   :  { %v995_v12 = vadd.f32 %v991_v53, %v965_v22  ;;  %v895_v33 = vrot.slane %v894_v30, 1  ;;  %v922_v20 = vadd.f32 %v921_v50, %v920_v51 }
 0x3bd   :  { %v999_v55 = vmul.f32 %v1888_v35, %v995_v12  ;;  %v896_v17 = vadd.f32 %v895_v33, %v894_v30 }
 0x3be   :  { %v969_v8 = vpop.permute.xlu1 %968 }
 0x3bf   :  { %v997_v4 = vadd.f32 %v993_v29, %v969_v8  ;;  %1783 = vpush %v896_v17  ;;  %vm1025_vm5 = vcmp.lt.f32.partialorder %v999_v55, 0.0  ;;  %v1003_v10 = vmin.f32 %v999_v55, 0.0  ;;  %v1069_v24 = vmul.f32 %v999_v55, %v999_v55 }
 0x3c0   :  { %1785 = vpush %v922_v20  ;;  %v1743_v0 = vsel %vm1025_vm5, 1.0, %v2476_v58  ;;  %v1051_v40 = vand.u32 2147483647, %v999_v55 }
 0x3c1   :  { %v1001_v31 = vmul.f32 %v1889_v11, %v997_v4  ;;  %v1036_v25 = vadd.f32 %v1743_v0, %v1742_v27  ;;  %v1007_v9 = vmul.f32 %v1003_v10, %v1003_v10  ;;  %v1072_v48 = vadd.f32 %v1069_v24, %v1068_v41 }
 0x3c2   :  { %v1385_v16 = vpop.permute.xlu1 %1384  ;;  %v1054_v62 = vadd.f32 %v1051_v40, %v1050_v44  ;;  %v1366_v44 = vmul.f32 %v2482_v47, %v2482_v47  ;;  %v1749_v4 = vsel %vm1335_vm7, 1.0, %v2476_v58  ;;  %v1321_v10 = vmul.f32 %v1319_v37, %v1319_v37 }
 0x3c3   :  { %v1399_v49 = vadd.f32 %v1397_v32, %v1385_v16  ;;  %vm1027_vm8 = vcmp.lt.f32.partialorder %v1001_v31, 0.0  ;;  %v1037_v46 = vadd.f32 %v1744_v2, %v1036_v25  ;;  %v1005_v21 = vmin.f32 %v1001_v31, 0.0 }
 0x3c4   :  { %v1745_v38 = vsel %vm1027_vm8, 1.0, %v2476_v58  ;;  %v1010_v6 = vadd.f32 %v1007_v9, %v1006_v7  ;;  %v1071_v61 = vmul.f32 %v1001_v31, %v1001_v31  ;;  %v1073_v51 = vadd.f32 %v1072_v48, %v1070_v57 }
 0x3c5   :  { %v1401_v36 = vmul.f32 %v1399_v49, %v2479_v39  ;;  %v1038_v45 = vadd.f32 %v1745_v38, %v1037_v46  ;;  %v1009_v1 = vmul.f32 %v1005_v21, %v1005_v21  ;;  %v1436_v32 = vand.u32 2147483647, %v2597_v13 }
 0x3c6   :  { %v1543_v53 = vpop.permute.xlu1 %1542  ;;  %v1011_v30 = vadd.f32 %v1010_v6, %v1008_v26  ;;  %v1053_v29 = vand.u32 2147483647, %v1001_v31  ;;  %v1055_v12 = vadd.f32 %v1054_v62, %v1052_v19  ;;  %v1074_v42 = vadd.f32 %v1073_v51, %v1071_v61 }
 0x3c7   :  { %1039 = vadd.xlane.f32.xlu1 %v1038_v45  ;;  %vm1419_vm9 = vcmp.lt.f32.partialorder %v1401_v36, 0.0  ;;  %v1403_v22 = vmin.f32 %v1401_v36, 0.0  ;;  %v1451_v50 = vmul.f32 %v1401_v36, %v1401_v36  ;;  %v1437_v27 = vand.u32 2147483647, %v1401_v36 }
 0x3c8   :  { %v1012_v23 = vadd.f32 %v1011_v30, %v1009_v1  ;;  %v1751_v33 = vsel %vm1419_vm9, 1.0, %v2476_v58  ;;  %v1748_v13 = vsel %vm1334_vm6, 1.0, %v2476_v58  ;;  %v1320_v7 = vmul.f32 %v1318_v63, %v1318_v63 }
 0x3c9   :  { %v1424_v41 = vadd.f32 %v1751_v33, %v1750_v60  ;;  %v1405_v35 = vmul.f32 %v1403_v22, %v1403_v22  ;;  %v1452_v55 = vadd.f32 %v1451_v50, %v1450_v5  ;;  %v1438_v8 = vadd.f32 %v1437_v27, %v1436_v32 }
 0x3ca   :  { %1013 = vadd.xlane.f32.xlu0 %v1012_v23  ;;  %v1625_v17 = vpop.permute.xlu1 %1624  ;;  %v1056_v57 = vadd.f32 %v1055_v12, %v1053_v29  ;;  %v1367_v63 = vmul.f32 %v2479_v39, %v2479_v39  ;;  %v1340_v0 = vadd.f32 %v1749_v4, %v1748_v13  ;;  %v1642_v26 = vmin.f32 %v1640_v54, 0.0 }
 0x3cb   :  { %v1639_v20 = vadd.f32 %v2600_v14, %v1625_v17  ;;  %1075 = vadd.xlane.f32.xlu1 %v1074_v42  ;;  %v1406_v2 = vadd.f32 %v1405_v35, %v1404_v28  ;;  %v1322_v14 = vadd.f32 %v1321_v10, %v1320_v7  ;;  %v1352_v19 = vand.u32 2147483647, %v2482_v47 }
 0x3cc   :  { %v1368_v40 = vadd.f32 %v1367_v63, %v1366_v44  ;;  %v1690_v31 = vmul.f32 %v1640_v54, %v1640_v54  ;;  %v1757_v37 = vsel %vm1658_vm10, 1.0, %v2476_v58  ;;  %v1676_v48 = vand.u32 2147483647, %v1640_v54 }
 0x3cd   :  { %v1641_v24 = vmul.f32 %v1639_v20, %v2479_v39  ;;  %v1644_v60 = vmul.f32 %v1642_v26, %v1642_v26  ;;  %v1353_v49 = vand.u32 2147483647, %v2479_v39  ;;  %v1474_v21 = vmul.f32 %v2518_v18, %v2482_v47  ;;  %v952_v20 = vpop.xlane.xlu0 %951 }
 0x3ce   :  { %1057 = vadd.xlane.f32.xlu0 %v1056_v57  ;;  %v1475_v38 = vmul.f32 %v2526_v56, %v2479_v39  ;;  %v1555_v62 = vmul.f32 %v2489_v15, %v2586_v43  ;;  %v1554_v36 = vmul.f32 %v2489_v15, %v2574_v34 }
 0x3cf   :  { %1341 = vadd.xlane.f32.xlu1 %v1340_v0  ;;  %vm1659_vm11 = vcmp.lt.f32.partialorder %v1641_v24, 0.0  ;;  %v1643_v11 = vmin.f32 %v1641_v24, 0.0  ;;  %v1691_v25 = vmul.f32 %v1641_v24, %v1641_v24  ;;  %v1677_v59 = vand.u32 2147483647, %v1641_v24 }
 0x3d0   :  { %v1758_v9 = vsel %vm1659_vm11, 1.0, %v2476_v58  ;;  %v1354_v61 = vadd.f32 %v1353_v49, %v1352_v19  ;;  %v1557_v45 = vadd.f32 %v1555_v62, %v1543_v53  ;;  %vm1492_vm12 = vcmp.lt.f32.partialorder %v1474_v21, 0.0 }
 0x3d1   :  { %v1664_v16 = vadd.f32 %v1758_v9, %v1757_v37  ;;  %v1645_v3 = vmul.f32 %v1643_v11, %v1643_v11  ;;  %v2648_v5 = vadd.f32 %v1691_v25, %v1690_v31  ;;  %v2651_v46 = vadd.f32 %v1677_v59, %v1676_v48 }
 0x3d2   :  { %1323 = vadd.xlane.f32.xlu0 %v1322_v14  ;;  %vm1493_vm13 = vcmp.lt.f32.partialorder %v1475_v38, 0.0  ;;  %v1476_v1 = vmin.f32 %v1474_v21, 0.0  ;;  %v1477_v51 = vmin.f32 %v1475_v38, 0.0  ;;  %v1556_v18 = vadd.f32 %v1554_v36, %v2576_v52 }
 0x3d3   :  { %1369 = vadd.xlane.f32.xlu1 %v1368_v40  ;;  %v1646_v6 = vadd.f32 %v1645_v3, %v1644_v60  ;;  %v1753_v56 = vsel %vm1492_vm12, 1.0, %v2476_v58  ;;  %v1754_v54 = vsel %vm1493_vm13, 1.0, %v2476_v58  ;;  %v1559_v30 = vmul.f32 %v1557_v45, %v2479_v39 }
 0x3d4   :  { %v1478_v43 = vmul.f32 %v1476_v1, %v1476_v1  ;;  %v1479_v28 = vmul.f32 %v1477_v51, %v1477_v51  ;;  %v1558_v15 = vmul.f32 %v1556_v18, %v2482_v47  ;;  %v1498_v34 = vadd.f32 %v1754_v54, %v1753_v56 }
 0x3d5   :  { %v1524_v53 = vmul.f32 %v1474_v21, %v1474_v21  ;;  %v1525_v32 = vmul.f32 %v1475_v38, %v1475_v38  ;;  %vm1577_vm14 = vcmp.lt.f32.partialorder %v1559_v30, 0.0  ;;  %v1510_v52 = vand.u32 2147483647, %v1474_v21 }
 0x3d6   :  { %1355 = vadd.xlane.f32.xlu0 %v1354_v61  ;;  %v1480_v29 = vadd.f32 %v1479_v28, %v1478_v43  ;;  %v1511_v22 = vand.u32 2147483647, %v1475_v38  ;;  %v1561_v50 = vmin.f32 %v1559_v30, 0.0  ;;  %vm1576_vm15 = vcmp.lt.f32.partialorder %v1558_v15, 0.0 }
 0x3d7   :  { %1425 = vadd.xlane.f32.xlu1 %v1424_v41  ;;  %v1526_v23 = vadd.f32 %v1525_v32, %v1524_v53  ;;  %v1756_v39 = vsel %vm1577_vm14, 1.0, %v2476_v58  ;;  %v1560_v12 = vmin.f32 %v1558_v15, 0.0  ;;  %v1755_v47 = vsel %vm1576_vm15, 1.0, %v2476_v58 }
 0x3d8   :  { %v1512_v33 = vadd.f32 %v1511_v22, %v1510_v52  ;;  %v1563_v27 = vmul.f32 %v1561_v50, %v1561_v50  ;;  %v1582_v42 = vadd.f32 %v1756_v39, %v1755_v47  ;;  %v1609_v41 = vmul.f32 %v1559_v30, %v1559_v30 }
 0x3d9   :  { %v1562_v35 = vmul.f32 %v1560_v12, %v1560_v12  ;;  %v1595_v13 = vand.u32 2147483647, %v1559_v30  ;;  %v1594_v44 = vand.u32 2147483647, %v1558_v15  ;;  %v953_v58 = vrot.slane %v952_v20, 4 }
 0x3da   :  { %1407 = vadd.xlane.f32.xlu0 %v1406_v2 }
 0x3db   :  { %1453 = vadd.xlane.f32.xlu1 %v1452_v55  ;;  %v1608_v55 = vmul.f32 %v1558_v15, %v1558_v15  ;;  %v1564_v17 = vadd.f32 %v1563_v27, %v1562_v35  ;;  %v954_v2 = vadd.f32 %v953_v58, %v952_v20 }
 0x3dd   :  { %v1610_v7 = vadd.f32 %v1609_v41, %v1608_v55  ;;  %v955_v57 = vrot.slane %v954_v2, 2 }
 0x3de   :  { %1439 = vadd.xlane.f32.xlu0 %v1438_v8  ;;  %v1596_v8 = vadd.f32 %v1595_v13, %v1594_v44 }
 0x3df   :  { %1499 = vadd.xlane.f32.xlu1 %v1498_v34  ;;  %v956_v24 = vadd.f32 %v955_v57, %v954_v2 }
 0x3e1   :  { %v957_v14 = vrot.slane %v956_v24, 1 }
 0x3e2   :  { %1481 = vadd.xlane.f32.xlu0 %v1480_v29 }
 0x3e3   :  { %1527 = vadd.xlane.f32.xlu1 %v1526_v23  ;;  %v958_v11 = vadd.f32 %v957_v14, %v956_v24 }
 0x3e6   :  { %1513 = vadd.xlane.f32.xlu0 %v1512_v33 }
 0x3e7   :  { %1583 = vadd.xlane.f32.xlu1 %v1582_v42 }
 0x3ea   :  { %1565 = vadd.xlane.f32.xlu0 %v1564_v17 }
 0x3eb   :  { %1611 = vadd.xlane.f32.xlu1 %v1610_v7 }
 0x3ee   :  { %1597 = vadd.xlane.f32.xlu0 %v1596_v8 }
 0x3ef   :  { %1665 = vadd.xlane.f32.xlu1 %v1664_v16 }
 0x3f0   :  { %s1784_s25 = spop %1783 }
 0x3f1   :  { %899 = sst [smem:[#allocation9 + $0x180]] %s1784_s25  ;;  %s1786_s26 = spop %1785 }
 0x3f2   :  { %925 = sst [smem:[#allocation9 + $0x181]] %s1786_s26  ;;  %1647 = vadd.xlane.f32.xlu0 %v1646_v6 }
 0x3f3   :  { %1693 = vadd.xlane.f32.xlu1 %v2648_v5 }
 0x3f6   :  { %1679 = vadd.xlane.f32.xlu0 %v2651_v46 }
 0x3fb   :  { %v934_v4 = vpop.xlane.xlu1 %933 }
 0x3fc   :  { %v935_v10 = vrot.slane %v934_v4, 4 }
 0x3fe   :  { %v936_v63 = vadd.f32 %v935_v10, %v934_v4 }
 0x400   :  { %v937_v0 = vrot.slane %v936_v63, 2 }
 0x402   :  { %v938_v26 = vadd.f32 %v937_v0, %v936_v63 }
 0x404   :  { %v939_v40 = vrot.slane %v938_v26, 1 }
 0x406   :  { %v940_v19 = vadd.f32 %v939_v40, %v938_v26 }
 0x408   :  { %1787 = vpush %v940_v19 }
 0x409   :  { %1789 = vpush %v958_v11 }
 0x439   :  { %s1788_s27 = spop %1787 }
 0x43a   :  { %943 = sst [smem:[#allocation9 + $0x182]] %s1788_s27  ;;  %s1790_s28 = spop %1789 }
 0x43b   :  { %961 = sst [smem:[#allocation9 + $0x183]] %s1790_s28  ;;  %s1934_s27 = scalar_lea.hbm %s2687_s2, 256 }
 0x43c   :  { %p1935_p2 = scmp.ne.s32.totalorder %s2687_s2, %s1934_s27  ;;  %p1938_p3 = scmp.lt.u32.totalorder %s1934_s27, %s2687_s2 }
 0x43e   :  { %p1940_p4 = pnand %p1938_p3, %p1935_p2 }
 0x454   :  { %v1040_v31 = vpop.xlane.xlu1 %1039 }
 0x455   :  { %v1041_v25 = vrot.slane %v1040_v31, 4 }
 0x457   :  { %v1042_v37 = vadd.f32 %v1041_v25, %v1040_v31  ;;  %v1014_v9 = vpop.xlane.xlu0 %1013 }
 0x458   :  { %v1015_v48 = vrot.slane %v1014_v9, 4  ;;  %v1076_v59 = vpop.xlane.xlu1 %1075 }
 0x459   :  { %v1043_v16 = vrot.slane %v1042_v37, 2  ;;  %v1077_v60 = vrot.slane %v1076_v59, 4 }
 0x45a   :  { %v1016_v3 = vadd.f32 %v1015_v48, %v1014_v9 }
 0x45b   :  { %v1078_v5 = vadd.f32 %v1077_v60, %v1076_v59  ;;  %v1058_v49 = vpop.xlane.xlu0 %1057  ;;  %v1044_v46 = vadd.f32 %v1043_v16, %v1042_v37 }
 0x45c   :  { %v1017_v21 = vrot.slane %v1016_v3, 2  ;;  %v1059_v38 = vrot.slane %v1058_v49, 4  ;;  %v1342_v6 = vpop.xlane.xlu1 %1341 }
 0x45d   :  { %v1079_v61 = vrot.slane %v1078_v5, 2  ;;  %v1343_v62 = vrot.slane %v1342_v6, 4  ;;  %v1045_v18 = vrot.slane %v1044_v46, 1 }
 0x45e   :  { %v1060_v36 = vadd.f32 %v1059_v38, %v1058_v49  ;;  %v1018_v45 = vadd.f32 %v1017_v21, %v1016_v3 }
 0x45f   :  { %v1344_v1 = vadd.f32 %v1343_v62, %v1342_v6  ;;  %v1324_v51 = vpop.xlane.xlu0 %1323  ;;  %v1080_v56 = vadd.f32 %v1079_v61, %v1078_v5  ;;  %v1046_v50 = vadd.f32 %v1045_v18, %v1044_v46 }
 0x460   :  { %v1061_v54 = vrot.slane %v1060_v36, 2  ;;  %v1325_v30 = vrot.slane %v1324_v51, 4  ;;  %v1370_v43 = vpop.xlane.xlu1 %1369  ;;  %v1019_v28 = vrot.slane %v1018_v45, 1 }
 0x461   :  { %v1345_v15 = vrot.slane %v1344_v1, 2  ;;  %v1371_v34 = vrot.slane %v1370_v43, 4  ;;  %v1081_v23 = vrot.slane %v1080_v56, 1 }
 0x462   :  { %v1326_v53 = vadd.f32 %v1325_v30, %v1324_v51  ;;  %v1020_v32 = vadd.f32 %v1019_v28, %v1018_v45  ;;  %v1062_v29 = vadd.f32 %v1061_v54, %v1060_v36 }
 0x463   :  { %v1372_v52 = vadd.f32 %v1371_v34, %v1370_v43  ;;  %v1356_v22 = vpop.xlane.xlu0 %1355  ;;  %v1346_v39 = vadd.f32 %v1345_v15, %v1344_v1  ;;  %v1082_v44 = vadd.f32 %v1081_v23, %v1080_v56 }
 0x464   :  { %v1327_v12 = vrot.slane %v1326_v53, 2  ;;  %v1357_v33 = vrot.slane %v1356_v22, 4  ;;  %1791 = vpush %v1020_v32  ;;  %v1426_v47 = vpop.xlane.xlu1 %1425  ;;  %v1063_v27 = vrot.slane %v1062_v29, 1 }
 0x465   :  { %v1373_v42 = vrot.slane %v1372_v52, 2  ;;  %1793 = vpush %v1046_v50  ;;  %v1427_v41 = vrot.slane %v1426_v47, 4  ;;  %v1347_v8 = vrot.slane %v1346_v39, 1 }
 0x466   :  { %v1358_v35 = vadd.f32 %v1357_v33, %v1356_v22  ;;  %v1064_v55 = vadd.f32 %v1063_v27, %v1062_v29  ;;  %v1328_v17 = vadd.f32 %v1327_v12, %v1326_v53 }
 0x467   :  { %v1428_v13 = vadd.f32 %v1427_v41, %v1426_v47  ;;  %v1408_v7 = vpop.xlane.xlu0 %1407  ;;  %v1374_v20 = vadd.f32 %v1373_v42, %v1372_v52  ;;  %v1348_v19 = vadd.f32 %v1347_v8, %v1346_v39 }
 0x468   :  { %v1359_v58 = vrot.slane %v1358_v35, 2  ;;  %v1409_v2 = vrot.slane %v1408_v7, 4  ;;  %1795 = vpush %v1064_v55  ;;  %v1454_v57 = vpop.xlane.xlu1 %1453  ;;  %v1329_v4 = vrot.slane %v1328_v17, 1 }
 0x469   :  { %v1429_v10 = vrot.slane %v1428_v13, 2  ;;  %1797 = vpush %v1082_v44  ;;  %v1455_v63 = vrot.slane %v1454_v57, 4  ;;  %v1375_v11 = vrot.slane %v1374_v20, 1 }
 0x46a   :  { %v1410_v24 = vadd.f32 %v1409_v2, %v1408_v7  ;;  %v1330_v0 = vadd.f32 %v1329_v4, %v1328_v17  ;;  %v1360_v26 = vadd.f32 %v1359_v58, %v1358_v35 }
 0x46b   :  { %v1456_v14 = vadd.f32 %v1455_v63, %v1454_v57  ;;  %v1440_v40 = vpop.xlane.xlu0 %1439  ;;  %v1430_v31 = vadd.f32 %v1429_v10, %v1428_v13  ;;  %v1376_v21 = vadd.f32 %v1375_v11, %v1374_v20 }
 0x46c   :  { %v1411_v25 = vrot.slane %v1410_v24, 2  ;;  %v1441_v37 = vrot.slane %v1440_v40, 4  ;;  %1799 = vpush %v1330_v0  ;;  %v1500_v9 = vpop.xlane.xlu1 %1499  ;;  %v1361_v48 = vrot.slane %v1360_v26, 1 }
 0x46d   :  { %v1457_v59 = vrot.slane %v1456_v14, 2  ;;  %1801 = vpush %v1348_v19  ;;  %v1501_v16 = vrot.slane %v1500_v9, 4  ;;  %v1431_v38 = vrot.slane %v1430_v31, 1 }
 0x46e   :  { %v1442_v60 = vadd.f32 %v1441_v37, %v1440_v40  ;;  %v1362_v3 = vadd.f32 %v1361_v48, %v1360_v26  ;;  %v1412_v5 = vadd.f32 %v1411_v25, %v1410_v24 }
 0x46f   :  { %v1502_v49 = vadd.f32 %v1501_v16, %v1500_v9  ;;  %v1482_v46 = vpop.xlane.xlu0 %1481  ;;  %v1458_v6 = vadd.f32 %v1457_v59, %v1456_v14  ;;  %v1432_v28 = vadd.f32 %v1431_v38, %v1430_v31 }
 0x470   :  { %v1443_v61 = vrot.slane %v1442_v60, 2  ;;  %v1483_v62 = vrot.slane %v1482_v46, 4  ;;  %1803 = vpush %v1362_v3  ;;  %v1528_v36 = vpop.xlane.xlu1 %1527  ;;  %v1413_v45 = vrot.slane %v1412_v5, 1 }
 0x471   :  { %v1503_v1 = vrot.slane %v1502_v49, 2  ;;  %1805 = vpush %v1376_v21  ;;  %v1529_v51 = vrot.slane %v1528_v36, 4  ;;  %v1459_v15 = vrot.slane %v1458_v6, 1 }
 0x472   :  { %v1484_v18 = vadd.f32 %v1483_v62, %v1482_v46  ;;  %v1414_v56 = vadd.f32 %v1413_v45, %v1412_v5  ;;  %v1444_v54 = vadd.f32 %v1443_v61, %v1442_v60 }
 0x473   :  { %v1530_v30 = vadd.f32 %v1529_v51, %v1528_v36  ;;  %v1514_v43 = vpop.xlane.xlu0 %1513  ;;  %v1504_v34 = vadd.f32 %v1503_v1, %v1502_v49  ;;  %v1460_v27 = vadd.f32 %v1459_v15, %v1458_v6 }
 0x474   :  { %v1485_v53 = vrot.slane %v1484_v18, 2  ;;  %v1515_v32 = vrot.slane %v1514_v43, 4  ;;  %1807 = vpush %v1414_v56  ;;  %v1584_v29 = vpop.xlane.xlu1 %1583  ;;  %v1445_v52 = vrot.slane %v1444_v54, 1 }
 0x475   :  { %v1531_v22 = vrot.slane %v1530_v30, 2  ;;  %1809 = vpush %v1432_v28  ;;  %v1585_v50 = vrot.slane %v1584_v29, 4  ;;  %v1505_v42 = vrot.slane %v1504_v34, 1 }
 0x476   :  { %v1516_v23 = vadd.f32 %v1515_v32, %v1514_v43  ;;  %v1446_v39 = vadd.f32 %v1445_v52, %v1444_v54  ;;  %v1486_v12 = vadd.f32 %v1485_v53, %v1484_v18 }
 0x477   :  { %v1586_v33 = vadd.f32 %v1585_v50, %v1584_v29  ;;  %v1566_v47 = vpop.xlane.xlu0 %1565  ;;  %v1532_v41 = vadd.f32 %v1531_v22, %v1530_v30  ;;  %v1506_v4 = vadd.f32 %v1505_v42, %v1504_v34 }
 0x478   :  { %v1517_v35 = vrot.slane %v1516_v23, 2  ;;  %v1567_v55 = vrot.slane %v1566_v47, 4  ;;  %1811 = vpush %v1446_v39  ;;  %v1612_v17 = vpop.xlane.xlu1 %1611  ;;  %v1487_v13 = vrot.slane %v1486_v12, 1 }
 0x479   :  { %v1587_v7 = vrot.slane %v1586_v33, 2  ;;  %1813 = vpush %v1460_v27  ;;  %v1613_v44 = vrot.slane %v1612_v17, 4  ;;  %v1533_v10 = vrot.slane %v1532_v41, 1 }
 0x47a   :  { %v1568_v8 = vadd.f32 %v1567_v55, %v1566_v47  ;;  %v1488_v20 = vadd.f32 %v1487_v13, %v1486_v12  ;;  %v1518_v58 = vadd.f32 %v1517_v35, %v1516_v23 }
 0x47b   :  { %v1614_v2 = vadd.f32 %v1613_v44, %v1612_v17  ;;  %v1598_v57 = vpop.xlane.xlu0 %1597  ;;  %v1588_v63 = vadd.f32 %v1587_v7, %v1586_v33  ;;  %v1534_v48 = vadd.f32 %v1533_v10, %v1532_v41 }
 0x47c   :  { %v1569_v24 = vrot.slane %v1568_v8, 2  ;;  %v1599_v0 = vrot.slane %v1598_v57, 4  ;;  %1815 = vpush %v1488_v20  ;;  %v1666_v26 = vpop.xlane.xlu1 %1665  ;;  %v1519_v14 = vrot.slane %v1518_v58, 1 }
 0x47d   :  { %v1615_v40 = vrot.slane %v1614_v2, 2  ;;  %1817 = vpush %v1506_v4  ;;  %v1667_v19 = vrot.slane %v1666_v26, 4  ;;  %v1589_v59 = vrot.slane %v1588_v63, 1 }
 0x47e   :  { %v1600_v11 = vadd.f32 %v1599_v0, %v1598_v57  ;;  %v1520_v31 = vadd.f32 %v1519_v14, %v1518_v58  ;;  %v1570_v25 = vadd.f32 %v1569_v24, %v1568_v8 }
 0x47f   :  { %v1668_v37 = vadd.f32 %v1667_v19, %v1666_v26  ;;  %v1648_v9 = vpop.xlane.xlu0 %1647  ;;  %v1616_v16 = vadd.f32 %v1615_v40, %v1614_v2  ;;  %v1590_v45 = vadd.f32 %v1589_v59, %v1588_v63 }
 0x480   :  { %v1601_v60 = vrot.slane %v1600_v11, 2  ;;  %v1649_v3 = vrot.slane %v1648_v9, 4  ;;  %1819 = vpush %v1520_v31  ;;  %v1694_v5 = vpop.xlane.xlu1 %1693  ;;  %v1571_v49 = vrot.slane %v1570_v25, 1 }
 0x481   :  { %v1669_v46 = vrot.slane %v1668_v37, 2  ;;  %1821 = vpush %v1534_v48  ;;  %v1695_v21 = vrot.slane %v1694_v5, 4  ;;  %v1617_v1 = vrot.slane %v1616_v16, 1 }
 0x482   :  { %v1650_v38 = vadd.f32 %v1649_v3, %v1648_v9  ;;  %v1572_v6 = vadd.f32 %v1571_v49, %v1570_v25  ;;  %v1602_v61 = vadd.f32 %v1601_v60, %v1600_v11 }
 0x483   :  { %v1696_v62 = vadd.f32 %v1695_v21, %v1694_v5  ;;  %v1680_v36 = vpop.xlane.xlu0 %1679  ;;  %v1670_v51 = vadd.f32 %v1669_v46, %v1668_v37  ;;  %v1618_v53 = vadd.f32 %v1617_v1, %v1616_v16 }
 0x484   :  { %v1651_v18 = vrot.slane %v1650_v38, 2  ;;  %v1681_v56 = vrot.slane %v1680_v36, 4  ;;  %1823 = vpush %v1572_v6  ;;  %v1603_v54 = vrot.slane %v1602_v61, 1 }
 0x485   :  { %v1697_v30 = vrot.slane %v1696_v62, 2  ;;  %1825 = vpush %v1590_v45  ;;  %v1671_v32 = vrot.slane %v1670_v51, 1 }
 0x486   :  { %v1682_v43 = vadd.f32 %v1681_v56, %v1680_v36  ;;  %v1604_v28 = vadd.f32 %v1603_v54, %v1602_v61  ;;  %v1652_v15 = vadd.f32 %v1651_v18, %v1650_v38 }
 0x487   :  { %v1698_v34 = vadd.f32 %v1697_v30, %v1696_v62  ;;  %v1672_v23 = vadd.f32 %v1671_v32, %v1670_v51 }
 0x488   :  { %v1683_v29 = vrot.slane %v1682_v43, 2  ;;  %1827 = vpush %v1604_v28  ;;  %v1653_v52 = vrot.slane %v1652_v15, 1 }
 0x489   :  { %1829 = vpush %v1618_v53  ;;  %v1699_v39 = vrot.slane %v1698_v34, 1 }
 0x48a   :  { %v1684_v22 = vadd.f32 %v1683_v29, %v1682_v43  ;;  %v1654_v50 = vadd.f32 %v1653_v52, %v1652_v15 }
 0x48b   :  { %v1700_v47 = vadd.f32 %v1699_v39, %v1698_v34 }
 0x48c   :  { %1831 = vpush %v1654_v50  ;;  %v1685_v12 = vrot.slane %v1684_v22, 1 }
 0x48d   :  { %1833 = vpush %v1672_v23 }
 0x48e   :  { %v1686_v33 = vadd.f32 %v1685_v12, %v1684_v22 }
 0x490   :  { %1835 = vpush %v1686_v33 }
 0x491   :  { %1837 = vpush %v1700_v47 }
 0x495   :  { %s1792_s29 = spop %1791 }
 0x496   :  { %1023 = sst [smem:[#allocation9 + $0x200]] %s1792_s29  ;;  %s1794_s30 = spop %1793 }
 0x497   :  { %1049 = sst [smem:[#allocation9 + $0x201]] %s1794_s30 }
 0x499   :  { %s1796_s3 = spop %1795 }
 0x49a   :  { %1067 = sst [smem:[#allocation9 + $0x202]] %s1796_s3  ;;  %s1798_s4 = spop %1797 }
 0x49b   :  { %1085 = sst [smem:[#allocation9 + $0x203]] %s1798_s4 }
 0x49d   :  { %s1800_s0 = spop %1799 }
 0x49e   :  { %1333 = sst [smem:[#allocation9 + $0x280]] %s1800_s0  ;;  %s1802_s5 = spop %1801 }
 0x49f   :  { %1351 = sst [smem:[#allocation9 + $0x281]] %s1802_s5 }
 0x4a1   :  { %s1804_s1 = spop %1803 }
 0x4a2   :  { %1365 = sst [smem:[#allocation9 + $0x282]] %s1804_s1  ;;  %s1806_s6 = spop %1805 }
 0x4a3   :  { %1379 = sst [smem:[#allocation9 + $0x283]] %s1806_s6 }
 0x4a5   :  { %s1808_s7 = spop %1807 }
 0x4a6   :  { %1417 = sst [smem:[#allocation9 + $0x300]] %s1808_s7  ;;  %s1810_s8 = spop %1809 }
 0x4a7   :  { %1435 = sst [smem:[#allocation9 + $0x301]] %s1810_s8 }
 0x4a9   :  { %s1812_s9 = spop %1811 }
 0x4aa   :  { %1449 = sst [smem:[#allocation9 + $0x302]] %s1812_s9  ;;  %s1814_s10 = spop %1813 }
 0x4ab   :  { %1463 = sst [smem:[#allocation9 + $0x303]] %s1814_s10 }
 0x4ad   :  { %s1816_s11 = spop %1815 }
 0x4ae   :  { %1491 = sst [smem:[#allocation9 + $0x380]] %s1816_s11  ;;  %s1818_s12 = spop %1817 }
 0x4af   :  { %1509 = sst [smem:[#allocation9 + $0x381]] %s1818_s12 }
 0x4b1   :  { %s1820_s13 = spop %1819 }
 0x4b2   :  { %1523 = sst [smem:[#allocation9 + $0x382]] %s1820_s13  ;;  %s1822_s14 = spop %1821 }
 0x4b3   :  { %1537 = sst [smem:[#allocation9 + $0x383]] %s1822_s14 }
 0x4b5   :  { %s1824_s15 = spop %1823 }
 0x4b6   :  { %1575 = sst [smem:[#allocation9 + $0x400]] %s1824_s15  ;;  %s1826_s16 = spop %1825 }
 0x4b7   :  { %1593 = sst [smem:[#allocation9 + $0x401]] %s1826_s16 }
 0x4b9   :  { %s1828_s17 = spop %1827 }
 0x4ba   :  { %1607 = sst [smem:[#allocation9 + $0x402]] %s1828_s17  ;;  %s1830_s18 = spop %1829 }
 0x4bb   :  { %1621 = sst [smem:[#allocation9 + $0x403]] %s1830_s18 }
 0x4bd   :  { %s1832_s21 = spop %1831 }
 0x4be   :  { %1657 = sst [smem:[#allocation9 + $0x480]] %s1832_s21  ;;  %s1834_s22 = spop %1833 }
 0x4bf   :  { %1675 = sst [smem:[#allocation9 + $0x481]] %s1834_s22 }
 0x4c1   :  { %s1836_s23 = spop %1835 }
 0x4c2   :  { %1689 = sst [smem:[#allocation9 + $0x482]] %s1836_s23  ;;  %s1838_s24 = spop %1837 }
 0x4c3   :  { %1703 = sst [smem:[#allocation9 + $0x483]] %s1838_s24 }
 0x4c4   :  { %1943 = shalt.err (!%p1940_p4)
}
 0x4c5   :  { %s1964_s4 = smov [#allocation9]  }
 0x4c6   :  { %1713 = dma.smem_to_hbm %s1964_s4, 256, %s2687_s2, [#allocation6], %s1951_s19, %s1951_s19, %s1952_s20  }
 0x4c7   :  { %1948 = dma.done.wait [#allocation6], 256  }
 0x4c8   :  { %1949 = vsyncadd [#allocation6], 4294967040 }
 0x4c9   :  { %1717 = sfence }
 0x4ca   :  { %1718 = vsyncpa [#allocation5], 1 }
 0x4cb   :  { %1719 = vsyncpa [#allocation8], 1 }
 0x4cc   :  { %1720 = vsyncpa [#allocation6], 1 }

</bundles_post_ra>
